<compile_context>
chip_gen: v7x
topology: tpu7x:2x2x1
jax: 0.10.0
libtpu: 0.0.40
codegen_flags: <defaults>
</compile_context>

<pallas_src>
import functools

import jax
import jax.numpy as jnp
from jax import lax
from jax.experimental import pallas as pl
from jax.experimental.pallas import tpu as pltpu


# ----------------------------------------------------------------------------
# In-kernel building blocks (operate on VMEM values, channels-first (C, H*W))
# ----------------------------------------------------------------------------
def _conv3x3_bn_relu_cf(x_bf, w_ref, s, b, W, wcol):
    """3x3 stride-1 SAME conv + folded BN + ReLU, channels-first.

    x_bf : (Cin, H*W) bf16, spatial flattened row-major along the lane dim.
    w_ref: (3, 3, Cout, Cin) bf16 VMEM ref; tap [kh,kw] is (Cout, Cin).
    s, b : (Cout, 1) f32 folded BatchNorm scale / bias.
    wcol : (1, H*W) int32 = (flat spatial index) % W   (hoisted by caller).
    Returns (Cout, H*W) f32.
    """
    Cin, HW = x_bf.shape
    Cout = w_ref.shape[2]

    # SAME padding along H is realized by a flat zero pad of W+1 on both ends;
    # SAME padding along W is realized by zeroing the column a +/-1 horizontal
    # tap must never read (it would otherwise wrap to the neighbouring row).
    zpad = jnp.zeros((Cin, W + 1), x_bf.dtype)
    z = jnp.zeros_like(x_bf)
    x_km1 = jnp.where(wcol == (W - 1), z, x_bf)   # consumed by kw = -1 taps
    x_kp1 = jnp.where(wcol == 0, z, x_bf)         # consumed by kw = +1 taps
    planes = {
        -1: jnp.concatenate([zpad, x_km1, zpad], axis=1),
        0: jnp.concatenate([zpad, x_bf, zpad], axis=1),
        1: jnp.concatenate([zpad, x_kp1, zpad], axis=1),
    }

    acc = jnp.zeros((Cout, HW), jnp.float32)
    for kh in (-1, 0, 1):                          # 9 full-size MXU matmuls
        for kw in (-1, 0, 1):
            off = (W + 1) + kh * W + kw            # static Python int offset
            rhs = planes[kw][:, off:off + HW]      # shifted (Cin, H*W) slab
            acc = acc + jnp.dot(w_ref[kh + 1, kw + 1], rhs,
                                preferred_element_type=jnp.float32)

    # Folded BN + ReLU epilogue in f32 (single broadcast, hoisted out of taps).
    return jnp.maximum(acc * s + b, 0.0)


def _detect_level_kernel(
        x_ref,
        w2a_ref, s2a_ref, b2a_ref, w2b_ref, s2b_ref, b2b_ref, w2c_ref, b2c_ref,
        w3a_ref, s3a_ref, b3a_ref, w3b_ref, s3b_ref, b3b_ref, w3c_ref, b3c_ref,
        o_ref, *, W, c_box):
    """Fused Detect head for one pyramid level, one image per grid step."""
    HW = x_ref.shape[2]
    # NCHW block (1, Cin, H*W) consumed channels-first directly (no transpose);
    # bf16 for the MXU, f32 accumulation + epilogue.
    x_cf = x_ref[0].astype(jnp.bfloat16)                        # (Cin, H*W)
    wcol = lax.broadcasted_iota(jnp.int32, (1, HW), 1) % W      # hoisted once

    def head(wa, sa, ba, wb, sb, bb, wc, bc):
        t = _conv3x3_bn_relu_cf(x_cf, wa, sa[...], ba[...], W, wcol)
        t = _conv3x3_bn_relu_cf(t.astype(jnp.bfloat16), wb, sb[...], bb[...],
                                W, wcol)
        # Final 1x1 conv (bias, no BN, no activation).
        y = jnp.dot(wc[...], t.astype(jnp.bfloat16),
                    preferred_element_type=jnp.float32)
        return y + bc[...]                                      # (Cout, H*W)

    # torch.cat((cv2(x), cv3(x)), dim=1): write both slabs straight into the
    # output block (lane-dense stores, lane dim = H*W; 8-aligned sublane split).
    o_ref[0, :c_box, :] = head(w2a_ref, s2a_ref, b2a_ref,
                               w2b_ref, s2b_ref, b2b_ref, w2c_ref, b2c_ref)
    o_ref[0, c_box:, :] = head(w3a_ref, s3a_ref, b3a_ref,
                               w3b_ref, s3b_ref, b3b_ref, w3c_ref, b3c_ref)


# ----------------------------------------------------------------------------
# Wrapper: one pallas_call per pyramid level
# ----------------------------------------------------------------------------
_PARAM_ORDER = ("w2a", "s2a", "b2a", "w2b", "s2b", "b2b", "w2c", "b2c",
                "w3a", "s3a", "b3a", "w3b", "s3b", "b3b", "w3c", "b3c")


def detect_level_forward(x_nchw, lp, nc, reg_max):
    N, Cin, H, W = x_nchw.shape
    HW = H * W
    c_box = 4 * reg_max
    no = c_box + nc

    x_flat = x_nchw.reshape(N, Cin, HW)            # metadata-only reshape
    args = [x_flat] + [lp[k] for k in _PARAM_ORDER]

    def full_spec(a):
        return pl.BlockSpec(a.shape, lambda n, nd=a.ndim: (0,) * nd)

    in_specs = [pl.BlockSpec((1, Cin, HW), lambda n: (n, 0, 0))]
    in_specs += [full_spec(a) for a in args[1:]]

    kernel = functools.partial(_detect_level_kernel, W=W, c_box=c_box)
    out = pl.pallas_call(
        kernel,
        out_shape=jax.ShapeDtypeStruct((N, no, HW), jnp.float32),
        grid=(N,),
        in_specs=in_specs,
        out_specs=pl.BlockSpec((1, no, HW), lambda n: (n, 0, 0)),
        compiler_params=pltpu.CompilerParams(
            dimension_semantics=("parallel",)),
    )(*args)
    return out.reshape(N, no, H, W)                # metadata-only reshape


def detect_forward(xs, params):
    """Training-mode Detect.forward: list of cat(cv2_i(x_i), cv3_i(x_i), 1)."""
    return [detect_level_forward(x, lp, params["nc"], params["reg_max"])
            for x, lp in zip(xs, params["levels"])]


# ----------------------------------------------------------------------------
# Deterministic synthetic parameters (weights bf16, BN folded to f32 scale/bias)
# ----------------------------------------------------------------------------
def _bn_fold(cout, idx):
    r = jnp.arange(cout, dtype=jnp.float32)
    gamma = 1.0 + 0.05 * jnp.cos(r * 0.37 + idx)
    beta = 0.05 * jnp.sin(r * 0.71 + idx)
    mean = 0.02 * jnp.cos(r * 0.29 + 2.0 * idx)
    var = 1.0 + 0.10 * jnp.sin(r * 0.53 + idx) ** 2
    scale = gamma / jnp.sqrt(var + 1e-5)
    bias = beta - mean * scale
    return scale.reshape(-1, 1), bias.reshape(-1, 1)   # (Cout, 1) channels-first


def init_detect_params(key, nc=80, ch=(32, 64)):
    reg_max = 16
    c2 = max(16, ch[0] // 4, reg_max * 4)
    c3 = max(ch[0], nc)
    params = {"nc": nc, "reg_max": reg_max, "c2": c2, "c3": c3, "levels": []}

    def w3x3(k, cout, cin):      # (3, 3, Cout, Cin) bf16 -- kernel-ready layout
        return (0.1 * jax.random.normal(k, (3, 3, cout, cin),
                                        jnp.float32)).astype(jnp.bfloat16)

    def w1x1(k, cout, cin):      # (Cout, Cin) bf16
        return (0.1 * jax.random.normal(k, (cout, cin),
                                        jnp.float32)).astype(jnp.bfloat16)

    for li, cin in enumerate(ch):
        key, *ks = jax.random.split(key, 7)
        lp = {}
        lp["w2a"] = w3x3(ks[0], c2, cin)
        lp["s2a"], lp["b2a"] = _bn_fold(c2, 10 * li + 0)
        lp["w2b"] = w3x3(ks[1], c2, c2)
        lp["s2b"], lp["b2b"] = _bn_fold(c2, 10 * li + 1)
        lp["w2c"] = w1x1(ks[2], 4 * reg_max, c2)
        lp["b2c"] = (0.05 * jnp.sin(jnp.arange(4 * reg_max, dtype=jnp.float32))
                     ).reshape(-1, 1)
        lp["w3a"] = w3x3(ks[3], c3, cin)
        lp["s3a"], lp["b3a"] = _bn_fold(c3, 10 * li + 2)
        lp["w3b"] = w3x3(ks[4], c3, c3)
        lp["s3b"], lp["b3b"] = _bn_fold(c3, 10 * li + 3)
        lp["w3c"] = w1x1(ks[5], nc, c3)
        lp["b3c"] = (0.05 * jnp.cos(jnp.arange(nc, dtype=jnp.float32))
                     ).reshape(-1, 1)
        params["levels"].append(lp)
    return params


# ----------------------------------------------------------------------------
# Pure-JAX reference (same bf16-operand / f32-accumulate numerics)
# ----------------------------------------------------------------------------
def _ref_conv3x3_bn_relu(x_nhwc, w_kernel, scale, bias):
    w_hwio = jnp.transpose(w_kernel, (0, 1, 3, 2))          # (3,3,Cin,Cout) bf16
    y = lax.conv_general_dilated(
        x_nhwc.astype(jnp.bfloat16), w_hwio, (1, 1), [(1, 1), (1, 1)],
        dimension_numbers=("NHWC", "HWIO", "NHWC"),
        preferred_element_type=jnp.float32)
    return jnp.maximum(y * scale[:, 0] + bias[:, 0], 0.0)


def detect_level_reference(x_nchw, lp):
    x = jnp.transpose(x_nchw, (0, 2, 3, 1))                 # NHWC f32

    def head(wa, sa, ba, wb, sb, bb, wc, bc):
        t = _ref_conv3x3_bn_relu(x, wa, sa, ba)
        t = _ref_conv3x3_bn_relu(t, wb, sb, bb)
        w1 = jnp.transpose(wc)[None, None]                  # (1,1,Cin,Cout)
        y = lax.conv_general_dilated(
            t.astype(jnp.bfloat16), w1, (1, 1), [(0, 0), (0, 0)],
            dimension_numbers=("NHWC", "HWIO", "NHWC"),
            preferred_element_type=jnp.float32)
        return y + bc[:, 0]

    box = head(lp["w2a"], lp["s2a"], lp["b2a"], lp["w2b"], lp["s2b"],
               lp["b2b"], lp["w2c"], lp["b2c"])
    cls = head(lp["w3a"], lp["s3a"], lp["b3a"], lp["w3b"], lp["s3b"],
               lp["b3b"], lp["w3c"], lp["b3c"])
    y = jnp.concatenate([box, cls], axis=-1)
    return jnp.transpose(y, (0, 3, 1, 2))                   # NCHW


if __name__ == "__main__":
    key = jax.random.PRNGKey(0)
    k_x0, k_x1, k_p = jax.random.split(key, 3)

    nc = 80                       # module default
    ch = (32, 64)                 # two small pyramid levels
    params = init_detect_params(k_p, nc=nc, ch=ch)

    xs = [
        jax.random.normal(k_x0, (2, ch[0], 16, 16), jnp.float32),
        jax.random.normal(k_x1, (2, ch[1], 8, 8), jnp.float32),
    ]

    outs = detect_forward(xs, params)
    outs = jax.block_until_ready(outs)

    no = nc + 4 * params["reg_max"]
    for i, (x, out) in enumerate(zip(xs, outs)):
        N, _, H, W = x.shape
        assert out.shape == (N, no, H, W), out.shape
        ref = jax.block_until_ready(detect_level_reference(x, params["levels"][i]))
        err = float(jnp.max(jnp.abs(out - ref)))
        assert jnp.allclose(out, ref, atol=1e-2, rtol=1e-2), (i, err)

    print("KERNEL_OK")
</pallas_src>

<mosaic_0001>
module attributes {stable_mosaic.version = 11 : i64} {
  func.func @_detect_level_kernel(%arg0: i32, %arg1: memref<1x32x256xf32, #tpu.memory_space<vmem>>, %arg2: memref<3x3x64x32xbf16, #tpu.memory_space<vmem>>, %arg3: memref<64x1xf32, #tpu.memory_space<vmem>>, %arg4: memref<64x1xf32, #tpu.memory_space<vmem>>, %arg5: memref<3x3x64x64xbf16, #tpu.memory_space<vmem>>, %arg6: memref<64x1xf32, #tpu.memory_space<vmem>>, %arg7: memref<64x1xf32, #tpu.memory_space<vmem>>, %arg8: memref<64x64xbf16, #tpu.memory_space<vmem>>, %arg9: memref<64x1xf32, #tpu.memory_space<vmem>>, %arg10: memref<3x3x80x32xbf16, #tpu.memory_space<vmem>>, %arg11: memref<80x1xf32, #tpu.memory_space<vmem>>, %arg12: memref<80x1xf32, #tpu.memory_space<vmem>>, %arg13: memref<3x3x80x80xbf16, #tpu.memory_space<vmem>>, %arg14: memref<80x1xf32, #tpu.memory_space<vmem>>, %arg15: memref<80x1xf32, #tpu.memory_space<vmem>>, %arg16: memref<80x80xbf16, #tpu.memory_space<vmem>>, %arg17: memref<80x1xf32, #tpu.memory_space<vmem>>, %arg18: memref<1x144x256xf32, #tpu.memory_space<vmem>>) attributes {dimension_semantics = [#tpu.dimension_semantics<parallel>], iteration_bounds = array<i64: 2>, scalar_prefetch = 0 : i64, scratch_operands = 0 : i64, tpu.core_type = #tpu.core_type<tc>, window_params = [{transform_indices = @transform_0, window_bounds = array<i64: 1, 32, 256>}, {pipeline_mode = #tpu.pipeline_mode<synchronous>, transform_indices = @transform_1, window_bounds = array<i64: 3, 3, 64, 32>}, {pipeline_mode = #tpu.pipeline_mode<synchronous>, transform_indices = @transform_2, window_bounds = array<i64: 64, 1>}, {pipeline_mode = #tpu.pipeline_mode<synchronous>, transform_indices = @transform_3, window_bounds = array<i64: 64, 1>}, {pipeline_mode = #tpu.pipeline_mode<synchronous>, transform_indices = @transform_4, window_bounds = array<i64: 3, 3, 64, 64>}, {pipeline_mode = #tpu.pipeline_mode<synchronous>, transform_indices = @transform_5, window_bounds = array<i64: 64, 1>}, {pipeline_mode = #tpu.pipeline_mode<synchronous>, transform_indices = @transform_6, window_bounds = array<i64: 64, 1>}, {pipeline_mode = #tpu.pipeline_mode<synchronous>, transform_indices = @transform_7, window_bounds = array<i64: 64, 64>}, {pipeline_mode = #tpu.pipeline_mode<synchronous>, transform_indices = @transform_8, window_bounds = array<i64: 64, 1>}, {pipeline_mode = #tpu.pipeline_mode<synchronous>, transform_indices = @transform_9, window_bounds = array<i64: 3, 3, 80, 32>}, {pipeline_mode = #tpu.pipeline_mode<synchronous>, transform_indices = @transform_10, window_bounds = array<i64: 80, 1>}, {pipeline_mode = #tpu.pipeline_mode<synchronous>, transform_indices = @transform_11, window_bounds = array<i64: 80, 1>}, {pipeline_mode = #tpu.pipeline_mode<synchronous>, transform_indices = @transform_12, window_bounds = array<i64: 3, 3, 80, 80>}, {pipeline_mode = #tpu.pipeline_mode<synchronous>, transform_indices = @transform_13, window_bounds = array<i64: 80, 1>}, {pipeline_mode = #tpu.pipeline_mode<synchronous>, transform_indices = @transform_14, window_bounds = array<i64: 80, 1>}, {pipeline_mode = #tpu.pipeline_mode<synchronous>, transform_indices = @transform_15, window_bounds = array<i64: 80, 80>}, {pipeline_mode = #tpu.pipeline_mode<synchronous>, transform_indices = @transform_16, window_bounds = array<i64: 80, 1>}, {transform_indices = @transform_17, window_bounds = array<i64: 1, 144, 256>}]} {
    %c0 = arith.constant 0 : index
    %c0_0 = arith.constant 0 : index
    %c0_1 = arith.constant 0 : index
    %0 = vector.load %arg1[%c0, %c0_0, %c0_1] : memref<1x32x256xf32, #tpu.memory_space<vmem>>, vector<1x32x256xf32>
    %1 = vector.shape_cast %0 : vector<1x32x256xf32> to vector<32x256xf32>
    %2 = arith.truncf %1 : vector<32x256xf32> to vector<32x256xbf16>
    %3 = tpu.iota {dimensions = array<i32: 1>} : vector<1x256xi32>
    %c16_i32 = arith.constant 16 : i32
    %c0_i32 = arith.constant 0 : i32
    %4 = arith.cmpi eq, %c16_i32, %c0_i32 : i32
    %c1_i32 = arith.constant 1 : i32
    %5 = arith.select %4, %c1_i32, %c16_i32 : i32
    %6 = vector.broadcast %5 : i32 to vector<1x256xi32>
    %7 = arith.remsi %3, %6 : vector<1x256xi32>
    %c0_i32_2 = arith.constant 0 : i32
    %8 = vector.broadcast %c0_i32_2 : i32 to vector<1x256xi32>
    %9 = arith.cmpi ne, %7, %8 : vector<1x256xi32>
    %c0_i32_3 = arith.constant 0 : i32
    %10 = vector.broadcast %c0_i32_3 : i32 to vector<1x256xi32>
    %11 = arith.cmpi slt, %7, %10 : vector<1x256xi32>
    %c0_i32_4 = arith.constant 0 : i32
    %12 = arith.cmpi slt, %5, %c0_i32_4 : i32
    %13 = vector.broadcast %12 : i1 to vector<1x256xi1>
    %14 = vector.broadcast %13 : vector<1x256xi1> to vector<1x256xi1>
    %15 = arith.xori %11, %14 : vector<1x256xi1>
    %16 = arith.andi %15, %9 : vector<1x256xi1>
    %17 = vector.broadcast %5 : i32 to vector<1x256xi32>
    %18 = arith.addi %7, %17 : vector<1x256xi32>
    %19 = arith.select %16, %18, %7 : vector<1x256xi1>, vector<1x256xi32>
    %c0_5 = arith.constant 0 : index
    %c0_6 = arith.constant 0 : index
    %20 = vector.load %arg3[%c0_5, %c0_6] : memref<64x1xf32, #tpu.memory_space<vmem>>, vector<64x1xf32>
    %c0_7 = arith.constant 0 : index
    %c0_8 = arith.constant 0 : index
    %21 = vector.load %arg4[%c0_7, %c0_8] : memref<64x1xf32, #tpu.memory_space<vmem>>, vector<64x1xf32>
    %cst = arith.constant 0.000000e+00 : bf16
    %22 = vector.broadcast %cst : bf16 to vector<32x17xbf16>
    %cst_9 = arith.constant 0.000000e+00 : bf16
    %23 = vector.broadcast %cst_9 : bf16 to vector<32x256xbf16>
    %c15_i32 = arith.constant 15 : i32
    %24 = vector.broadcast %c15_i32 : i32 to vector<1x256xi32>
    %25 = arith.cmpi eq, %19, %24 : vector<1x256xi32>
    %26 = vector.shape_cast %25 : vector<1x256xi1> to vector<1x256xi1>
    %27 = vector.broadcast %26 : vector<1x256xi1> to vector<32x256xi1>
    %28 = arith.select %27, %23, %2 : vector<32x256xi1>, vector<32x256xbf16>
    %c0_i32_10 = arith.constant 0 : i32
    %29 = vector.broadcast %c0_i32_10 : i32 to vector<1x256xi32>
    %30 = arith.cmpi eq, %19, %29 : vector<1x256xi32>
    %31 = vector.shape_cast %30 : vector<1x256xi1> to vector<1x256xi1>
    %32 = vector.broadcast %31 : vector<1x256xi1> to vector<32x256xi1>
    %33 = arith.select %32, %23, %2 : vector<32x256xi1>, vector<32x256xbf16>
    %34 = tpu.concatenate %22, %28, %22 in 1 : vector<32x17xbf16>, vector<32x256xbf16>, vector<32x17xbf16> -> vector<32x290xbf16>
    %35 = tpu.concatenate %22, %2, %22 in 1 : vector<32x17xbf16>, vector<32x256xbf16>, vector<32x17xbf16> -> vector<32x290xbf16>
    %36 = tpu.concatenate %22, %33, %22 in 1 : vector<32x17xbf16>, vector<32x256xbf16>, vector<32x17xbf16> -> vector<32x290xbf16>
    %cst_11 = arith.constant 0.000000e+00 : f32
    %37 = vector.broadcast %cst_11 : f32 to vector<64x256xf32>
    %38 = vector.extract_strided_slice %34 {offsets = [0, 0], sizes = [32, 256], strides = [1, 1]} : vector<32x290xbf16> to vector<32x256xbf16>
    %c0_12 = arith.constant 0 : index
    %c0_13 = arith.constant 0 : index
    %c0_14 = arith.constant 0 : index
    %c0_15 = arith.constant 0 : index
    %39 = vector.load %arg2[%c0_12, %c0_13, %c0_14, %c0_15] : memref<3x3x64x32xbf16, #tpu.memory_space<vmem>>, vector<1x1x64x32xbf16>
    %40 = vector.shape_cast %39 : vector<1x1x64x32xbf16> to vector<64x32xbf16>
    %cst_16 = arith.constant dense<0.000000e+00> : vector<64x256xf32>
    %41 = tpu.matmul %40, %38, %cst_16 {dimension_numbers = #tpu.dot_dimension_numbers<[1], [0], [0], [1], [0, 0, 1, 1], [], []>} : vector<64x32xbf16>, vector<32x256xbf16>, vector<64x256xf32> -> vector<64x256xf32>
    %42 = arith.addf %37, %41 : vector<64x256xf32>
    %43 = vector.extract_strided_slice %35 {offsets = [0, 1], sizes = [32, 256], strides = [1, 1]} : vector<32x290xbf16> to vector<32x256xbf16>
    %c0_17 = arith.constant 0 : index
    %c1 = arith.constant 1 : index
    %c0_18 = arith.constant 0 : index
    %c0_19 = arith.constant 0 : index
    %44 = vector.load %arg2[%c0_17, %c1, %c0_18, %c0_19] : memref<3x3x64x32xbf16, #tpu.memory_space<vmem>>, vector<1x1x64x32xbf16>
    %45 = vector.shape_cast %44 : vector<1x1x64x32xbf16> to vector<64x32xbf16>
    %cst_20 = arith.constant dense<0.000000e+00> : vector<64x256xf32>
    %46 = tpu.matmul %45, %43, %cst_20 {dimension_numbers = #tpu.dot_dimension_numbers<[1], [0], [0], [1], [0, 0, 1, 1], [], []>} : vector<64x32xbf16>, vector<32x256xbf16>, vector<64x256xf32> -> vector<64x256xf32>
    %47 = arith.addf %42, %46 : vector<64x256xf32>
    %48 = vector.extract_strided_slice %36 {offsets = [0, 2], sizes = [32, 256], strides = [1, 1]} : vector<32x290xbf16> to vector<32x256xbf16>
    %c0_21 = arith.constant 0 : index
    %c2 = arith.constant 2 : index
    %c0_22 = arith.constant 0 : index
    %c0_23 = arith.constant 0 : index
    %49 = vector.load %arg2[%c0_21, %c2, %c0_22, %c0_23] : memref<3x3x64x32xbf16, #tpu.memory_space<vmem>>, vector<1x1x64x32xbf16>
    %50 = vector.shape_cast %49 : vector<1x1x64x32xbf16> to vector<64x32xbf16>
    %cst_24 = arith.constant dense<0.000000e+00> : vector<64x256xf32>
    %51 = tpu.matmul %50, %48, %cst_24 {dimension_numbers = #tpu.dot_dimension_numbers<[1], [0], [0], [1], [0, 0, 1, 1], [], []>} : vector<64x32xbf16>, vector<32x256xbf16>, vector<64x256xf32> -> vector<64x256xf32>
    %52 = arith.addf %47, %51 : vector<64x256xf32>
    %53 = vector.extract_strided_slice %34 {offsets = [0, 16], sizes = [32, 256], strides = [1, 1]} : vector<32x290xbf16> to vector<32x256xbf16>
    %c1_25 = arith.constant 1 : index
    %c0_26 = arith.constant 0 : index
    %c0_27 = arith.constant 0 : index
    %c0_28 = arith.constant 0 : index
    %54 = vector.load %arg2[%c1_25, %c0_26, %c0_27, %c0_28] : memref<3x3x64x32xbf16, #tpu.memory_space<vmem>>, vector<1x1x64x32xbf16>
    %55 = vector.shape_cast %54 : vector<1x1x64x32xbf16> to vector<64x32xbf16>
    %cst_29 = arith.constant dense<0.000000e+00> : vector<64x256xf32>
    %56 = tpu.matmul %55, %53, %cst_29 {dimension_numbers = #tpu.dot_dimension_numbers<[1], [0], [0], [1], [0, 0, 1, 1], [], []>} : vector<64x32xbf16>, vector<32x256xbf16>, vector<64x256xf32> -> vector<64x256xf32>
    %57 = arith.addf %52, %56 : vector<64x256xf32>
    %58 = vector.extract_strided_slice %35 {offsets = [0, 17], sizes = [32, 256], strides = [1, 1]} : vector<32x290xbf16> to vector<32x256xbf16>
    %c1_30 = arith.constant 1 : index
    %c1_31 = arith.constant 1 : index
    %c0_32 = arith.constant 0 : index
    %c0_33 = arith.constant 0 : index
    %59 = vector.load %arg2[%c1_30, %c1_31, %c0_32, %c0_33] : memref<3x3x64x32xbf16, #tpu.memory_space<vmem>>, vector<1x1x64x32xbf16>
    %60 = vector.shape_cast %59 : vector<1x1x64x32xbf16> to vector<64x32xbf16>
    %cst_34 = arith.constant dense<0.000000e+00> : vector<64x256xf32>
    %61 = tpu.matmul %60, %58, %cst_34 {dimension_numbers = #tpu.dot_dimension_numbers<[1], [0], [0], [1], [0, 0, 1, 1], [], []>} : vector<64x32xbf16>, vector<32x256xbf16>, vector<64x256xf32> -> vector<64x256xf32>
    %62 = arith.addf %57, %61 : vector<64x256xf32>
    %63 = vector.extract_strided_slice %36 {offsets = [0, 18], sizes = [32, 256], strides = [1, 1]} : vector<32x290xbf16> to vector<32x256xbf16>
    %c1_35 = arith.constant 1 : index
    %c2_36 = arith.constant 2 : index
    %c0_37 = arith.constant 0 : index
    %c0_38 = arith.constant 0 : index
    %64 = vector.load %arg2[%c1_35, %c2_36, %c0_37, %c0_38] : memref<3x3x64x32xbf16, #tpu.memory_space<vmem>>, vector<1x1x64x32xbf16>
    %65 = vector.shape_cast %64 : vector<1x1x64x32xbf16> to vector<64x32xbf16>
    %cst_39 = arith.constant dense<0.000000e+00> : vector<64x256xf32>
    %66 = tpu.matmul %65, %63, %cst_39 {dimension_numbers = #tpu.dot_dimension_numbers<[1], [0], [0], [1], [0, 0, 1, 1], [], []>} : vector<64x32xbf16>, vector<32x256xbf16>, vector<64x256xf32> -> vector<64x256xf32>
    %67 = arith.addf %62, %66 : vector<64x256xf32>
    %68 = vector.extract_strided_slice %34 {offsets = [0, 32], sizes = [32, 256], strides = [1, 1]} : vector<32x290xbf16> to vector<32x256xbf16>
    %c2_40 = arith.constant 2 : index
    %c0_41 = arith.constant 0 : index
    %c0_42 = arith.constant 0 : index
    %c0_43 = arith.constant 0 : index
    %69 = vector.load %arg2[%c2_40, %c0_41, %c0_42, %c0_43] : memref<3x3x64x32xbf16, #tpu.memory_space<vmem>>, vector<1x1x64x32xbf16>
    %70 = vector.shape_cast %69 : vector<1x1x64x32xbf16> to vector<64x32xbf16>
    %cst_44 = arith.constant dense<0.000000e+00> : vector<64x256xf32>
    %71 = tpu.matmul %70, %68, %cst_44 {dimension_numbers = #tpu.dot_dimension_numbers<[1], [0], [0], [1], [0, 0, 1, 1], [], []>} : vector<64x32xbf16>, vector<32x256xbf16>, vector<64x256xf32> -> vector<64x256xf32>
    %72 = arith.addf %67, %71 : vector<64x256xf32>
    %73 = vector.extract_strided_slice %35 {offsets = [0, 33], sizes = [32, 256], strides = [1, 1]} : vector<32x290xbf16> to vector<32x256xbf16>
    %c2_45 = arith.constant 2 : index
    %c1_46 = arith.constant 1 : index
    %c0_47 = arith.constant 0 : index
    %c0_48 = arith.constant 0 : index
    %74 = vector.load %arg2[%c2_45, %c1_46, %c0_47, %c0_48] : memref<3x3x64x32xbf16, #tpu.memory_space<vmem>>, vector<1x1x64x32xbf16>
    %75 = vector.shape_cast %74 : vector<1x1x64x32xbf16> to vector<64x32xbf16>
    %cst_49 = arith.constant dense<0.000000e+00> : vector<64x256xf32>
    %76 = tpu.matmul %75, %73, %cst_49 {dimension_numbers = #tpu.dot_dimension_numbers<[1], [0], [0], [1], [0, 0, 1, 1], [], []>} : vector<64x32xbf16>, vector<32x256xbf16>, vector<64x256xf32> -> vector<64x256xf32>
    %77 = arith.addf %72, %76 : vector<64x256xf32>
    %78 = vector.extract_strided_slice %36 {offsets = [0, 34], sizes = [32, 256], strides = [1, 1]} : vector<32x290xbf16> to vector<32x256xbf16>
    %c2_50 = arith.constant 2 : index
    %c2_51 = arith.constant 2 : index
    %c0_52 = arith.constant 0 : index
    %c0_53 = arith.constant 0 : index
    %79 = vector.load %arg2[%c2_50, %c2_51, %c0_52, %c0_53] : memref<3x3x64x32xbf16, #tpu.memory_space<vmem>>, vector<1x1x64x32xbf16>
    %80 = vector.shape_cast %79 : vector<1x1x64x32xbf16> to vector<64x32xbf16>
    %cst_54 = arith.constant dense<0.000000e+00> : vector<64x256xf32>
    %81 = tpu.matmul %80, %78, %cst_54 {dimension_numbers = #tpu.dot_dimension_numbers<[1], [0], [0], [1], [0, 0, 1, 1], [], []>} : vector<64x32xbf16>, vector<32x256xbf16>, vector<64x256xf32> -> vector<64x256xf32>
    %82 = arith.addf %77, %81 : vector<64x256xf32>
    %83 = vector.broadcast %20 : vector<64x1xf32> to vector<64x256xf32>
    %84 = arith.mulf %82, %83 : vector<64x256xf32>
    %85 = vector.broadcast %21 : vector<64x1xf32> to vector<64x256xf32>
    %86 = arith.addf %84, %85 : vector<64x256xf32>
    %cst_55 = arith.constant 0.000000e+00 : f32
    %87 = vector.broadcast %cst_55 : f32 to vector<64x256xf32>
    %88 = arith.maximumf %86, %87 : vector<64x256xf32>
    %89 = arith.truncf %88 : vector<64x256xf32> to vector<64x256xbf16>
    %c0_56 = arith.constant 0 : index
    %c0_57 = arith.constant 0 : index
    %90 = vector.load %arg6[%c0_56, %c0_57] : memref<64x1xf32, #tpu.memory_space<vmem>>, vector<64x1xf32>
    %c0_58 = arith.constant 0 : index
    %c0_59 = arith.constant 0 : index
    %91 = vector.load %arg7[%c0_58, %c0_59] : memref<64x1xf32, #tpu.memory_space<vmem>>, vector<64x1xf32>
    %cst_60 = arith.constant 0.000000e+00 : bf16
    %92 = vector.broadcast %cst_60 : bf16 to vector<64x17xbf16>
    %cst_61 = arith.constant 0.000000e+00 : bf16
    %93 = vector.broadcast %cst_61 : bf16 to vector<64x256xbf16>
    %c15_i32_62 = arith.constant 15 : i32
    %94 = vector.broadcast %c15_i32_62 : i32 to vector<1x256xi32>
    %95 = arith.cmpi eq, %19, %94 : vector<1x256xi32>
    %96 = vector.shape_cast %95 : vector<1x256xi1> to vector<1x256xi1>
    %97 = vector.broadcast %96 : vector<1x256xi1> to vector<64x256xi1>
    %98 = arith.select %97, %93, %89 : vector<64x256xi1>, vector<64x256xbf16>
    %c0_i32_63 = arith.constant 0 : i32
    %99 = vector.broadcast %c0_i32_63 : i32 to vector<1x256xi32>
    %100 = arith.cmpi eq, %19, %99 : vector<1x256xi32>
    %101 = vector.shape_cast %100 : vector<1x256xi1> to vector<1x256xi1>
    %102 = vector.broadcast %101 : vector<1x256xi1> to vector<64x256xi1>
    %103 = arith.select %102, %93, %89 : vector<64x256xi1>, vector<64x256xbf16>
    %104 = tpu.concatenate %92, %98, %92 in 1 : vector<64x17xbf16>, vector<64x256xbf16>, vector<64x17xbf16> -> vector<64x290xbf16>
    %105 = tpu.concatenate %92, %89, %92 in 1 : vector<64x17xbf16>, vector<64x256xbf16>, vector<64x17xbf16> -> vector<64x290xbf16>
    %106 = tpu.concatenate %92, %103, %92 in 1 : vector<64x17xbf16>, vector<64x256xbf16>, vector<64x17xbf16> -> vector<64x290xbf16>
    %cst_64 = arith.constant 0.000000e+00 : f32
    %107 = vector.broadcast %cst_64 : f32 to vector<64x256xf32>
    %108 = vector.extract_strided_slice %104 {offsets = [0, 0], sizes = [64, 256], strides = [1, 1]} : vector<64x290xbf16> to vector<64x256xbf16>
    %c0_65 = arith.constant 0 : index
    %c0_66 = arith.constant 0 : index
    %c0_67 = arith.constant 0 : index
    %c0_68 = arith.constant 0 : index
    %109 = vector.load %arg5[%c0_65, %c0_66, %c0_67, %c0_68] : memref<3x3x64x64xbf16, #tpu.memory_space<vmem>>, vector<1x1x64x64xbf16>
    %110 = vector.shape_cast %109 : vector<1x1x64x64xbf16> to vector<64x64xbf16>
    %cst_69 = arith.constant dense<0.000000e+00> : vector<64x256xf32>
    %111 = tpu.matmul %110, %108, %cst_69 {dimension_numbers = #tpu.dot_dimension_numbers<[1], [0], [0], [1], [0, 0, 1, 1], [], []>} : vector<64x64xbf16>, vector<64x256xbf16>, vector<64x256xf32> -> vector<64x256xf32>
    %112 = arith.addf %107, %111 : vector<64x256xf32>
    %113 = vector.extract_strided_slice %105 {offsets = [0, 1], sizes = [64, 256], strides = [1, 1]} : vector<64x290xbf16> to vector<64x256xbf16>
    %c0_70 = arith.constant 0 : index
    %c1_71 = arith.constant 1 : index
    %c0_72 = arith.constant 0 : index
    %c0_73 = arith.constant 0 : index
    %114 = vector.load %arg5[%c0_70, %c1_71, %c0_72, %c0_73] : memref<3x3x64x64xbf16, #tpu.memory_space<vmem>>, vector<1x1x64x64xbf16>
    %115 = vector.shape_cast %114 : vector<1x1x64x64xbf16> to vector<64x64xbf16>
    %cst_74 = arith.constant dense<0.000000e+00> : vector<64x256xf32>
    %116 = tpu.matmul %115, %113, %cst_74 {dimension_numbers = #tpu.dot_dimension_numbers<[1], [0], [0], [1], [0, 0, 1, 1], [], []>} : vector<64x64xbf16>, vector<64x256xbf16>, vector<64x256xf32> -> vector<64x256xf32>
    %117 = arith.addf %112, %116 : vector<64x256xf32>
    %118 = vector.extract_strided_slice %106 {offsets = [0, 2], sizes = [64, 256], strides = [1, 1]} : vector<64x290xbf16> to vector<64x256xbf16>
    %c0_75 = arith.constant 0 : index
    %c2_76 = arith.constant 2 : index
    %c0_77 = arith.constant 0 : index
    %c0_78 = arith.constant 0 : index
    %119 = vector.load %arg5[%c0_75, %c2_76, %c0_77, %c0_78] : memref<3x3x64x64xbf16, #tpu.memory_space<vmem>>, vector<1x1x64x64xbf16>
    %120 = vector.shape_cast %119 : vector<1x1x64x64xbf16> to vector<64x64xbf16>
    %cst_79 = arith.constant dense<0.000000e+00> : vector<64x256xf32>
    %121 = tpu.matmul %120, %118, %cst_79 {dimension_numbers = #tpu.dot_dimension_numbers<[1], [0], [0], [1], [0, 0, 1, 1], [], []>} : vector<64x64xbf16>, vector<64x256xbf16>, vector<64x256xf32> -> vector<64x256xf32>
    %122 = arith.addf %117, %121 : vector<64x256xf32>
    %123 = vector.extract_strided_slice %104 {offsets = [0, 16], sizes = [64, 256], strides = [1, 1]} : vector<64x290xbf16> to vector<64x256xbf16>
    %c1_80 = arith.constant 1 : index
    %c0_81 = arith.constant 0 : index
    %c0_82 = arith.constant 0 : index
    %c0_83 = arith.constant 0 : index
    %124 = vector.load %arg5[%c1_80, %c0_81, %c0_82, %c0_83] : memref<3x3x64x64xbf16, #tpu.memory_space<vmem>>, vector<1x1x64x64xbf16>
    %125 = vector.shape_cast %124 : vector<1x1x64x64xbf16> to vector<64x64xbf16>
    %cst_84 = arith.constant dense<0.000000e+00> : vector<64x256xf32>
    %126 = tpu.matmul %125, %123, %cst_84 {dimension_numbers = #tpu.dot_dimension_numbers<[1], [0], [0], [1], [0, 0, 1, 1], [], []>} : vector<64x64xbf16>, vector<64x256xbf16>, vector<64x256xf32> -> vector<64x256xf32>
    %127 = arith.addf %122, %126 : vector<64x256xf32>
    %128 = vector.extract_strided_slice %105 {offsets = [0, 17], sizes = [64, 256], strides = [1, 1]} : vector<64x290xbf16> to vector<64x256xbf16>
    %c1_85 = arith.constant 1 : index
    %c1_86 = arith.constant 1 : index
    %c0_87 = arith.constant 0 : index
    %c0_88 = arith.constant 0 : index
    %129 = vector.load %arg5[%c1_85, %c1_86, %c0_87, %c0_88] : memref<3x3x64x64xbf16, #tpu.memory_space<vmem>>, vector<1x1x64x64xbf16>
    %130 = vector.shape_cast %129 : vector<1x1x64x64xbf16> to vector<64x64xbf16>
    %cst_89 = arith.constant dense<0.000000e+00> : vector<64x256xf32>
    %131 = tpu.matmul %130, %128, %cst_89 {dimension_numbers = #tpu.dot_dimension_numbers<[1], [0], [0], [1], [0, 0, 1, 1], [], []>} : vector<64x64xbf16>, vector<64x256xbf16>, vector<64x256xf32> -> vector<64x256xf32>
    %132 = arith.addf %127, %131 : vector<64x256xf32>
    %133 = vector.extract_strided_slice %106 {offsets = [0, 18], sizes = [64, 256], strides = [1, 1]} : vector<64x290xbf16> to vector<64x256xbf16>
    %c1_90 = arith.constant 1 : index
    %c2_91 = arith.constant 2 : index
    %c0_92 = arith.constant 0 : index
    %c0_93 = arith.constant 0 : index
    %134 = vector.load %arg5[%c1_90, %c2_91, %c0_92, %c0_93] : memref<3x3x64x64xbf16, #tpu.memory_space<vmem>>, vector<1x1x64x64xbf16>
    %135 = vector.shape_cast %134 : vector<1x1x64x64xbf16> to vector<64x64xbf16>
    %cst_94 = arith.constant dense<0.000000e+00> : vector<64x256xf32>
    %136 = tpu.matmul %135, %133, %cst_94 {dimension_numbers = #tpu.dot_dimension_numbers<[1], [0], [0], [1], [0, 0, 1, 1], [], []>} : vector<64x64xbf16>, vector<64x256xbf16>, vector<64x256xf32> -> vector<64x256xf32>
    %137 = arith.addf %132, %136 : vector<64x256xf32>
    %138 = vector.extract_strided_slice %104 {offsets = [0, 32], sizes = [64, 256], strides = [1, 1]} : vector<64x290xbf16> to vector<64x256xbf16>
    %c2_95 = arith.constant 2 : index
    %c0_96 = arith.constant 0 : index
    %c0_97 = arith.constant 0 : index
    %c0_98 = arith.constant 0 : index
    %139 = vector.load %arg5[%c2_95, %c0_96, %c0_97, %c0_98] : memref<3x3x64x64xbf16, #tpu.memory_space<vmem>>, vector<1x1x64x64xbf16>
    %140 = vector.shape_cast %139 : vector<1x1x64x64xbf16> to vector<64x64xbf16>
    %cst_99 = arith.constant dense<0.000000e+00> : vector<64x256xf32>
    %141 = tpu.matmul %140, %138, %cst_99 {dimension_numbers = #tpu.dot_dimension_numbers<[1], [0], [0], [1], [0, 0, 1, 1], [], []>} : vector<64x64xbf16>, vector<64x256xbf16>, vector<64x256xf32> -> vector<64x256xf32>
    %142 = arith.addf %137, %141 : vector<64x256xf32>
    %143 = vector.extract_strided_slice %105 {offsets = [0, 33], sizes = [64, 256], strides = [1, 1]} : vector<64x290xbf16> to vector<64x256xbf16>
    %c2_100 = arith.constant 2 : index
    %c1_101 = arith.constant 1 : index
    %c0_102 = arith.constant 0 : index
    %c0_103 = arith.constant 0 : index
    %144 = vector.load %arg5[%c2_100, %c1_101, %c0_102, %c0_103] : memref<3x3x64x64xbf16, #tpu.memory_space<vmem>>, vector<1x1x64x64xbf16>
    %145 = vector.shape_cast %144 : vector<1x1x64x64xbf16> to vector<64x64xbf16>
    %cst_104 = arith.constant dense<0.000000e+00> : vector<64x256xf32>
    %146 = tpu.matmul %145, %143, %cst_104 {dimension_numbers = #tpu.dot_dimension_numbers<[1], [0], [0], [1], [0, 0, 1, 1], [], []>} : vector<64x64xbf16>, vector<64x256xbf16>, vector<64x256xf32> -> vector<64x256xf32>
    %147 = arith.addf %142, %146 : vector<64x256xf32>
    %148 = vector.extract_strided_slice %106 {offsets = [0, 34], sizes = [64, 256], strides = [1, 1]} : vector<64x290xbf16> to vector<64x256xbf16>
    %c2_105 = arith.constant 2 : index
    %c2_106 = arith.constant 2 : index
    %c0_107 = arith.constant 0 : index
    %c0_108 = arith.constant 0 : index
    %149 = vector.load %arg5[%c2_105, %c2_106, %c0_107, %c0_108] : memref<3x3x64x64xbf16, #tpu.memory_space<vmem>>, vector<1x1x64x64xbf16>
    %150 = vector.shape_cast %149 : vector<1x1x64x64xbf16> to vector<64x64xbf16>
    %cst_109 = arith.constant dense<0.000000e+00> : vector<64x256xf32>
    %151 = tpu.matmul %150, %148, %cst_109 {dimension_numbers = #tpu.dot_dimension_numbers<[1], [0], [0], [1], [0, 0, 1, 1], [], []>} : vector<64x64xbf16>, vector<64x256xbf16>, vector<64x256xf32> -> vector<64x256xf32>
    %152 = arith.addf %147, %151 : vector<64x256xf32>
    %153 = vector.broadcast %90 : vector<64x1xf32> to vector<64x256xf32>
    %154 = arith.mulf %152, %153 : vector<64x256xf32>
    %155 = vector.broadcast %91 : vector<64x1xf32> to vector<64x256xf32>
    %156 = arith.addf %154, %155 : vector<64x256xf32>
    %cst_110 = arith.constant 0.000000e+00 : f32
    %157 = vector.broadcast %cst_110 : f32 to vector<64x256xf32>
    %158 = arith.maximumf %156, %157 : vector<64x256xf32>
    %c0_111 = arith.constant 0 : index
    %c0_112 = arith.constant 0 : index
    %159 = vector.load %arg8[%c0_111, %c0_112] : memref<64x64xbf16, #tpu.memory_space<vmem>>, vector<64x64xbf16>
    %160 = arith.truncf %158 : vector<64x256xf32> to vector<64x256xbf16>
    %cst_113 = arith.constant dense<0.000000e+00> : vector<64x256xf32>
    %161 = tpu.matmul %159, %160, %cst_113 {dimension_numbers = #tpu.dot_dimension_numbers<[1], [0], [0], [1], [0, 0, 1, 1], [], []>} : vector<64x64xbf16>, vector<64x256xbf16>, vector<64x256xf32> -> vector<64x256xf32>
    %c0_114 = arith.constant 0 : index
    %c0_115 = arith.constant 0 : index
    %162 = vector.load %arg9[%c0_114, %c0_115] : memref<64x1xf32, #tpu.memory_space<vmem>>, vector<64x1xf32>
    %163 = vector.broadcast %162 : vector<64x1xf32> to vector<64x256xf32>
    %164 = arith.addf %161, %163 : vector<64x256xf32>
    %c0_116 = arith.constant 0 : index
    %c0_117 = arith.constant 0 : index
    %c0_118 = arith.constant 0 : index
    %165 = vector.load %arg18[%c0_116, %c0_117, %c0_118] : memref<1x144x256xf32, #tpu.memory_space<vmem>>, vector<1x64x256xf32>
    %166 = vector.shape_cast %165 : vector<1x64x256xf32> to vector<64x256xf32>
    %167 = vector.shape_cast %164 : vector<64x256xf32> to vector<1x64x256xf32>
    tpu.vector_store %arg18[%c0_116, %c0_117, %c0_118], %167 {strides = array<i32>} : memref<1x144x256xf32, #tpu.memory_space<vmem>>, vector<1x64x256xf32>,
    %c0_119 = arith.constant 0 : index
    %c0_120 = arith.constant 0 : index
    %168 = vector.load %arg11[%c0_119, %c0_120] : memref<80x1xf32, #tpu.memory_space<vmem>>, vector<80x1xf32>
    %c0_121 = arith.constant 0 : index
    %c0_122 = arith.constant 0 : index
    %169 = vector.load %arg12[%c0_121, %c0_122] : memref<80x1xf32, #tpu.memory_space<vmem>>, vector<80x1xf32>
    %cst_123 = arith.constant 0.000000e+00 : bf16
    %170 = vector.broadcast %cst_123 : bf16 to vector<32x17xbf16>
    %cst_124 = arith.constant 0.000000e+00 : bf16
    %171 = vector.broadcast %cst_124 : bf16 to vector<32x256xbf16>
    %c15_i32_125 = arith.constant 15 : i32
    %172 = vector.broadcast %c15_i32_125 : i32 to vector<1x256xi32>
    %173 = arith.cmpi eq, %19, %172 : vector<1x256xi32>
    %174 = vector.shape_cast %173 : vector<1x256xi1> to vector<1x256xi1>
    %175 = vector.broadcast %174 : vector<1x256xi1> to vector<32x256xi1>
    %176 = arith.select %175, %171, %2 : vector<32x256xi1>, vector<32x256xbf16>
    %c0_i32_126 = arith.constant 0 : i32
    %177 = vector.broadcast %c0_i32_126 : i32 to vector<1x256xi32>
    %178 = arith.cmpi eq, %19, %177 : vector<1x256xi32>
    %179 = vector.shape_cast %178 : vector<1x256xi1> to vector<1x256xi1>
    %180 = vector.broadcast %179 : vector<1x256xi1> to vector<32x256xi1>
    %181 = arith.select %180, %171, %2 : vector<32x256xi1>, vector<32x256xbf16>
    %182 = tpu.concatenate %170, %176, %170 in 1 : vector<32x17xbf16>, vector<32x256xbf16>, vector<32x17xbf16> -> vector<32x290xbf16>
    %183 = tpu.concatenate %170, %2, %170 in 1 : vector<32x17xbf16>, vector<32x256xbf16>, vector<32x17xbf16> -> vector<32x290xbf16>
    %184 = tpu.concatenate %170, %181, %170 in 1 : vector<32x17xbf16>, vector<32x256xbf16>, vector<32x17xbf16> -> vector<32x290xbf16>
    %cst_127 = arith.constant 0.000000e+00 : f32
    %185 = vector.broadcast %cst_127 : f32 to vector<80x256xf32>
    %186 = vector.extract_strided_slice %182 {offsets = [0, 0], sizes = [32, 256], strides = [1, 1]} : vector<32x290xbf16> to vector<32x256xbf16>
    %c0_128 = arith.constant 0 : index
    %c0_129 = arith.constant 0 : index
    %c0_130 = arith.constant 0 : index
    %c0_131 = arith.constant 0 : index
    %187 = vector.load %arg10[%c0_128, %c0_129, %c0_130, %c0_131] : memref<3x3x80x32xbf16, #tpu.memory_space<vmem>>, vector<1x1x80x32xbf16>
    %188 = vector.shape_cast %187 : vector<1x1x80x32xbf16> to vector<80x32xbf16>
    %cst_132 = arith.constant dense<0.000000e+00> : vector<80x256xf32>
    %189 = tpu.matmul %188, %186, %cst_132 {dimension_numbers = #tpu.dot_dimension_numbers<[1], [0], [0], [1], [0, 0, 1, 1], [], []>} : vector<80x32xbf16>, vector<32x256xbf16>, vector<80x256xf32> -> vector<80x256xf32>
    %190 = arith.addf %185, %189 : vector<80x256xf32>
    %191 = vector.extract_strided_slice %183 {offsets = [0, 1], sizes = [32, 256], strides = [1, 1]} : vector<32x290xbf16> to vector<32x256xbf16>
    %c0_133 = arith.constant 0 : index
    %c1_134 = arith.constant 1 : index
    %c0_135 = arith.constant 0 : index
    %c0_136 = arith.constant 0 : index
    %192 = vector.load %arg10[%c0_133, %c1_134, %c0_135, %c0_136] : memref<3x3x80x32xbf16, #tpu.memory_space<vmem>>, vector<1x1x80x32xbf16>
    %193 = vector.shape_cast %192 : vector<1x1x80x32xbf16> to vector<80x32xbf16>
    %cst_137 = arith.constant dense<0.000000e+00> : vector<80x256xf32>
    %194 = tpu.matmul %193, %191, %cst_137 {dimension_numbers = #tpu.dot_dimension_numbers<[1], [0], [0], [1], [0, 0, 1, 1], [], []>} : vector<80x32xbf16>, vector<32x256xbf16>, vector<80x256xf32> -> vector<80x256xf32>
    %195 = arith.addf %190, %194 : vector<80x256xf32>
    %196 = vector.extract_strided_slice %184 {offsets = [0, 2], sizes = [32, 256], strides = [1, 1]} : vector<32x290xbf16> to vector<32x256xbf16>
    %c0_138 = arith.constant 0 : index
    %c2_139 = arith.constant 2 : index
    %c0_140 = arith.constant 0 : index
    %c0_141 = arith.constant 0 : index
    %197 = vector.load %arg10[%c0_138, %c2_139, %c0_140, %c0_141] : memref<3x3x80x32xbf16, #tpu.memory_space<vmem>>, vector<1x1x80x32xbf16>
    %198 = vector.shape_cast %197 : vector<1x1x80x32xbf16> to vector<80x32xbf16>
    %cst_142 = arith.constant dense<0.000000e+00> : vector<80x256xf32>
    %199 = tpu.matmul %198, %196, %cst_142 {dimension_numbers = #tpu.dot_dimension_numbers<[1], [0], [0], [1], [0, 0, 1, 1], [], []>} : vector<80x32xbf16>, vector<32x256xbf16>, vector<80x256xf32> -> vector<80x256xf32>
    %200 = arith.addf %195, %199 : vector<80x256xf32>
    %201 = vector.extract_strided_slice %182 {offsets = [0, 16], sizes = [32, 256], strides = [1, 1]} : vector<32x290xbf16> to vector<32x256xbf16>
    %c1_143 = arith.constant 1 : index
    %c0_144 = arith.constant 0 : index
    %c0_145 = arith.constant 0 : index
    %c0_146 = arith.constant 0 : index
    %202 = vector.load %arg10[%c1_143, %c0_144, %c0_145, %c0_146] : memref<3x3x80x32xbf16, #tpu.memory_space<vmem>>, vector<1x1x80x32xbf16>
    %203 = vector.shape_cast %202 : vector<1x1x80x32xbf16> to vector<80x32xbf16>
    %cst_147 = arith.constant dense<0.000000e+00> : vector<80x256xf32>
    %204 = tpu.matmul %203, %201, %cst_147 {dimension_numbers = #tpu.dot_dimension_numbers<[1], [0], [0], [1], [0, 0, 1, 1], [], []>} : vector<80x32xbf16>, vector<32x256xbf16>, vector<80x256xf32> -> vector<80x256xf32>
    %205 = arith.addf %200, %204 : vector<80x256xf32>
    %206 = vector.extract_strided_slice %183 {offsets = [0, 17], sizes = [32, 256], strides = [1, 1]} : vector<32x290xbf16> to vector<32x256xbf16>
    %c1_148 = arith.constant 1 : index
    %c1_149 = arith.constant 1 : index
    %c0_150 = arith.constant 0 : index
    %c0_151 = arith.constant 0 : index
    %207 = vector.load %arg10[%c1_148, %c1_149, %c0_150, %c0_151] : memref<3x3x80x32xbf16, #tpu.memory_space<vmem>>, vector<1x1x80x32xbf16>
    %208 = vector.shape_cast %207 : vector<1x1x80x32xbf16> to vector<80x32xbf16>
    %cst_152 = arith.constant dense<0.000000e+00> : vector<80x256xf32>
    %209 = tpu.matmul %208, %206, %cst_152 {dimension_numbers = #tpu.dot_dimension_numbers<[1], [0], [0], [1], [0, 0, 1, 1], [], []>} : vector<80x32xbf16>, vector<32x256xbf16>, vector<80x256xf32> -> vector<80x256xf32>
    %210 = arith.addf %205, %209 : vector<80x256xf32>
    %211 = vector.extract_strided_slice %184 {offsets = [0, 18], sizes = [32, 256], strides = [1, 1]} : vector<32x290xbf16> to vector<32x256xbf16>
    %c1_153 = arith.constant 1 : index
    %c2_154 = arith.constant 2 : index
    %c0_155 = arith.constant 0 : index
    %c0_156 = arith.constant 0 : index
    %212 = vector.load %arg10[%c1_153, %c2_154, %c0_155, %c0_156] : memref<3x3x80x32xbf16, #tpu.memory_space<vmem>>, vector<1x1x80x32xbf16>
    %213 = vector.shape_cast %212 : vector<1x1x80x32xbf16> to vector<80x32xbf16>
    %cst_157 = arith.constant dense<0.000000e+00> : vector<80x256xf32>
    %214 = tpu.matmul %213, %211, %cst_157 {dimension_numbers = #tpu.dot_dimension_numbers<[1], [0], [0], [1], [0, 0, 1, 1], [], []>} : vector<80x32xbf16>, vector<32x256xbf16>, vector<80x256xf32> -> vector<80x256xf32>
    %215 = arith.addf %210, %214 : vector<80x256xf32>
    %216 = vector.extract_strided_slice %182 {offsets = [0, 32], sizes = [32, 256], strides = [1, 1]} : vector<32x290xbf16> to vector<32x256xbf16>
    %c2_158 = arith.constant 2 : index
    %c0_159 = arith.constant 0 : index
    %c0_160 = arith.constant 0 : index
    %c0_161 = arith.constant 0 : index
    %217 = vector.load %arg10[%c2_158, %c0_159, %c0_160, %c0_161] : memref<3x3x80x32xbf16, #tpu.memory_space<vmem>>, vector<1x1x80x32xbf16>
    %218 = vector.shape_cast %217 : vector<1x1x80x32xbf16> to vector<80x32xbf16>
    %cst_162 = arith.constant dense<0.000000e+00> : vector<80x256xf32>
    %219 = tpu.matmul %218, %216, %cst_162 {dimension_numbers = #tpu.dot_dimension_numbers<[1], [0], [0], [1], [0, 0, 1, 1], [], []>} : vector<80x32xbf16>, vector<32x256xbf16>, vector<80x256xf32> -> vector<80x256xf32>
    %220 = arith.addf %215, %219 : vector<80x256xf32>
    %221 = vector.extract_strided_slice %183 {offsets = [0, 33], sizes = [32, 256], strides = [1, 1]} : vector<32x290xbf16> to vector<32x256xbf16>
    %c2_163 = arith.constant 2 : index
    %c1_164 = arith.constant 1 : index
    %c0_165 = arith.constant 0 : index
    %c0_166 = arith.constant 0 : index
    %222 = vector.load %arg10[%c2_163, %c1_164, %c0_165, %c0_166] : memref<3x3x80x32xbf16, #tpu.memory_space<vmem>>, vector<1x1x80x32xbf16>
    %223 = vector.shape_cast %222 : vector<1x1x80x32xbf16> to vector<80x32xbf16>
    %cst_167 = arith.constant dense<0.000000e+00> : vector<80x256xf32>
    %224 = tpu.matmul %223, %221, %cst_167 {dimension_numbers = #tpu.dot_dimension_numbers<[1], [0], [0], [1], [0, 0, 1, 1], [], []>} : vector<80x32xbf16>, vector<32x256xbf16>, vector<80x256xf32> -> vector<80x256xf32>
    %225 = arith.addf %220, %224 : vector<80x256xf32>
    %226 = vector.extract_strided_slice %184 {offsets = [0, 34], sizes = [32, 256], strides = [1, 1]} : vector<32x290xbf16> to vector<32x256xbf16>
    %c2_168 = arith.constant 2 : index
    %c2_169 = arith.constant 2 : index
    %c0_170 = arith.constant 0 : index
    %c0_171 = arith.constant 0 : index
    %227 = vector.load %arg10[%c2_168, %c2_169, %c0_170, %c0_171] : memref<3x3x80x32xbf16, #tpu.memory_space<vmem>>, vector<1x1x80x32xbf16>
    %228 = vector.shape_cast %227 : vector<1x1x80x32xbf16> to vector<80x32xbf16>
    %cst_172 = arith.constant dense<0.000000e+00> : vector<80x256xf32>
    %229 = tpu.matmul %228, %226, %cst_172 {dimension_numbers = #tpu.dot_dimension_numbers<[1], [0], [0], [1], [0, 0, 1, 1], [], []>} : vector<80x32xbf16>, vector<32x256xbf16>, vector<80x256xf32> -> vector<80x256xf32>
    %230 = arith.addf %225, %229 : vector<80x256xf32>
    %231 = vector.broadcast %168 : vector<80x1xf32> to vector<80x256xf32>
    %232 = arith.mulf %230, %231 : vector<80x256xf32>
    %233 = vector.broadcast %169 : vector<80x1xf32> to vector<80x256xf32>
    %234 = arith.addf %232, %233 : vector<80x256xf32>
    %cst_173 = arith.constant 0.000000e+00 : f32
    %235 = vector.broadcast %cst_173 : f32 to vector<80x256xf32>
    %236 = arith.maximumf %234, %235 : vector<80x256xf32>
    %237 = arith.truncf %236 : vector<80x256xf32> to vector<80x256xbf16>
    %c0_174 = arith.constant 0 : index
    %c0_175 = arith.constant 0 : index
    %238 = vector.load %arg14[%c0_174, %c0_175] : memref<80x1xf32, #tpu.memory_space<vmem>>, vector<80x1xf32>
    %c0_176 = arith.constant 0 : index
    %c0_177 = arith.constant 0 : index
    %239 = vector.load %arg15[%c0_176, %c0_177] : memref<80x1xf32, #tpu.memory_space<vmem>>, vector<80x1xf32>
    %cst_178 = arith.constant 0.000000e+00 : bf16
    %240 = vector.broadcast %cst_178 : bf16 to vector<80x17xbf16>
    %cst_179 = arith.constant 0.000000e+00 : bf16
    %241 = vector.broadcast %cst_179 : bf16 to vector<80x256xbf16>
    %c15_i32_180 = arith.constant 15 : i32
    %242 = vector.broadcast %c15_i32_180 : i32 to vector<1x256xi32>
    %243 = arith.cmpi eq, %19, %242 : vector<1x256xi32>
    %244 = vector.shape_cast %243 : vector<1x256xi1> to vector<1x256xi1>
    %245 = vector.broadcast %244 : vector<1x256xi1> to vector<80x256xi1>
    %246 = arith.select %245, %241, %237 : vector<80x256xi1>, vector<80x256xbf16>
    %c0_i32_181 = arith.constant 0 : i32
    %247 = vector.broadcast %c0_i32_181 : i32 to vector<1x256xi32>
    %248 = arith.cmpi eq, %19, %247 : vector<1x256xi32>
    %249 = vector.shape_cast %248 : vector<1x256xi1> to vector<1x256xi1>
    %250 = vector.broadcast %249 : vector<1x256xi1> to vector<80x256xi1>
    %251 = arith.select %250, %241, %237 : vector<80x256xi1>, vector<80x256xbf16>
    %252 = tpu.concatenate %240, %246, %240 in 1 : vector<80x17xbf16>, vector<80x256xbf16>, vector<80x17xbf16> -> vector<80x290xbf16>
    %253 = tpu.concatenate %240, %237, %240 in 1 : vector<80x17xbf16>, vector<80x256xbf16>, vector<80x17xbf16> -> vector<80x290xbf16>
    %254 = tpu.concatenate %240, %251, %240 in 1 : vector<80x17xbf16>, vector<80x256xbf16>, vector<80x17xbf16> -> vector<80x290xbf16>
    %cst_182 = arith.constant 0.000000e+00 : f32
    %255 = vector.broadcast %cst_182 : f32 to vector<80x256xf32>
    %256 = vector.extract_strided_slice %252 {offsets = [0, 0], sizes = [80, 256], strides = [1, 1]} : vector<80x290xbf16> to vector<80x256xbf16>
    %c0_183 = arith.constant 0 : index
    %c0_184 = arith.constant 0 : index
    %c0_185 = arith.constant 0 : index
    %c0_186 = arith.constant 0 : index
    %257 = vector.load %arg13[%c0_183, %c0_184, %c0_185, %c0_186] : memref<3x3x80x80xbf16, #tpu.memory_space<vmem>>, vector<1x1x80x80xbf16>
    %258 = vector.shape_cast %257 : vector<1x1x80x80xbf16> to vector<80x80xbf16>
    %cst_187 = arith.constant dense<0.000000e+00> : vector<80x256xf32>
    %259 = tpu.matmul %258, %256, %cst_187 {dimension_numbers = #tpu.dot_dimension_numbers<[1], [0], [0], [1], [0, 0, 1, 1], [], []>} : vector<80x80xbf16>, vector<80x256xbf16>, vector<80x256xf32> -> vector<80x256xf32>
    %260 = arith.addf %255, %259 : vector<80x256xf32>
    %261 = vector.extract_strided_slice %253 {offsets = [0, 1], sizes = [80, 256], strides = [1, 1]} : vector<80x290xbf16> to vector<80x256xbf16>
    %c0_188 = arith.constant 0 : index
    %c1_189 = arith.constant 1 : index
    %c0_190 = arith.constant 0 : index
    %c0_191 = arith.constant 0 : index
    %262 = vector.load %arg13[%c0_188, %c1_189, %c0_190, %c0_191] : memref<3x3x80x80xbf16, #tpu.memory_space<vmem>>, vector<1x1x80x80xbf16>
    %263 = vector.shape_cast %262 : vector<1x1x80x80xbf16> to vector<80x80xbf16>
    %cst_192 = arith.constant dense<0.000000e+00> : vector<80x256xf32>
    %264 = tpu.matmul %263, %261, %cst_192 {dimension_numbers = #tpu.dot_dimension_numbers<[1], [0], [0], [1], [0, 0, 1, 1], [], []>} : vector<80x80xbf16>, vector<80x256xbf16>, vector<80x256xf32> -> vector<80x256xf32>
    %265 = arith.addf %260, %264 : vector<80x256xf32>
    %266 = vector.extract_strided_slice %254 {offsets = [0, 2], sizes = [80, 256], strides = [1, 1]} : vector<80x290xbf16> to vector<80x256xbf16>
    %c0_193 = arith.constant 0 : index
    %c2_194 = arith.constant 2 : index
    %c0_195 = arith.constant 0 : index
    %c0_196 = arith.constant 0 : index
    %267 = vector.load %arg13[%c0_193, %c2_194, %c0_195, %c0_196] : memref<3x3x80x80xbf16, #tpu.memory_space<vmem>>, vector<1x1x80x80xbf16>
    %268 = vector.shape_cast %267 : vector<1x1x80x80xbf16> to vector<80x80xbf16>
    %cst_197 = arith.constant dense<0.000000e+00> : vector<80x256xf32>
    %269 = tpu.matmul %268, %266, %cst_197 {dimension_numbers = #tpu.dot_dimension_numbers<[1], [0], [0], [1], [0, 0, 1, 1], [], []>} : vector<80x80xbf16>, vector<80x256xbf16>, vector<80x256xf32> -> vector<80x256xf32>
    %270 = arith.addf %265, %269 : vector<80x256xf32>
    %271 = vector.extract_strided_slice %252 {offsets = [0, 16], sizes = [80, 256], strides = [1, 1]} : vector<80x290xbf16> to vector<80x256xbf16>
    %c1_198 = arith.constant 1 : index
    %c0_199 = arith.constant 0 : index
    %c0_200 = arith.constant 0 : index
    %c0_201 = arith.constant 0 : index
    %272 = vector.load %arg13[%c1_198, %c0_199, %c0_200, %c0_201] : memref<3x3x80x80xbf16, #tpu.memory_space<vmem>>, vector<1x1x80x80xbf16>
    %273 = vector.shape_cast %272 : vector<1x1x80x80xbf16> to vector<80x80xbf16>
    %cst_202 = arith.constant dense<0.000000e+00> : vector<80x256xf32>
    %274 = tpu.matmul %273, %271, %cst_202 {dimension_numbers = #tpu.dot_dimension_numbers<[1], [0], [0], [1], [0, 0, 1, 1], [], []>} : vector<80x80xbf16>, vector<80x256xbf16>, vector<80x256xf32> -> vector<80x256xf32>
    %275 = arith.addf %270, %274 : vector<80x256xf32>
    %276 = vector.extract_strided_slice %253 {offsets = [0, 17], sizes = [80, 256], strides = [1, 1]} : vector<80x290xbf16> to vector<80x256xbf16>
    %c1_203 = arith.constant 1 : index
    %c1_204 = arith.constant 1 : index
    %c0_205 = arith.constant 0 : index
    %c0_206 = arith.constant 0 : index
    %277 = vector.load %arg13[%c1_203, %c1_204, %c0_205, %c0_206] : memref<3x3x80x80xbf16, #tpu.memory_space<vmem>>, vector<1x1x80x80xbf16>
    %278 = vector.shape_cast %277 : vector<1x1x80x80xbf16> to vector<80x80xbf16>
    %cst_207 = arith.constant dense<0.000000e+00> : vector<80x256xf32>
    %279 = tpu.matmul %278, %276, %cst_207 {dimension_numbers = #tpu.dot_dimension_numbers<[1], [0], [0], [1], [0, 0, 1, 1], [], []>} : vector<80x80xbf16>, vector<80x256xbf16>, vector<80x256xf32> -> vector<80x256xf32>
    %280 = arith.addf %275, %279 : vector<80x256xf32>
    %281 = vector.extract_strided_slice %254 {offsets = [0, 18], sizes = [80, 256], strides = [1, 1]} : vector<80x290xbf16> to vector<80x256xbf16>
    %c1_208 = arith.constant 1 : index
    %c2_209 = arith.constant 2 : index
    %c0_210 = arith.constant 0 : index
    %c0_211 = arith.constant 0 : index
    %282 = vector.load %arg13[%c1_208, %c2_209, %c0_210, %c0_211] : memref<3x3x80x80xbf16, #tpu.memory_space<vmem>>, vector<1x1x80x80xbf16>
    %283 = vector.shape_cast %282 : vector<1x1x80x80xbf16> to vector<80x80xbf16>
    %cst_212 = arith.constant dense<0.000000e+00> : vector<80x256xf32>
    %284 = tpu.matmul %283, %281, %cst_212 {dimension_numbers = #tpu.dot_dimension_numbers<[1], [0], [0], [1], [0, 0, 1, 1], [], []>} : vector<80x80xbf16>, vector<80x256xbf16>, vector<80x256xf32> -> vector<80x256xf32>
    %285 = arith.addf %280, %284 : vector<80x256xf32>
    %286 = vector.extract_strided_slice %252 {offsets = [0, 32], sizes = [80, 256], strides = [1, 1]} : vector<80x290xbf16> to vector<80x256xbf16>
    %c2_213 = arith.constant 2 : index
    %c0_214 = arith.constant 0 : index
    %c0_215 = arith.constant 0 : index
    %c0_216 = arith.constant 0 : index
    %287 = vector.load %arg13[%c2_213, %c0_214, %c0_215, %c0_216] : memref<3x3x80x80xbf16, #tpu.memory_space<vmem>>, vector<1x1x80x80xbf16>
    %288 = vector.shape_cast %287 : vector<1x1x80x80xbf16> to vector<80x80xbf16>
    %cst_217 = arith.constant dense<0.000000e+00> : vector<80x256xf32>
    %289 = tpu.matmul %288, %286, %cst_217 {dimension_numbers = #tpu.dot_dimension_numbers<[1], [0], [0], [1], [0, 0, 1, 1], [], []>} : vector<80x80xbf16>, vector<80x256xbf16>, vector<80x256xf32> -> vector<80x256xf32>
    %290 = arith.addf %285, %289 : vector<80x256xf32>
    %291 = vector.extract_strided_slice %253 {offsets = [0, 33], sizes = [80, 256], strides = [1, 1]} : vector<80x290xbf16> to vector<80x256xbf16>
    %c2_218 = arith.constant 2 : index
    %c1_219 = arith.constant 1 : index
    %c0_220 = arith.constant 0 : index
    %c0_221 = arith.constant 0 : index
    %292 = vector.load %arg13[%c2_218, %c1_219, %c0_220, %c0_221] : memref<3x3x80x80xbf16, #tpu.memory_space<vmem>>, vector<1x1x80x80xbf16>
    %293 = vector.shape_cast %292 : vector<1x1x80x80xbf16> to vector<80x80xbf16>
    %cst_222 = arith.constant dense<0.000000e+00> : vector<80x256xf32>
    %294 = tpu.matmul %293, %291, %cst_222 {dimension_numbers = #tpu.dot_dimension_numbers<[1], [0], [0], [1], [0, 0, 1, 1], [], []>} : vector<80x80xbf16>, vector<80x256xbf16>, vector<80x256xf32> -> vector<80x256xf32>
    %295 = arith.addf %290, %294 : vector<80x256xf32>
    %296 = vector.extract_strided_slice %254 {offsets = [0, 34], sizes = [80, 256], strides = [1, 1]} : vector<80x290xbf16> to vector<80x256xbf16>
    %c2_223 = arith.constant 2 : index
    %c2_224 = arith.constant 2 : index
    %c0_225 = arith.constant 0 : index
    %c0_226 = arith.constant 0 : index
    %297 = vector.load %arg13[%c2_223, %c2_224, %c0_225, %c0_226] : memref<3x3x80x80xbf16, #tpu.memory_space<vmem>>, vector<1x1x80x80xbf16>
    %298 = vector.shape_cast %297 : vector<1x1x80x80xbf16> to vector<80x80xbf16>
    %cst_227 = arith.constant dense<0.000000e+00> : vector<80x256xf32>
    %299 = tpu.matmul %298, %296, %cst_227 {dimension_numbers = #tpu.dot_dimension_numbers<[1], [0], [0], [1], [0, 0, 1, 1], [], []>} : vector<80x80xbf16>, vector<80x256xbf16>, vector<80x256xf32> -> vector<80x256xf32>
    %300 = arith.addf %295, %299 : vector<80x256xf32>
    %301 = vector.broadcast %238 : vector<80x1xf32> to vector<80x256xf32>
    %302 = arith.mulf %300, %301 : vector<80x256xf32>
    %303 = vector.broadcast %239 : vector<80x1xf32> to vector<80x256xf32>
    %304 = arith.addf %302, %303 : vector<80x256xf32>
    %cst_228 = arith.constant 0.000000e+00 : f32
    %305 = vector.broadcast %cst_228 : f32 to vector<80x256xf32>
    %306 = arith.maximumf %304, %305 : vector<80x256xf32>
    %c0_229 = arith.constant 0 : index
    %c0_230 = arith.constant 0 : index
    %307 = vector.load %arg16[%c0_229, %c0_230] : memref<80x80xbf16, #tpu.memory_space<vmem>>, vector<80x80xbf16>
    %308 = arith.truncf %306 : vector<80x256xf32> to vector<80x256xbf16>
    %cst_231 = arith.constant dense<0.000000e+00> : vector<80x256xf32>
    %309 = tpu.matmul %307, %308, %cst_231 {dimension_numbers = #tpu.dot_dimension_numbers<[1], [0], [0], [1], [0, 0, 1, 1], [], []>} : vector<80x80xbf16>, vector<80x256xbf16>, vector<80x256xf32> -> vector<80x256xf32>
    %c0_232 = arith.constant 0 : index
    %c0_233 = arith.constant 0 : index
    %310 = vector.load %arg17[%c0_232, %c0_233] : memref<80x1xf32, #tpu.memory_space<vmem>>, vector<80x1xf32>
    %311 = vector.broadcast %310 : vector<80x1xf32> to vector<80x256xf32>
    %312 = arith.addf %309, %311 : vector<80x256xf32>
    %c0_234 = arith.constant 0 : index
    %c64 = arith.constant 64 : index
    %c0_235 = arith.constant 0 : index
    %313 = vector.load %arg18[%c0_234, %c64, %c0_235] : memref<1x144x256xf32, #tpu.memory_space<vmem>>, vector<1x80x256xf32>
    %314 = vector.shape_cast %313 : vector<1x80x256xf32> to vector<80x256xf32>
    %315 = vector.shape_cast %312 : vector<80x256xf32> to vector<1x80x256xf32>
    tpu.vector_store %arg18[%c0_234, %c64, %c0_235], %315 {strides = array<i32>} : memref<1x144x256xf32, #tpu.memory_space<vmem>>, vector<1x80x256xf32>,
    return
  }
  func.func @transform_0(%arg0: i32) -> (i32, i32, i32) {
    %c0_i32 = arith.constant 0 : i32
    %c0_i32_0 = arith.constant 0 : i32
    %c0_i32_1 = arith.constant 0 : i32
    return %arg0, %c0_i32, %c0_i32_0 : i32, i32, i32
  }
  func.func @transform_1(%arg0: i32) -> (i32, i32, i32, i32) {
    %c0_i32 = arith.constant 0 : i32
    %c0_i32_0 = arith.constant 0 : i32
    %c0_i32_1 = arith.constant 0 : i32
    %c0_i32_2 = arith.constant 0 : i32
    %c0_i32_3 = arith.constant 0 : i32
    return %c0_i32, %c0_i32_0, %c0_i32_1, %c0_i32_2 : i32, i32, i32, i32
  }
  func.func @transform_2(%arg0: i32) -> (i32, i32) {
    %c0_i32 = arith.constant 0 : i32
    %c0_i32_0 = arith.constant 0 : i32
    %c0_i32_1 = arith.constant 0 : i32
    return %c0_i32, %c0_i32_0 : i32, i32
  }
  func.func @transform_3(%arg0: i32) -> (i32, i32) {
    %c0_i32 = arith.constant 0 : i32
    %c0_i32_0 = arith.constant 0 : i32
    %c0_i32_1 = arith.constant 0 : i32
    return %c0_i32, %c0_i32_0 : i32, i32
  }
  func.func @transform_4(%arg0: i32) -> (i32, i32, i32, i32) {
    %c0_i32 = arith.constant 0 : i32
    %c0_i32_0 = arith.constant 0 : i32
    %c0_i32_1 = arith.constant 0 : i32
    %c0_i32_2 = arith.constant 0 : i32
    %c0_i32_3 = arith.constant 0 : i32
    return %c0_i32, %c0_i32_0, %c0_i32_1, %c0_i32_2 : i32, i32, i32, i32
  }
  func.func @transform_5(%arg0: i32) -> (i32, i32) {
    %c0_i32 = arith.constant 0 : i32
    %c0_i32_0 = arith.constant 0 : i32
    %c0_i32_1 = arith.constant 0 : i32
    return %c0_i32, %c0_i32_0 : i32, i32
  }
  func.func @transform_6(%arg0: i32) -> (i32, i32) {
    %c0_i32 = arith.constant 0 : i32
    %c0_i32_0 = arith.constant 0 : i32
    %c0_i32_1 = arith.constant 0 : i32
    return %c0_i32, %c0_i32_0 : i32, i32
  }
  func.func @transform_7(%arg0: i32) -> (i32, i32) {
    %c0_i32 = arith.constant 0 : i32
    %c0_i32_0 = arith.constant 0 : i32
    %c0_i32_1 = arith.constant 0 : i32
    return %c0_i32, %c0_i32_0 : i32, i32
  }
  func.func @transform_8(%arg0: i32) -> (i32, i32) {
    %c0_i32 = arith.constant 0 : i32
    %c0_i32_0 = arith.constant 0 : i32
    %c0_i32_1 = arith.constant 0 : i32
    return %c0_i32, %c0_i32_0 : i32, i32
  }
  func.func @transform_9(%arg0: i32) -> (i32, i32, i32, i32) {
    %c0_i32 = arith.constant 0 : i32
    %c0_i32_0 = arith.constant 0 : i32
    %c0_i32_1 = arith.constant 0 : i32
    %c0_i32_2 = arith.constant 0 : i32
    %c0_i32_3 = arith.constant 0 : i32
    return %c0_i32, %c0_i32_0, %c0_i32_1, %c0_i32_2 : i32, i32, i32, i32
  }
  func.func @transform_10(%arg0: i32) -> (i32, i32) {
    %c0_i32 = arith.constant 0 : i32
    %c0_i32_0 = arith.constant 0 : i32
    %c0_i32_1 = arith.constant 0 : i32
    return %c0_i32, %c0_i32_0 : i32, i32
  }
  func.func @transform_11(%arg0: i32) -> (i32, i32) {
    %c0_i32 = arith.constant 0 : i32
    %c0_i32_0 = arith.constant 0 : i32
    %c0_i32_1 = arith.constant 0 : i32
    return %c0_i32, %c0_i32_0 : i32, i32
  }
  func.func @transform_12(%arg0: i32) -> (i32, i32, i32, i32) {
    %c0_i32 = arith.constant 0 : i32
    %c0_i32_0 = arith.constant 0 : i32
    %c0_i32_1 = arith.constant 0 : i32
    %c0_i32_2 = arith.constant 0 : i32
    %c0_i32_3 = arith.constant 0 : i32
    return %c0_i32, %c0_i32_0, %c0_i32_1, %c0_i32_2 : i32, i32, i32, i32
  }
  func.func @transform_13(%arg0: i32) -> (i32, i32) {
    %c0_i32 = arith.constant 0 : i32
    %c0_i32_0 = arith.constant 0 : i32
    %c0_i32_1 = arith.constant 0 : i32
    return %c0_i32, %c0_i32_0 : i32, i32
  }
  func.func @transform_14(%arg0: i32) -> (i32, i32) {
    %c0_i32 = arith.constant 0 : i32
    %c0_i32_0 = arith.constant 0 : i32
    %c0_i32_1 = arith.constant 0 : i32
    return %c0_i32, %c0_i32_0 : i32, i32
  }
  func.func @transform_15(%arg0: i32) -> (i32, i32) {
    %c0_i32 = arith.constant 0 : i32
    %c0_i32_0 = arith.constant 0 : i32
    %c0_i32_1 = arith.constant 0 : i32
    return %c0_i32, %c0_i32_0 : i32, i32
  }
  func.func @transform_16(%arg0: i32) -> (i32, i32) {
    %c0_i32 = arith.constant 0 : i32
    %c0_i32_0 = arith.constant 0 : i32
    %c0_i32_1 = arith.constant 0 : i32
    return %c0_i32, %c0_i32_0 : i32, i32
  }
  func.func @transform_17(%arg0: i32) -> (i32, i32, i32) {
    %c0_i32 = arith.constant 0 : i32
    %c0_i32_0 = arith.constant 0 : i32
    %c0_i32_1 = arith.constant 0 : i32
    return %arg0, %c0_i32, %c0_i32_0 : i32, i32, i32
  }
}

</mosaic_0001>

<bundles_post_ra>
// kernel: tpu_custom_call.1
= control target key start
LH: loop header
LB: loop body
LE: loop exit
PB: predicated region body
PF: predicated region fallthrough
CT: control target
= control target key end

     0   :  { %s12740_s0 = inlined_call_operand.vmem [shape: f32[2,32,256], index: 0, kind: input, shape index: {}]   ;;  %s12741_s1 = inlined_call_operand.vmem [shape: bf16[3,3,64,32], index: 1, kind: input, shape index: {}]   ;;  %s12742_s2 = inlined_call_operand.vmem [shape: f32[64,1], index: 2, kind: input, shape index: {}]   ;;  %s12743_s3 = inlined_call_operand.vmem [shape: f32[64,1], index: 3, kind: input, shape index: {}]   ;;  %s12744_s4 = inlined_call_operand.vmem [shape: bf16[3,3,64,64], index: 4, kind: input, shape index: {}]   ;;  %s12745_s5 = inlined_call_operand.vmem [shape: f32[64,1], index: 5, kind: input, shape index: {}]   ;;  %s12746_s6 = inlined_call_operand.vmem [shape: f32[64,1], index: 6, kind: input, shape index: {}]   ;;  %s12747_s7 = inlined_call_operand.vmem [shape: bf16[64,64], index: 7, kind: input, shape index: {}]   ;;  %s12748_s8 = inlined_call_operand.vmem [shape: f32[64,1], index: 8, kind: input, shape index: {}]   ;;  %s12749_s9 = inlined_call_operand.vmem [shape: bf16[3,3,80,32], index: 9, kind: input, shape index: {}]   ;;  %s12750_s10 = inlined_call_operand.vmem [shape: f32[80,1], index: 10, kind: input, shape index: {}]   ;;  %s12751_s11 = inlined_call_operand.vmem [shape: f32[80,1], index: 11, kind: input, shape index: {}]   ;;  %s12752_s12 = inlined_call_operand.vmem [shape: bf16[3,3,80,80], index: 12, kind: input, shape index: {}]   ;;  %s12753_s13 = inlined_call_operand.vmem [shape: f32[80,1], index: 13, kind: input, shape index: {}]   ;;  %s12754_s14 = inlined_call_operand.vmem [shape: f32[80,1], index: 14, kind: input, shape index: {}]   ;;  %s12755_s15 = inlined_call_operand.vmem [shape: bf16[80,80], index: 15, kind: input, shape index: {}]   ;;  %s12756_s16 = inlined_call_operand.vmem [shape: f32[80,1], index: 16, kind: input, shape index: {}]   ;;  %s12757_s17 = inlined_call_operand.hbm [shape: f32[2,144,256], index: 17, kind: output, shape index: {}]  }
   0x1   :  { %12817 = sst [smem:[#allocation36_spill]] %s12740_s0 }
   0x2   :  { %12818 = sst [smem:[#allocation37_spill]] %s12741_s1 }
   0x3   :  { %12819 = sst [smem:[#allocation38_spill]] %s12742_s2 }
   0x4   :  { %12820 = sst [smem:[#allocation39_spill]] %s12743_s3 }
   0x5   :  { %12821 = sst [smem:[#allocation40_spill]] %s12744_s4 }
   0x6   :  { %12822 = sst [smem:[#allocation41_spill]] %s12749_s9 }
   0x7   :  { %12823 = sst [smem:[#allocation42_spill]] %s12757_s17 }
   0x8   :  { %22 = vsyncpa [#allocation3], 0 }
   0x9   :  { %24 = vsyncpa [#allocation3 + $0x1], 0  ;;  %s9773_s24 = smov 0   ;;  %s9775_s25 = smov 0  }
   0xa   :  { %s9777_s26 = smov 0   ;;  %s9779_s27 = smov 0  }
   0xb LB: > { %12824 = sst [smem:[#allocation5_spill]] %s9656_s24  ;;  %s9794_s28 = sadd.s32 4294967295, %s9668_s27   ;;  %s9668_s27 = sphi %s9779_s27, %s12906_s27   ;;  %s9664_s26 = sphi %s9777_s26, %s12908_s26   ;;  %s9660_s25 = sphi %s9775_s25, %s12910_s25   ;;  %s9656_s24 = sphi %s9773_s24, %s12909_s24  }
   0xc   : > { %12825 = sst [smem:[#allocation6_spill]] %s9664_s26  ;;  %s8128_s29 = sadd.s32 4294967294, %s9668_s27  }
   0xd   : > { %12826 = sst [smem:[#allocation7_spill]] %s9668_s27  ;;  %s9798_s0 = sadd.s32 1, %s9668_s27  }
   0xe   : > { %12827 = sst [smem:[#allocation8_spill]] %s9794_s28  ;;  %s399_s30 = sadd.s32 1, %s9664_s26 }
   0xf   : > { %12828 = sst [smem:[#allocation9_spill]] %s9798_s0  ;;  %s396_s18 = ssub.s32 %s9668_s27, %s9798_s0 }
  0x10   : > { %p409_p0 = scmp.ne.s32.totalorder %s9664_s26, %s9660_s25  ;;  %p397_p1 = scmp.eq.s32.totalorder %s396_s18, 0 }
  0x11   : > { %p410_p2 = scmp.eq.s32.totalorder %s9794_s28, 1  ;;  %p415_p3 = scmp.ne.s32.totalorder %s9660_s25, %s9656_s24 }
  0x12   : > { %p416_p4 = scmp.eq.s32.totalorder %s8128_s29, 1  ;;  %p8131_p7 = scmp.ge.s32.totalorder %s9668_s27, 1 }
  0x13   : > { %s9809_s19 = scalar_select %p397_p1, %s9664_s26, %s399_s30  }
  0x14   : > { %p9811_p5 = por %p410_p2, %p409_p0  ;;  %p9815_p6 = por %p416_p4, %p415_p3 }
  0x15   : > { %12829 = sst [smem:[#allocation10_spill]] %s9809_s19  ;;  %p490_p8 = scmp.lt.s32.totalorder %s9668_s27, 3 }
  0x16   : > { %s12830_s1 = scalar_select %p9811_p5, 1, 0 }
  0x17   : > { %s12832_s20 = scalar_select %p9815_p6, 1, 0 }
  0x18   : > { %12831 = sst [smem:[#allocation11_spill]] %s12830_s1  ;;  %p491_p9 = pnand %p8131_p7, %p490_p8 }
  0x19   : > { %12833 = sst [smem:[#allocation12_spill]] %s12832_s20 }
  0x1a   : > { %494 = sbr.rel (%p491_p9) target bundleno = 3163 (0xc5b), region = 88 }
  0x21   : > { %p542_p10 = scmp.lt.s32.totalorder %s9794_s28, 1  ;;  %v562_v0 = vlaneseq  ;;  %v12782_v1 = vmov 0   ;;  %s12834_s30 = sld [smem:[#allocation36_spill]]  ;;  %vm661_vm7 = vcmask 138240   ;;  %vm775_vm11 = vcmask 1039360  }
  0x22   : > { %829 = vmatprep.mubr.bf16.mxu0 %v12782_v1  ;;  %9434 = vset.pattern.permute.xlu1 %v12782_v1  ;;  %vm784_vm12 = vcmask 261120   ;;  %vm9961_vm13 = vmneg %vm661_vm7  ;;  %s12763_s23 = smov 112   ;;  %s12769_s29 = smov 110   ;;  %vm1020_vm14 = vcmask 1031168   ;;  %vm1175_vm15 = vcmask 916480  }
  0x23   : > { %s543_s21 = scalar_select %p542_p10, %s9794_s28, 1  ;;  %v563_v2 = vand.u32 127, %v562_v0  ;;  %v614_v3 = vshrl.u32 %v562_v0, 7  ;;  %9433 = vset.pattern.permute.xlu0 %v12782_v1  ;;  %2478 = vmatprep.mubr.bf16.mxu1 %v12782_v1 }
  0x24   : > { %s12852_s2 = sld [smem:[#allocation38_spill]]  ;;  %s12853_s3 = sld [smem:[#allocation39_spill]] }
  0x25   : > { %s8793_s22 = sshll.u32 %s543_s21, 6  ;;  %v564_v4 = vadd.s32 128, %v563_v2  ;;  %v569_v5 = vand.u32 15, %v563_v2  ;;  %v615_v15 = vsub.s32 0, %v614_v3  ;;  %v619_v16 = vsub.s32 4, %v614_v3  ;;  %s12765_s21 = smov 17  }
  0x26   : > { %s12867_s26 = smov 126   ;;  %s12868_s4 = sld [smem:[#allocation40_spill]] }
  0x27   : > { %s546_s18 = scalar_lea.vmem %s12834_s30, %s8793_s22  ;;  %v576_v9 = vand.u32 15, %v564_v4  ;;  %vm9830_vm0 = vcmp.eq.s32.totalorder %v569_v5, 0  ;;  %vm605_vm4 = vcmp.eq.s32.totalorder %v569_v5, 15  ;;  %s12761_s22 = smov 127  }
  0x28   : > { %v550_v6 = vld [vmem:[%s546_s18] sm:$0xff]  ;;  %v552_v7 = vld [vmem:[%s546_s18 + $0x10] sm:$0xff]  ;;  %v551_v13 = vld [vmem:[%s546_s18 + $0x8] sm:$0xff]  ;;  %s12841_s30 = sld [smem:[#allocation37_spill]]  ;;  %s12870_s20 = smov 112  }
  0x29   : > { %v554_v8 = vld [vmem:[%s546_s18 + $0x20] sm:$0xff]  ;;  %v558_v11 = vpack.c.bf16 %v552_v7, %v550_v6  ;;  %v556_v12 = vld [vmem:[%s546_s18 + $0x30] sm:$0xff]  ;;  %v553_v14 = vld [vmem:[%s546_s18 + $0x18] sm:$0xff]  ;;  %vm628_vm1 = vcmp.eq.s32.totalorder %v576_v9, 0  ;;  %vm606_vm5 = vcmp.eq.s32.totalorder %v576_v9, 15  ;;  %s12871_s19 = smov 111  }
  0x2a   : > { %v560_v17 = vpack.c.bf16 %v556_v12, %v554_v8  ;;  %v555_v18 = vld [vmem:[%s546_s18 + $0x28] sm:$0xff]  ;;  %v557_v19 = vld [vmem:[%s546_s18 + $0x38] sm:$0xff]  ;;  %v559_v20 = vpack.c.bf16 %v553_v14, %v551_v13  ;;  %vm633_vm2 = vmpackc.low %vm628_vm1, %vm9830_vm0  ;;  %s12759_s18 = smov 126   ;;  %vm1326_vm0 = vcmask 908288   ;;  %vm1477_vm1 = vcmask 900096   ;;  %s12872_s0 = smov 110  }
  0x2b   : > { %682 = vrot.lane.b32.xlu0 %v558_v11, %s12765_s21  ;;  %v561_v21 = vpack.c.bf16 %v557_v19, %v555_v18  ;;  %v634_v22 = vsel %vm633_vm2, 65537, %v12782_v1  ;;  %vm611_vm6 = vmpackc.low %vm606_vm5, %vm605_vm4  ;;  %vm1628_vm2 = vcmask 785408   ;;  %vm1779_vm4 = vcmask 777216   ;;  %s12875_s24 = smov 94   ;;  %s12876_s9 = sld [smem:[#allocation41_spill]]  ;;  %v9562_v7 = vld [vmem:[%s12752_s12 + $0x8] sm:$0xff]  }
  0x2c   : > { %686 = vrot.lane.b32.xlu1 %v560_v17, %s12765_s21  ;;  %v9839_v23 = vrot.slane %v634_v22, %v615_v15  ;;  %v9841_v24 = vrot.slane %v634_v22, %v619_v16  ;;  %v612_v26 = vsel %vm611_vm6, 65537, %v12782_v1  ;;  %vm1930_vm5 = vcmask 769024   ;;  %s12900_s28 = sld [smem:[#allocation8_spill]] }
  0x2d   : > { %v9850_v27 = vrot.slane %v612_v26, %v619_v16  ;;  %v9852_v28 = vrot.slane %v612_v26, %v615_v15  ;;  %vm2433_vm6 = vcmask 523264  }
  0x2e   : > { %12837 = vst [vmem:[#allocation13_spill] sm:$0xff] %v9839_v23  ;;  %12838 = vst [vmem:[#allocation14_spill] sm:$0xff] %v9841_v24  ;;  %vm643_vm3 = vcmp.ne.s16.totalorder %v9839_v23, 0  ;;  %vm644_vm8 = vcmp.ne.s16.totalorder %v9841_v24, 0  ;;  %v9435_v57 = vld [vmem:[%s12841_s30 + $0x20] sm:$0xff]   ;;  %v9436_v3 = vld [vmem:[%s12841_s30 + $0x28] sm:$0xff]  }
  0x2f   : > { %684 = vrot.lane.b32.xlu0 %v559_v20, %s12765_s21  ;;  %v645_v25 = vsel %vm643_vm3, 0, %v558_v11  ;;  %12839 = vst [vmem:[#allocation15_spill] sm:$0xff] %v9850_v27  ;;  %12840 = vst [vmem:[#allocation16_spill] sm:$0xff] %v9852_v28  ;;  %v646_v39 = vsel %vm644_vm8, 0, %v559_v20  ;;  %v648_v40 = vsel %vm644_vm8, 0, %v561_v21  ;;  %vm622_vm9 = vcmp.ne.s16.totalorder %v9850_v27, 0 }
  0x30   : > { %688 = vrot.lane.b32.xlu1 %v561_v21, %s12765_s21  ;;  %v647_v41 = vsel %vm643_vm3, 0, %v560_v17  ;;  %v624_v42 = vsel %vm622_vm9, 0, %v559_v20  ;;  %vm621_vm10 = vcmp.ne.s16.totalorder %v9852_v28, 0  ;;  %v626_v44 = vsel %vm622_vm9, 0, %v561_v21  ;;  %v9437_v14 = vld [vmem:[%s12841_s30 + $0x30] sm:$0xff]   ;;  %v9439_v18 = vld [vmem:[%s12841_s30] sm:$0xff]  }
  0x31   : > { %v623_v43 = vsel %vm621_vm10, 0, %v558_v11  ;;  %v625_v45 = vsel %vm621_vm10, 0, %v560_v17  ;;  %v9438_v17 = vld [vmem:[%s12841_s30 + $0x38] sm:$0xff]   ;;  %v9440_v19 = vld [vmem:[%s12841_s30 + $0x8] sm:$0xff]   ;;  %v9441_v20 = vld [vmem:[%s12841_s30 + $0x10] sm:$0xff]  }
  0x32   : > { %v9442_v21 = vld [vmem:[%s12841_s30 + $0x18] sm:$0xff]  }
  0x34   : > { %704 = vrot.lane.b32.xlu1 %v645_v25, %s12765_s21 }
  0x9d   : > { %v683_v29 = vpop.permute.xlu0 %682 }
  0x9e   : > { %v687_v30 = vpop.permute.xlu1 %686  ;;  %v9868_v36 = vsel %vm661_vm7, 0, %v683_v29 }
  0x9f   : > { %v9879_v38 = vsel %vm661_vm7, 0, %v687_v30 }
  0xa1   : > { %v685_v31 = vpop.permute.xlu0 %684 }
  0xa2   : > { %v9855_v32 = vsel %vm661_vm7, %v683_v29, %v685_v31  ;;  %v9858_v33 = vsel %vm661_vm7, %v685_v31, 0  ;;  %v689_v34 = vpop.permute.xlu1 %688 }
  0xa3   : > { %765 = vrot.lane.b32.xlu0 %v9855_v32, %s12761_s22  ;;  %767 = vrot.lane.b32.xlu1 %v9858_v33, %s12761_s22  ;;  %v9865_v35 = vsel %vm661_vm7, %v687_v30, %v689_v34  ;;  %v9875_v37 = vsel %vm661_vm7, %v689_v34, 0 }
  0xa6   : > { %v705_v46 = vpop.permute.xlu1 %704 }
  0xa7   : > { %763 = vrot.lane.b32.xlu0 %v9868_v36, %s12761_s22  ;;  %771 = vrot.lane.b32.xlu1 %v9865_v35, %s12761_s22  ;;  %v9943_v0 = vsel %vm661_vm7, 0, %v705_v46 }
  0xab   : > { %773 = vrot.lane.b32.xlu0 %v9875_v37, %s12761_s22  ;;  %769 = vrot.lane.b32.xlu1 %v9879_v38, %s12761_s22  ;;  %s12767_s22 = smov 111  }
  0xaf   : > { %706 = vrot.lane.b32.xlu0 %v646_v39, %s12765_s21  ;;  %710 = vrot.lane.b32.xlu1 %v648_v40, %s12765_s21 }
  0xb3   : > { %708 = vrot.lane.b32.xlu0 %v647_v41, %s12765_s21  ;;  %655 = vrot.lane.b32.xlu1 %v624_v42, %s12765_s21 }
  0xb7   : > { %653 = vrot.lane.b32.xlu0 %v623_v43, %s12765_s21  ;;  %659 = vrot.lane.b32.xlu1 %v626_v44, %s12765_s21  ;;  %v9444_v43 = vld [vmem:[%s12841_s30 + $0x48] sm:$0xff]  }
  0xbb   : > { %657 = vrot.lane.b32.xlu0 %v625_v45, %s12765_s21  ;;  %s12775_s21 = smov 96  }
 0x115   : > { %v766_v47 = vpop.permute.xlu0 %765  ;;  %v768_v48 = vpop.permute.xlu1 %767 }
 0x116   : > { %v9909_v49 = vsel %vm775_vm11, %v766_v47, %v768_v48 }
 0x117   : > { %797 = vmatprep.subr.bf16.mxu0 %v9909_v49 }
 0x119   : > { %v764_v50 = vpop.permute.xlu0 %763  ;;  %v772_v51 = vpop.permute.xlu1 %771 }
 0x11a   : > { %v9913_v52 = vsel %vm775_vm11, %v764_v50, %v766_v47 }
 0x11b   : > { %798 = vmatpush1.bf16.msra.mxu0 %v9913_v52 }
 0x11d   : > { %v774_v53 = vpop.permute.xlu0 %773  ;;  %v770_v54 = vpop.permute.xlu1 %769 }
 0x11e   : > { %v9917_v55 = vsel %vm775_vm11, %v772_v51, %v774_v53  ;;  %v9920_v56 = vsel %vm775_vm11, %v770_v54, %v772_v51  ;;  %v9445_v53 = vld [vmem:[%s12841_s30 + $0x50] sm:$0xff]   ;;  %v9446_v54 = vld [vmem:[%s12841_s30 + $0x58] sm:$0xff]  }
 0x11f   : > { %799 = vmatprep.subr.bf16.mxu0 %v9917_v55 }
 0x120   : > { %800 = vmatpush1.bf16.msra.mxu0 %v9920_v56 }
 0x121   : > { %v707_v58 = vpop.permute.xlu0 %706  ;;  %v711_v61 = vpop.permute.xlu1 %710 }
 0x122   : > { %v9928_v59 = vsel %vm661_vm7, %v707_v58, 0  ;;  %v9931_v60 = vsel %vm661_vm7, %v705_v46, %v707_v58  ;;  %v9958_v6 = vsel %vm661_vm7, %v711_v61, 0 }
 0x123   : > { %1012 = vrot.lane.b32.xlu1 %v9928_v59, %s12759_s18  ;;  %1010 = vrot.lane.b32.xlu0 %v9931_v60, %s12759_s18 }
 0x124   : > { %8146 = vmatmul.mubr.msk.bf16.vlgmr.msra.gmra.mrb[0].mxu0 %vm784_vm12, %v9435_v57 }
 0x125   : > { %v709_v62 = vpop.permute.xlu0 %708  ;;  %839 = vmatprep.mubr.bf16.mxu0 %v12782_v1  ;;  %v656_v2 = vpop.permute.xlu1 %655 }
 0x126   : > { %v9940_v63 = vsel %vm661_vm7, %v709_v62, %v711_v61  ;;  %v9955_v5 = vsel %vm661_vm7, 0, %v709_v62  ;;  %v675_v9 = vsel %vm661_vm7, %v656_v2, 0  ;;  %v9447_v61 = vld [vmem:[%s12841_s30 + $0x60] sm:$0xff]  }
 0x127   : > { %1016 = vrot.lane.b32.xlu1 %v9940_v63, %s12759_s18  ;;  %1008 = vrot.lane.b32.xlu0 %v9943_v0, %s12759_s18 }
 0x129   : > { %v9952_v4 = vpop.permute.xlu0 %653  ;;  %v660_v10 = vpop.permute.xlu1 %659 }
 0x12a   : > { %v9971_v8 = vsel %vm661_vm7, %v9952_v4, %v656_v2  ;;  %v669_v13 = vsel %vm661_vm7, 0, %v9952_v4  ;;  %v677_v15 = vsel %vm661_vm7, %v660_v10, 0 }
 0x12b   : > { %1014 = vrot.lane.b32.xlu1 %v9955_v5, %s12759_s18  ;;  %1018 = vrot.lane.b32.xlu0 %v9958_v6, %s12759_s18  ;;  %s12873_s18 = smov 96  }
 0x12c   : > { %902 = vmatprep.subr.bf16.mxu0 %v9971_v8  ;;  %8147 = vmatmul.mubr.msk.bf16.gmra.mrb[4].mxu0 %vm784_vm12, %v9436_v3 }
 0x12d   : > { %v9976_v11 = vpop.permute.xlu0 %657  ;;  %8155 = vmatpush1.bf16.msk.msra.mxu0 %vm9961_vm13, %v9952_v4  ;;  %849 = vmatprep.mubr.bf16.mxu0 %v12782_v1 }
 0x12e   : > { %v9987_v12 = vsel %vm661_vm7, %v9976_v11, %v660_v10  ;;  %v672_v16 = vsel %vm661_vm7, 0, %v9976_v11  ;;  %v9450_v10 = vld [vmem:[%s12841_s30 + $0x78] sm:$0xff]  }
 0x12f   : > { %1167 = vrot.lane.b32.xlu1 %v675_v9, %s12763_s23  ;;  %1165 = vrot.lane.b32.xlu0 %v9971_v8, %s12763_s23 }
 0x130   : > { %904 = vmatprep.subr.bf16.mxu0 %v9987_v12 }
 0x131   : > { %8157 = vmatpush1.bf16.msk.msra.mxu0 %vm9961_vm13, %v9976_v11 }
 0x133   : > { %1163 = vrot.lane.b32.xlu0 %v669_v13, %s12763_s23  ;;  %1171 = vrot.lane.b32.xlu1 %v9987_v12, %s12763_s23 }
 0x134   : > { %8148 = vmatmul.mubr.msk.bf16.gmra.mrb[8].mxu0 %vm784_vm12, %v9437_v14 }
 0x135   : > { %859 = vmatprep.mubr.bf16.mxu0 %v12782_v1 }
 0x137   : > { %1173 = vrot.lane.b32.xlu0 %v677_v15, %s12763_s23  ;;  %1169 = vrot.lane.b32.xlu1 %v672_v16, %s12763_s23  ;;  %s12874_s23 = smov 95  }
 0x13b   : > { %1316 = vrot.lane.b32.xlu0 %v9855_v32, %s12767_s22  ;;  %1318 = vrot.lane.b32.xlu1 %v9858_v33, %s12767_s22 }
 0x13c   : > { %8149 = vmatmul.mubr.msk.bf16.gmra.mrb[12].mxu0 %vm784_vm12, %v9438_v17  ;;  %v9451_v17 = vld [vmem:[%s12841_s30 + $0x80] sm:$0xff]  }
 0x13d   : > { %934 = vmatprep.mubr.bf16.mxu0 %v12782_v1 }
 0x13f   : > { %1314 = vrot.lane.b32.xlu0 %v9868_v36, %s12767_s22  ;;  %1322 = vrot.lane.b32.xlu1 %v9865_v35, %s12767_s22 }
 0x143   : > { %1324 = vrot.lane.b32.xlu0 %v9875_v37, %s12767_s22  ;;  %1320 = vrot.lane.b32.xlu1 %v9879_v38, %s12767_s22  ;;  %s12773_s22 = smov 95  }
 0x144   : > { %8158 = vmatmul.mubr.msk.bf16.vlgmr.msra.gmra.mrb[0].mxu0 %vm784_vm12, %v9439_v18 }
 0x145   : > { %944 = vmatprep.mubr.bf16.mxu0 %v12782_v1 }
 0x147   : > { %1467 = vrot.lane.b32.xlu0 %v9931_v60, %s12769_s29  ;;  %1469 = vrot.lane.b32.xlu1 %v9928_v59, %s12769_s29 }
 0x14b   : > { %1465 = vrot.lane.b32.xlu0 %v9943_v0, %s12769_s29  ;;  %1473 = vrot.lane.b32.xlu1 %v9940_v63, %s12769_s29 }
 0x14c   : > { %8159 = vmatmul.mubr.msk.bf16.gmra.mrb[4].mxu0 %vm784_vm12, %v9440_v19 }
 0x14d   : > { %954 = vmatprep.mubr.bf16.mxu0 %v12782_v1 }
 0x14f   : > { %1475 = vrot.lane.b32.xlu0 %v9958_v6, %s12769_s29  ;;  %1471 = vrot.lane.b32.xlu1 %v9955_v5, %s12769_s29  ;;  %s12771_s29 = smov 94  }
 0x153   : > { %1618 = vrot.lane.b32.xlu0 %v9971_v8, %s12775_s21  ;;  %1620 = vrot.lane.b32.xlu1 %v675_v9, %s12775_s21  ;;  %v9449_v9 = vld [vmem:[%s12841_s30 + $0x70] sm:$0xff]  }
 0x154   : > { %8160 = vmatmul.mubr.msk.bf16.gmra.mrb[8].mxu0 %vm784_vm12, %v9441_v20 }
 0x155   : > { %964 = vmatprep.mubr.bf16.mxu0 %v12782_v1 }
 0x157   : > { %1616 = vrot.lane.b32.xlu0 %v669_v13, %s12775_s21  ;;  %1624 = vrot.lane.b32.xlu1 %v9987_v12, %s12775_s21 }
 0x15b   : > { %1626 = vrot.lane.b32.xlu0 %v677_v15, %s12775_s21  ;;  %1622 = vrot.lane.b32.xlu1 %v672_v16, %s12775_s21 }
 0x15c   : > { %8161 = vmatmul.mubr.msk.bf16.gmra.mrb[12].mxu0 %vm784_vm12, %v9442_v21 }
 0x15d   : > { %1073 = vmatprep.mubr.bf16.mxu0 %v12782_v1 }
 0x15f   : > { %1769 = vrot.lane.b32.xlu0 %v9855_v32, %s12773_s22  ;;  %1771 = vrot.lane.b32.xlu1 %v9858_v33, %s12773_s22 }
 0x163   : > { %1767 = vrot.lane.b32.xlu0 %v9868_v36, %s12773_s22  ;;  %1775 = vrot.lane.b32.xlu1 %v9865_v35, %s12773_s22  ;;  %v9443_v36 = vld [vmem:[%s12841_s30 + $0x40] sm:$0xff]  }
 0x167   : > { %1777 = vrot.lane.b32.xlu0 %v9875_v37, %s12773_s22  ;;  %1773 = vrot.lane.b32.xlu1 %v9879_v38, %s12773_s22  ;;  %s12865_s22 = smov 17  }
 0x16b   : > { %1920 = vrot.lane.b32.xlu0 %v9931_v60, %s12771_s29  ;;  %1922 = vrot.lane.b32.xlu1 %v9928_v59, %s12771_s29 }
 0x16f   : > { %1918 = vrot.lane.b32.xlu0 %v9943_v0, %s12771_s29  ;;  %1926 = vrot.lane.b32.xlu1 %v9940_v63, %s12771_s29 }
 0x173   : > { %1928 = vrot.lane.b32.xlu0 %v9958_v6, %s12771_s29  ;;  %1924 = vrot.lane.b32.xlu1 %v9955_v5, %s12771_s29  ;;  %v9448_v5 = vld [vmem:[%s12841_s30 + $0x68] sm:$0xff]   ;;  %s12866_s29 = smov 127  }
 0x195   : > { %v1013_v22 = vpop.permute.xlu1 %1012  ;;  %v1011_v25 = vpop.permute.xlu0 %1010 }
 0x196   : > { %v10090_v26 = vsel %vm1020_vm14, %v1011_v25, %v1013_v22 }
 0x197   : > { %1041 = vmatprep.subr.bf16.mxu0 %v10090_v26 }
 0x199   : > { %v1017_v29 = vpop.permute.xlu1 %1016  ;;  %v1009_v30 = vpop.permute.xlu0 %1008 }
 0x19a   : > { %v10094_v31 = vsel %vm1020_vm14, %v1009_v30, %v1011_v25  ;;  %v9452_v25 = vld [vmem:[%s12841_s30 + $0x88] sm:$0xff]   ;;  %v9453_v30 = vld [vmem:[%s12841_s30 + $0x90] sm:$0xff]  }
 0x19b   : > { %1042 = vmatpush1.bf16.msra.mxu0 %v10094_v31 }
 0x19d   : > { %v1015_v32 = vpop.permute.xlu1 %1014  ;;  %v1019_v33 = vpop.permute.xlu0 %1018 }
 0x19e   : > { %v10098_v34 = vsel %vm1020_vm14, %v1015_v32, %v1017_v29  ;;  %v10101_v35 = vsel %vm1020_vm14, %v1017_v29, %v1019_v33  ;;  %v9454_v32 = vld [vmem:[%s12841_s30 + $0x98] sm:$0xff]  }
 0x19f   : > { %1043 = vmatprep.subr.bf16.mxu0 %v10101_v35 }
 0x1a0   : > { %1044 = vmatpush1.bf16.msra.mxu0 %v10098_v34 }
 0x1a1   : > { %v1168_v37 = vpop.permute.xlu1 %1167  ;;  %v1166_v38 = vpop.permute.xlu0 %1165 }
 0x1a2   : > { %v10109_v39 = vsel %vm1175_vm15, %v1166_v38, %v1168_v37  ;;  %v589_v37 = vld [vmem:[%s12852_s2] sm:$0xff] }
 0x1a3   : > { %8174 = vmatmul.mubr.msk.bf16.vlgmr.msra.gmra.mrb[0].mxu0 %vm784_vm12, %v9443_v36  ;;  %1196 = vmatprep.subr.bf16.mxu0 %v10109_v39 }
 0x1a4   : > { %1083 = vmatprep.mubr.bf16.mxu0 %v12782_v1  ;;  %2042 = vperm.xlu0 %9433, %v589_v37  }
 0x1a5   : > { %v1172_v40 = vpop.permute.xlu1 %1171  ;;  %v1164_v41 = vpop.permute.xlu0 %1163 }
 0x1a6   : > { %v10115_v42 = vsel %vm1175_vm15, %v1164_v41, %v1166_v38  ;;  %v590_v38 = vld [vmem:[%s12852_s2 + $0x8] sm:$0xff]  ;;  %v597_v41 = vld [vmem:[%s12853_s3] sm:$0xff] }
 0x1a7   : > { %1197 = vmatpush1.bf16.msra.mxu0 %v10115_v42  ;;  %2047 = vperm.xlu1 %9434, %v590_v38  }
 0x1a9   : > { %v1170_v44 = vpop.permute.xlu1 %1169  ;;  %v1174_v45 = vpop.permute.xlu0 %1173 }
 0x1aa   : > { %v10122_v46 = vsel %vm1175_vm15, %v1170_v44, %v1172_v40  ;;  %v10125_v47 = vsel %vm1175_vm15, %v1172_v40, %v1174_v45  ;;  %v598_v40 = vld [vmem:[%s12853_s3 + $0x8] sm:$0xff]  ;;  %v9455_v45 = vld [vmem:[%s12841_s30 + $0xa0] sm:$0xff]  }
 0x1ab   : > { %8175 = vmatmul.mubr.msk.bf16.gmra.mrb[4].mxu0 %vm784_vm12, %v9444_v43  ;;  %1198 = vmatprep.subr.bf16.mxu0 %v10125_v47 }
 0x1ac   : > { %1199 = vmatpush1.bf16.msra.mxu0 %v10122_v46  ;;  %1093 = vmatprep.mubr.bf16.mxu0 %v12782_v1 }
 0x1ad   : > { %v1319_v48 = vpop.permute.xlu1 %1318  ;;  %v1317_v50 = vpop.permute.xlu0 %1316  ;;  %2103 = vperm.xlu0 %9433, %v598_v40   ;;  %2098 = vperm.xlu1 %9434, %v597_v41  }
 0x1ae   : > { %v10132_v51 = vsel %vm1326_vm0, %v1317_v50, %v1319_v48  ;;  %v592_v48 = vld [vmem:[%s12852_s2 + $0x18] sm:$0xff] }
 0x1af   : > { %1347 = vmatprep.subr.bf16.mxu0 %v10132_v51 }
 0x1b1   : > { %v1323_v57 = vpop.permute.xlu1 %1322  ;;  %v1315_v58 = vpop.permute.xlu0 %1314  ;;  %2057 = vperm.xlu0 %9433, %v592_v48   ;;  %v9461_v48 = vld [vmem:[%s12841_s30 + $0xd0] sm:$0xff]  }
 0x1b2   : > { %v10149_v62 = vsel %vm1326_vm0, %v1315_v58, %v1317_v50 }
 0x1b3   : > { %8176 = vmatmul.mubr.msk.bf16.gmra.mrb[8].mxu0 %vm784_vm12, %v9445_v53  ;;  %12844 = vst [vmem:[#allocation17_spill] sm:$0xff] %v10149_v62  ;;  %v591_v53 = vld [vmem:[%s12852_s2 + $0x10] sm:$0xff] }
 0x1b4   : > { %1103 = vmatprep.mubr.bf16.mxu0 %v12782_v1  ;;  %2052 = vperm.xlu1 %9434, %v591_v53   ;;  %v9462_v53 = vld [vmem:[%s12841_s30 + $0xd8] sm:$0xff]  }
 0x1b5   : > { %v1321_v59 = vpop.permute.xlu1 %1320  ;;  %v1325_v60 = vpop.permute.xlu0 %1324 }
 0x1b6   : > { %v10154_v63 = vsel %vm1326_vm0, %v1323_v57, %v1325_v60  ;;  %v10159_v3 = vsel %vm1326_vm0, %v1321_v59, %v1323_v57  ;;  %v600_v59 = vld [vmem:[%s12853_s3 + $0x18] sm:$0xff] }
 0x1b7   : > { %12845 = vst [vmem:[#allocation18_spill] sm:$0xff] %v10154_v63  ;;  %12846 = vst [vmem:[#allocation19_spill] sm:$0xff] %v10159_v3  ;;  %2113 = vperm.xlu0 %9433, %v600_v59   ;;  %v9463_v59 = vld [vmem:[%s12841_s30 + $0xe0] sm:$0xff]  }
 0x1b9   : > { %v1470_v0 = vpop.permute.xlu1 %1469  ;;  %v1468_v2 = vpop.permute.xlu0 %1467 }
 0x1ba   : > { %v10166_v6 = vsel %vm1477_vm1, %v1468_v2, %v1470_v0  ;;  %v599_v0 = vld [vmem:[%s12853_s3 + $0x10] sm:$0xff] }
 0x1bb   : > { %8177 = vmatmul.mubr.msk.bf16.gmra.mrb[12].mxu0 %vm784_vm12, %v9446_v54  ;;  %12847 = vst [vmem:[#allocation20_spill] sm:$0xff] %v10166_v6  ;;  %2108 = vperm.xlu1 %9434, %v599_v0  }
 0x1bc   : > { %1228 = vmatprep.mubr.bf16.mxu0 %v12782_v1 }
 0x1bd   : > { %v1474_v13 = vpop.permute.xlu1 %1473  ;;  %v1466_v14 = vpop.permute.xlu0 %1465 }
 0x1be   : > { %v10185_v18 = vsel %vm1477_vm1, %v1466_v14, %v1468_v2  ;;  %v601_v14 = vld [vmem:[%s12853_s3 + $0x20] sm:$0xff] }
 0x1bf   : > { %12848 = vst [vmem:[#allocation21_spill] sm:$0xff] %v10185_v18 }
 0x1c1   : > { %v1472_v15 = vpop.permute.xlu1 %1471  ;;  %v1476_v16 = vpop.permute.xlu0 %1475 }
 0x1c2   : > { %v10190_v19 = vsel %vm1477_vm1, %v1474_v13, %v1476_v16  ;;  %v10195_v22 = vsel %vm1477_vm1, %v1472_v15, %v1474_v13  ;;  %v9457_v13 = vld [vmem:[%s12841_s30 + $0xb0] sm:$0xff]   ;;  %v596_v15 = vld [vmem:[%s12852_s2 + $0x38] sm:$0xff] }
 0x1c3   : > { %8190 = vmatmul.mubr.msk.bf16.vlgmr.msra.gmra.mrb[0].mxu0 %vm784_vm12, %v9447_v61  ;;  %12849 = vst [vmem:[#allocation22_spill] sm:$0xff] %v10190_v19  ;;  %12850 = vst [vmem:[#allocation23_spill] sm:$0xff] %v10195_v22  ;;  %v9456_v61 = vld [vmem:[%s12841_s30 + $0xa8] sm:$0xff]   ;;  %v595_v16 = vld [vmem:[%s12852_s2 + $0x30] sm:$0xff] }
 0x1c4   : > { %1348 = vmatpush1.bf16.msra.mxu0 %v10149_v62  ;;  %1238 = vmatprep.mubr.bf16.mxu0 %v12782_v1 }
 0x1c5   : > { %1349 = vmatprep.subr.bf16.mxu0 %v10154_v63  ;;  %v1621_v20 = vpop.permute.xlu1 %1620  ;;  %v1619_v21 = vpop.permute.xlu0 %1618 }
 0x1c6   : > { %v10202_v29 = vsel %vm1628_vm2, %v1619_v21, %v1621_v20  ;;  %v9458_v20 = vld [vmem:[%s12841_s30 + $0xb8] sm:$0xff]  }
 0x1c7   : > { %12851 = vst [vmem:[#allocation24_spill] sm:$0xff] %v10202_v29 }
 0x1c8   : > { %1350 = vmatpush1.bf16.msra.mxu0 %v10159_v3 }
 0x1c9   : > { %1498 = vmatprep.subr.bf16.mxu0 %v10166_v6  ;;  %v1625_v33 = vpop.permute.xlu1 %1624  ;;  %v1617_v36 = vpop.permute.xlu0 %1616 }
 0x1ca   : > { %v10236_v50 = vsel %vm1628_vm2, %v1617_v36, %v1619_v21  ;;  %v603_v21 = vld [vmem:[%s12853_s3 + $0x30] sm:$0xff]  ;;  %v9459_v36 = vld [vmem:[%s12841_s30 + $0xc0] sm:$0xff]  }
 0x1cb   : > { %8191 = vmatmul.mubr.msk.bf16.gmra.mrb[4].mxu0 %vm784_vm12, %v9448_v5  ;;  %12854 = vst [vmem:[#allocation25_spill] sm:$0xff] %v10236_v50  ;;  %v594_v5 = vld [vmem:[%s12852_s2 + $0x28] sm:$0xff] }
 0x1cc   : > { %1248 = vmatprep.mubr.bf16.mxu0 %v12782_v1  ;;  %2067 = vperm.xlu0 %9433, %v594_v5  }
 0x1cd   : > { %v1623_v43 = vpop.permute.xlu1 %1622  ;;  %v1627_v44 = vpop.permute.xlu0 %1626 }
 0x1ce   : > { %v10244_v54 = vsel %vm1628_vm2, %v1625_v33, %v1627_v44  ;;  %v10252_v60 = vsel %vm1628_vm2, %v1623_v43, %v1625_v33  ;;  %v9460_v44 = vld [vmem:[%s12841_s30 + $0xc8] sm:$0xff]  }
 0x1cf   : > { %12855 = vst [vmem:[#allocation26_spill] sm:$0xff] %v10244_v54  ;;  %12856 = vst [vmem:[#allocation27_spill] sm:$0xff] %v10252_v60 }
 0x1d1   : > { %v1772_v57 = vpop.permute.xlu1 %1771  ;;  %v1770_v58 = vpop.permute.xlu0 %1769 }
 0x1d2   : > { %v10262_v2 = vsel %vm1779_vm4, %v1770_v58, %v1772_v57 }
 0x1d3   : > { %8192 = vmatmul.mubr.msk.bf16.gmra.mrb[8].mxu0 %vm784_vm12, %v9449_v9  ;;  %12857 = vst [vmem:[#allocation28_spill] sm:$0xff] %v10262_v2  ;;  %v593_v9 = vld [vmem:[%s12852_s2 + $0x20] sm:$0xff] }
 0x1d4   : > { %1258 = vmatprep.mubr.bf16.mxu0 %v12782_v1  ;;  %2062 = vperm.xlu1 %9434, %v593_v9  }
 0x1d8   : > { %2118 = vperm.xlu1 %9434, %v601_v14   ;;  %v9465_v14 = vld [vmem:[%s12841_s30 + $0xf0] sm:$0xff]  }
 0x1db   : > { %8193 = vmatmul.mubr.msk.bf16.gmra.mrb[12].mxu0 %vm784_vm12, %v9450_v10  ;;  %v602_v10 = vld [vmem:[%s12853_s3 + $0x28] sm:$0xff] }
 0x1dc   : > { %1379 = vmatprep.mubr.bf16.mxu0 %v12782_v1  ;;  %2123 = vperm.xlu0 %9433, %v602_v10  }
 0x1dd   : > { %2072 = vperm.xlu1 %9434, %v595_v16   ;;  %v9467_v16 = vld [vmem:[%s12841_s30 + $0x100] sm:$0xff]  }
 0x1e0   : > { %2077 = vperm.xlu0 %9433, %v596_v15   ;;  %v9466_v15 = vld [vmem:[%s12841_s30 + $0xf8] sm:$0xff]  }
 0x1e1   : > { %2128 = vperm.xlu1 %9434, %v603_v21   ;;  %v9470_v21 = vld [vmem:[%s12841_s30 + $0x118] sm:$0xff]  }
 0x1e3   : > { %8206 = vmatmul.mubr.msk.bf16.vlgmr.msra.gmra.mrb[0].mxu0 %vm784_vm12, %v9451_v17  ;;  %v604_v17 = vld [vmem:[%s12853_s3 + $0x38] sm:$0xff] }
 0x1e4   : > { %1499 = vmatpush1.bf16.msra.mxu0 %v10185_v18  ;;  %1389 = vmatprep.mubr.bf16.mxu0 %v12782_v1 }
 0x1e5   : > { %1500 = vmatprep.subr.bf16.mxu0 %v10190_v19  ;;  %2133 = vperm.xlu0 %9433, %v604_v17   ;;  %v9468_v17 = vld [vmem:[%s12841_s30 + $0x108] sm:$0xff]  }
 0x1e8   : > { %1501 = vmatpush1.bf16.msra.mxu0 %v10195_v22 }
 0x1e9   : > { %1649 = vmatprep.subr.bf16.mxu0 %v10202_v29 }
 0x1eb   : > { %8207 = vmatmul.mubr.msk.bf16.gmra.mrb[4].mxu0 %vm784_vm12, %v9452_v25  ;;  %v1776_v25 = vpop.permute.xlu1 %1775 }
 0x1ec   : > { %1399 = vmatprep.mubr.bf16.mxu0 %v12782_v1 }
 0x1f3   : > { %8208 = vmatmul.mubr.msk.bf16.gmra.mrb[8].mxu0 %vm784_vm12, %v9453_v30  ;;  %v1768_v30 = vpop.permute.xlu0 %1767 }
 0x1f4   : > { %1409 = vmatprep.mubr.bf16.mxu0 %v12782_v1  ;;  %v10305_v37 = vsel %vm1779_vm4, %v1768_v30, %v1770_v58 }
 0x1f5   : > { %12858 = vst [vmem:[#allocation29_spill] sm:$0xff] %v10305_v37 }
 0x1f7   : > { %v1778_v33 = vpop.permute.xlu0 %1777 }
 0x1f8   : > { %v10310_v38 = vsel %vm1779_vm4, %v1776_v25, %v1778_v33 }
 0x1f9   : > { %12859 = vst [vmem:[#allocation30_spill] sm:$0xff] %v10310_v38 }
 0x1fb   : > { %8209 = vmatmul.mubr.msk.bf16.gmra.mrb[12].mxu0 %vm784_vm12, %v9454_v32  ;;  %v1774_v32 = vpop.permute.xlu1 %1773  ;;  %v1921_v41 = vpop.permute.xlu0 %1920 }
 0x1fc   : > { %1530 = vmatprep.mubr.bf16.mxu0 %v12782_v1  ;;  %v10315_v43 = vsel %vm1779_vm4, %v1774_v32, %v1776_v25 }
 0x1fd   : > { %12860 = vst [vmem:[#allocation31_spill] sm:$0xff] %v10315_v43 }
 0x1ff   : > { %v1923_v40 = vpop.permute.xlu1 %1922  ;;  %v1919_v57 = vpop.permute.xlu0 %1918 }
 0x200   : > { %v10341_v0 = vsel %vm1930_vm5, %v1919_v57, %v1921_v41 }
 0x201   : > { %12862 = vst [vmem:[#allocation33_spill] sm:$0xff] %v10341_v0 }
 0x203   : > { %8222 = vmatmul.mubr.msk.bf16.vlgmr.msra.gmra.mrb[0].mxu0 %vm784_vm12, %v9455_v45  ;;  %v10322_v45 = vsel %vm1930_vm5, %v1921_v41, %v1923_v40  ;;  %v1927_v58 = vpop.permute.xlu1 %1926 }
 0x204   : > { %1650 = vmatpush1.bf16.msra.mxu0 %v10236_v50  ;;  %1540 = vmatprep.mubr.bf16.mxu0 %v12782_v1  ;;  %12861 = vst [vmem:[#allocation32_spill] sm:$0xff] %v10322_v45 }
 0x205   : > { %1651 = vmatprep.subr.bf16.mxu0 %v10244_v54 }
 0x207   : > { %v1925_v5 = vpop.permute.xlu1 %1924 }
 0x208   : > { %1652 = vmatpush1.bf16.msra.mxu0 %v10252_v60  ;;  %v10351_v10 = vsel %vm1930_vm5, %v1925_v5, %v1927_v58  ;;  %v9473_v60 = vld [vmem:[%s12868_s4 + $0x30] sm:$0xff]  }
 0x209   : > { %1800 = vmatprep.subr.bf16.mxu0 %v10262_v2  ;;  %12864 = vst [vmem:[#allocation35_spill] sm:$0xff] %v10351_v10 }
 0x20b   : > { %8223 = vmatmul.mubr.msk.bf16.gmra.mrb[4].mxu0 %vm784_vm12, %v9456_v61  ;;  %v1929_v61 = vpop.permute.xlu0 %1928 }
 0x20c   : > { %1550 = vmatprep.mubr.bf16.mxu0 %v12782_v1  ;;  %v10346_v9 = vsel %vm1930_vm5, %v1927_v58, %v1929_v61 }
 0x20d   : > { %12863 = vst [vmem:[#allocation34_spill] sm:$0xff] %v10346_v9 }
 0x213   : > { %8224 = vmatmul.mubr.msk.bf16.gmra.mrb[8].mxu0 %vm784_vm12, %v9457_v13  ;;  %v9464_v13 = vld [vmem:[%s12841_s30 + $0xe8] sm:$0xff]  }
 0x214   : > { %1560 = vmatprep.mubr.bf16.mxu0 %v12782_v1 }
 0x21b   : > { %8225 = vmatmul.mubr.msk.bf16.gmra.mrb[12].mxu0 %vm784_vm12, %v9458_v20  ;;  %v9469_v20 = vld [vmem:[%s12841_s30 + $0x110] sm:$0xff]  }
 0x21c   : > { %1681 = vmatprep.mubr.bf16.mxu0 %v12782_v1 }
 0x223   : > { %8238 = vmatmul.mubr.msk.bf16.vlgmr.msra.gmra.mrb[0].mxu0 %vm784_vm12, %v9459_v36  ;;  %v2043_v30 = vpop.permute.xlu0 %2042 }
 0x224   : > { %1801 = vmatpush1.bf16.msra.mxu0 %v10305_v37  ;;  %1691 = vmatprep.mubr.bf16.mxu0 %v12782_v1 }
 0x225   : > { %1802 = vmatprep.subr.bf16.mxu0 %v10310_v38 }
 0x226   : > { %v2048_v25 = vpop.permute.xlu1 %2047 }
 0x228   : > { %1803 = vmatpush1.bf16.msra.mxu0 %v10315_v43 }
 0x229   : > { %1951 = vmatprep.subr.bf16.mxu0 %v10322_v45 }
 0x22b   : > { %8239 = vmatmul.mubr.msk.bf16.gmra.mrb[4].mxu0 %vm784_vm12, %v9460_v44 }
 0x22c   : > { %1701 = vmatprep.mubr.bf16.mxu0 %v12782_v1  ;;  %v2099_v32 = vpop.permute.xlu1 %2098  ;;  %v2104_v33 = vpop.permute.xlu0 %2103 }
 0x230   : > { %v2058_v40 = vpop.permute.xlu0 %2057 }
 0x233   : > { %8240 = vmatmul.mubr.msk.bf16.gmra.mrb[8].mxu0 %vm784_vm12, %v9461_v48  ;;  %v2053_v36 = vpop.permute.xlu1 %2052 }
 0x234   : > { %1711 = vmatprep.mubr.bf16.mxu0 %v12782_v1 }
 0x23b   : > { %8241 = vmatmul.mubr.msk.bf16.gmra.mrb[12].mxu0 %vm784_vm12, %v9462_v53  ;;  %v2109_v53 = vpop.permute.xlu1 %2108 }
 0x23c   : > { %1832 = vmatprep.mubr.bf16.mxu0 %v12782_v1 }
 0x243   : > { %8254 = vmatmul.mubr.msk.bf16.vlgmr.msra.gmra.mrb[0].mxu0 %vm784_vm12, %v9463_v59 }
 0x244   : > { %1952 = vmatpush1.bf16.msra.mxu0 %v10341_v0  ;;  %1842 = vmatprep.mubr.bf16.mxu0 %v12782_v1 }
 0x245   : > { %1953 = vmatprep.subr.bf16.mxu0 %v10346_v9 }
 0x248   : > { %1954 = vmatpush1.bf16.msra.mxu0 %v10351_v10 }
 0x24b   : > { %8255 = vmatmul.mubr.msk.bf16.gmra.mrb[4].mxu0 %vm784_vm12, %v9464_v13  ;;  %v2114_v13 = vpop.permute.xlu0 %2113 }
 0x24c   : > { %1852 = vmatprep.mubr.bf16.mxu0 %v12782_v1 }
 0x253   : > { %8256 = vmatmul.mubr.msk.bf16.gmra.mrb[8].mxu0 %vm784_vm12, %v9465_v14 }
 0x254   : > { %1862 = vmatprep.mubr.bf16.mxu0 %v12782_v1 }
 0x25b   : > { %8257 = vmatmul.mubr.msk.bf16.gmra.mrb[12].mxu0 %vm784_vm12, %v9466_v15 }
 0x25c   : > { %1983 = vmatprep.mubr.bf16.mxu0 %v12782_v1 }
 0x263   : > { %8270 = vmatmul.mubr.msk.bf16.vlgmr.msra.gmra.mrb[0].mxu0 %vm784_vm12, %v9467_v16 }
 0x264   : > { %1993 = vmatprep.mubr.bf16.mxu0 %v12782_v1 }
 0x26b   : > { %8271 = vmatmul.mubr.msk.bf16.gmra.mrb[4].mxu0 %vm784_vm12, %v9468_v17 }
 0x26c   : > { %2003 = vmatprep.mubr.bf16.mxu0 %v12782_v1 }
 0x273   : > { %8272 = vmatmul.mubr.msk.bf16.gmra.mrb[8].mxu0 %vm784_vm12, %v9469_v20 }
 0x274   : > { %2013 = vmatprep.mubr.bf16.mxu0 %v12782_v1 }
 0x27b   : > { %8273 = vmatmul.mubr.msk.bf16.gmra.mrb[12].mxu0 %vm784_vm12, %v9470_v21 }
 0x27c   : > { %4086 = vmatprep.mubr.bf16.mxu0 %v12782_v1  ;;  %v2063_v1 = vpop.permute.xlu1 %2062 }
 0x336   : > { %v1985_v41 = vpop.f32.mrb[0].mxu0 }
 0x337   : > { %v2080_v44 = vmul.f32 %v2043_v30, %v1985_v41  ;;  %v1987_v48 = vpop.f32.mrb[1].mxu0 }
 0x338   : > { %v2081_v57 = vmul.f32 %v2043_v30, %v1987_v48  ;;  %v1989_v58 = vpop.f32.mrb[2].mxu0  ;;  %v2068_v30 = vpop.permute.xlu0 %2067 }
 0x339   : > { %v2136_v59 = vadd.f32 %v2099_v32, %v2080_v44  ;;  %v2082_v61 = vmul.f32 %v2048_v25, %v1989_v58  ;;  %v1991_v5 = vpop.f32.mrb[3].mxu0 }
 0x33a   : > { %v2137_v14 = vadd.f32 %v2099_v32, %v2081_v57  ;;  %v2083_v15 = vmul.f32 %v2048_v25, %v1991_v5 }
 0x33b   : > { %v2138_v16 = vadd.f32 %v2104_v33, %v2082_v61  ;;  %v2152_v20 = vmax.f32 %v2136_v59, 0.0  ;;  %v2119_v59 = vpop.permute.xlu1 %2118 }
 0x33c   : > { %v2139_v17 = vadd.f32 %v2104_v33, %v2083_v15  ;;  %v2153_v10 = vmax.f32 %v2137_v14, 0.0 }
 0x33d   : > { %v2154_v21 = vmax.f32 %v2138_v16, 0.0 }
 0x33e   : > { %v2155_v9 = vmax.f32 %v2139_v17, 0.0  ;;  %v1995_v0 = vpop.f32.mrb[4].mxu0 }
 0x33f   : > { %v2084_v45 = vmul.f32 %v2053_v36, %v1995_v0  ;;  %v1997_v41 = vpop.f32.mrb[5].mxu0  ;;  %v10389_v43 = vpack.c.bf16 %v2154_v21, %v2152_v20 }
 0x340   : > { %v2085_v48 = vmul.f32 %v2053_v36, %v1997_v41  ;;  %v1999_v44 = vpop.f32.mrb[6].mxu0  ;;  %v10391_v58 = vpack.c.bf16 %v2155_v9, %v2153_v10  ;;  %v2124_v36 = vpop.permute.xlu0 %2123 }
 0x341   : > { %v2140_v38 = vadd.f32 %v2109_v53, %v2084_v45  ;;  %v2086_v32 = vmul.f32 %v2058_v40, %v1999_v44  ;;  %v2001_v25 = vpop.f32.mrb[7].mxu0  ;;  %2268 = vrot.lane.b32.xlu1 %v10389_v43, %s12865_s22 }
 0x342   : > { %v2141_v33 = vadd.f32 %v2109_v53, %v2085_v48  ;;  %v2087_v57 = vmul.f32 %v2058_v40, %v2001_v25  ;;  %2270 = vrot.lane.b32.xlu0 %v10391_v58, %s12865_s22 }
 0x343   : > { %v2142_v0 = vadd.f32 %v2114_v13, %v2086_v32  ;;  %v2156_v5 = vmax.f32 %v2140_v38, 0.0  ;;  %v2073_v38 = vpop.permute.xlu1 %2072 }
 0x344   : > { %v2143_v61 = vadd.f32 %v2114_v13, %v2087_v57  ;;  %v2157_v15 = vmax.f32 %v2141_v33, 0.0  ;;  %v2078_v25 = vpop.permute.xlu0 %2077 }
 0x345   : > { %v2158_v14 = vmax.f32 %v2142_v0, 0.0 }
 0x346   : > { %v2159_v9 = vmax.f32 %v2143_v61, 0.0  ;;  %v2005_v10 = vpop.f32.mrb[8].mxu0 }
 0x347   : > { %v2088_v45 = vmul.f32 %v2063_v1, %v2005_v10  ;;  %v2007_v16 = vpop.f32.mrb[9].mxu0  ;;  %v10397_v17 = vpack.c.bf16 %v2158_v14, %v2156_v5  ;;  %v2129_v10 = vpop.permute.xlu1 %2128 }
 0x348   : > { %v2089_v20 = vmul.f32 %v2063_v1, %v2007_v16  ;;  %v2009_v21 = vpop.f32.mrb[10].mxu0  ;;  %v10399_v53 = vpack.c.bf16 %v2159_v9, %v2157_v15 }
 0x349   : > { %v2144_v40 = vadd.f32 %v2119_v59, %v2088_v45  ;;  %v2090_v41 = vmul.f32 %v2068_v30, %v2009_v21  ;;  %v2011_v48 = vpop.f32.mrb[11].mxu0  ;;  %2272 = vrot.lane.b32.xlu1 %v10397_v17, %s12865_s22 }
 0x34a   : > { %v2145_v13 = vadd.f32 %v2119_v59, %v2089_v20  ;;  %v2091_v44 = vmul.f32 %v2068_v30, %v2011_v48  ;;  %2274 = vrot.lane.b32.xlu0 %v10399_v53, %s12865_s22 }
 0x34b   : > { %v2146_v32 = vadd.f32 %v2124_v36, %v2090_v41  ;;  %v2160_v57 = vmax.f32 %v2144_v40, 0.0 }
 0x34c   : > { %v2147_v33 = vadd.f32 %v2124_v36, %v2091_v44  ;;  %v2161_v0 = vmax.f32 %v2145_v13, 0.0  ;;  %v2134_v36 = vpop.permute.xlu0 %2133 }
 0x34d   : > { %v2162_v1 = vmax.f32 %v2146_v32, 0.0 }
 0x34e   : > { %v2163_v61 = vmax.f32 %v2147_v33, 0.0  ;;  %v2015_v5 = vpop.f32.mrb[12].mxu0 }
 0x34f   : > { %v2092_v14 = vmul.f32 %v2073_v38, %v2015_v5  ;;  %v2017_v15 = vpop.f32.mrb[13].mxu0  ;;  %v10405_v9 = vpack.c.bf16 %v2162_v1, %v2160_v57  ;;  %v2203_v5 = vsel %vm644_vm8, 0, %v10399_v53 }
 0x350   : > { %v2093_v45 = vmul.f32 %v2073_v38, %v2017_v15  ;;  %v2019_v16 = vpop.f32.mrb[14].mxu0  ;;  %v10407_v59 = vpack.c.bf16 %v2163_v61, %v2161_v0  ;;  %v2200_v0 = vsel %vm643_vm3, 0, %v10389_v43  ;;  %v2202_v61 = vsel %vm643_vm3, 0, %v10397_v17 }
 0x351   : > { %v2148_v30 = vadd.f32 %v2129_v10, %v2092_v14  ;;  %v2094_v20 = vmul.f32 %v2078_v25, %v2019_v16  ;;  %v2021_v21 = vpop.f32.mrb[15].mxu0  ;;  %2276 = vrot.lane.b32.xlu1 %v10405_v9, %s12865_s22  ;;  %v2204_v14 = vsel %vm643_vm3, 0, %v10405_v9 }
 0x352   : > { %v2149_v40 = vadd.f32 %v2129_v10, %v2093_v45  ;;  %v2095_v41 = vmul.f32 %v2078_v25, %v2021_v21  ;;  %2278 = vrot.lane.b32.xlu0 %v10407_v59, %s12865_s22  ;;  %v2201_v25 = vsel %vm644_vm8, 0, %v10391_v58 }
 0x353   : > { %v2150_v48 = vadd.f32 %v2134_v36, %v2094_v20  ;;  %v2164_v44 = vmax.f32 %v2148_v30, 0.0 }
 0x354   : > { %v2151_v13 = vadd.f32 %v2134_v36, %v2095_v41  ;;  %v2165_v38 = vmax.f32 %v2149_v40, 0.0 }
 0x355   : > { %v2166_v32 = vmax.f32 %v2150_v48, 0.0 }
 0x356   : > { %v2167_v33 = vmax.f32 %v2151_v13, 0.0 }
 0x357   : > { %v10413_v57 = vpack.c.bf16 %v2166_v32, %v2164_v44 }
 0x358   : > { %v10415_v1 = vpack.c.bf16 %v2167_v33, %v2165_v38 }
 0x359   : > { %2280 = vrot.lane.b32.xlu1 %v10413_v57, %s12865_s22 }
 0x35a   : > { %2282 = vrot.lane.b32.xlu0 %v10415_v1, %s12865_s22 }
 0x35d   : > { %2314 = vrot.lane.b32.xlu1 %v2201_v25, %s12865_s22 }
 0x35e   : > { %2312 = vrot.lane.b32.xlu0 %v2200_v0, %s12865_s22 }
 0x361   : > { %2316 = vrot.lane.b32.xlu1 %v2202_v61, %s12865_s22 }
 0x362   : > { %2318 = vrot.lane.b32.xlu0 %v2203_v5, %s12865_s22  ;;  %v2205_v5 = vsel %vm644_vm8, 0, %v10407_v59 }
 0x366   : > { %2320 = vrot.lane.b32.xlu0 %v2204_v14, %s12865_s22 }
 0x3b3   : > { %v2269_v15 = vpop.permute.xlu1 %2268 }
 0x3b4   : > { %v2271_v10 = vpop.permute.xlu0 %2270  ;;  %v10442_v45 = vsel %vm661_vm7, 0, %v2269_v15 }
 0x3b5   : > { %2393 = vrot.lane.b32.xlu1 %v10442_v45, %s12866_s29  ;;  %v10447_v16 = vsel %vm661_vm7, %v2271_v10, 0  ;;  %v10452_v30 = vsel %vm661_vm7, %v2269_v15, %v2271_v10  ;;  %v2206_v15 = vsel %vm643_vm3, 0, %v10413_v57  ;;  %v2207_v10 = vsel %vm644_vm8, 0, %v10415_v1 }
 0x3b6   : > { %2397 = vrot.lane.b32.xlu0 %v10447_v16, %s12866_s29 }
 0x3b9   : > { %2395 = vrot.lane.b32.xlu1 %v10452_v30, %s12866_s29 }
 0x3bb   : > { %v2273_v20 = vpop.permute.xlu1 %2272 }
 0x3bc   : > { %v2275_v21 = vpop.permute.xlu0 %2274  ;;  %v10457_v36 = vsel %vm661_vm7, 0, %v2273_v20 }
 0x3bd   : > { %2399 = vrot.lane.b32.xlu0 %v10457_v36, %s12866_s29  ;;  %v10462_v40 = vsel %vm661_vm7, %v2275_v21, 0  ;;  %v10467_v41 = vsel %vm661_vm7, %v2273_v20, %v2275_v21  ;;  %v2192_v20 = vsel %vm621_vm10, 0, %v10389_v43  ;;  %v2193_v21 = vsel %vm622_vm9, 0, %v10391_v58 }
 0x3be   : > { %2403 = vrot.lane.b32.xlu1 %v10462_v40, %s12866_s29  ;;  %v2196_v43 = vsel %vm621_vm10, 0, %v10405_v9  ;;  %v2197_v58 = vsel %vm622_vm9, 0, %v10407_v59 }
 0x3c1   : > { %2401 = vrot.lane.b32.xlu0 %v10467_v41, %s12866_s29 }
 0x3c3   : > { %v2277_v48 = vpop.permute.xlu1 %2276 }
 0x3c4   : > { %v2279_v13 = vpop.permute.xlu0 %2278  ;;  %v10472_v44 = vsel %vm661_vm7, 0, %v2277_v48 }
 0x3c5   : > { %2405 = vrot.lane.b32.xlu1 %v10472_v44, %s12866_s29  ;;  %v10477_v32 = vsel %vm661_vm7, %v2279_v13, 0  ;;  %v10482_v38 = vsel %vm661_vm7, %v2277_v48, %v2279_v13  ;;  %v2194_v48 = vsel %vm621_vm10, 0, %v10397_v17  ;;  %v2195_v13 = vsel %vm622_vm9, 0, %v10399_v53 }
 0x3c6   : > { %2409 = vrot.lane.b32.xlu0 %v10477_v32, %s12866_s29  ;;  %v2198_v53 = vsel %vm621_vm10, 0, %v10413_v57 }
 0x3c9   : > { %2407 = vrot.lane.b32.xlu1 %v10482_v38, %s12866_s29 }
 0x3cb   : > { %v2281_v33 = vpop.permute.xlu1 %2280 }
 0x3cc   : > { %v2283_v25 = vpop.permute.xlu0 %2282  ;;  %v10500_v14 = vsel %vm661_vm7, 0, %v2281_v33 }
 0x3cd   : > { %v10487_v0 = vsel %vm661_vm7, %v2283_v25, 0  ;;  %v10490_v61 = vsel %vm661_vm7, %v2281_v33, %v2283_v25  ;;  %v2199_v25 = vsel %vm622_vm9, 0, %v10415_v1 }
 0x3ce   : > { %2415 = vrot.lane.b32.xlu1 %v10487_v0, %s12866_s29  ;;  %2413 = vrot.lane.b32.xlu0 %v10490_v61, %s12866_s29 }
 0x3cf   : > { %v2315_v17 = vpop.permute.xlu1 %2314 }
 0x3d0   : > { %v2313_v33 = vpop.permute.xlu0 %2312  ;;  %v10546_v9 = vsel %vm661_vm7, %v2315_v17, 0 }
 0x3d1   : > { %v10549_v59 = vsel %vm661_vm7, %v2313_v33, %v2315_v17  ;;  %v10556_v57 = vsel %vm661_vm7, 0, %v2313_v33 }
 0x3d2   : > { %2322 = vrot.lane.b32.xlu1 %v2205_v5, %s12865_s22  ;;  %2411 = vrot.lane.b32.xlu0 %v10500_v14, %s12866_s29 }
 0x3d3   : > { %v2317_v5 = vpop.permute.xlu1 %2316 }
 0x3d6   : > { %2324 = vrot.lane.b32.xlu1 %v2206_v15, %s12865_s22  ;;  %2326 = vrot.lane.b32.xlu0 %v2207_v10, %s12865_s22  ;;  %v2319_v15 = vpop.permute.xlu0 %2318 }
 0x3d7   : > { %v10559_v1 = vsel %vm661_vm7, %v2317_v5, %v2319_v15  ;;  %v10566_v10 = vsel %vm661_vm7, %v2319_v15, 0 }
 0x3da   : > { %2216 = vrot.lane.b32.xlu1 %v2192_v20, %s12865_s22  ;;  %2218 = vrot.lane.b32.xlu0 %v2193_v21, %s12865_s22  ;;  %v10569_v20 = vsel %vm661_vm7, 0, %v2317_v5  ;;  %v2321_v21 = vpop.permute.xlu0 %2320 }
 0x3de   : > { %2220 = vrot.lane.b32.xlu1 %v2194_v48, %s12865_s22  ;;  %2222 = vrot.lane.b32.xlu0 %v2195_v13, %s12865_s22 }
 0x3e2   : > { %2224 = vrot.lane.b32.xlu1 %v2196_v43, %s12865_s22  ;;  %2226 = vrot.lane.b32.xlu0 %v2197_v58, %s12865_s22 }
 0x3e6   : > { %2228 = vrot.lane.b32.xlu1 %v2198_v53, %s12865_s22  ;;  %2230 = vrot.lane.b32.xlu0 %v2199_v25, %s12865_s22 }
 0x3ea   : > { %2665 = vrot.lane.b32.xlu0 %v10546_v9, %s12867_s26  ;;  %2663 = vrot.lane.b32.xlu1 %v10549_v59, %s12867_s26 }
 0x3ee   : > { %2661 = vrot.lane.b32.xlu1 %v10556_v57, %s12867_s26  ;;  %2669 = vrot.lane.b32.xlu0 %v10559_v1, %s12867_s26 }
 0x3f2   : > { %2671 = vrot.lane.b32.xlu1 %v10566_v10, %s12867_s26  ;;  %2667 = vrot.lane.b32.xlu0 %v10569_v20, %s12867_s26 }
 0x427   : > { %v2394_v48 = vpop.permute.xlu1 %2393 }
 0x428   : > { %v2398_v13 = vpop.permute.xlu0 %2397 }
 0x42b   : > { %v2396_v43 = vpop.permute.xlu1 %2395 }
 0x42c   : > { %v2418_v58 = vsel %vm775_vm11, %v2396_v43, %v2398_v13  ;;  %v2417_v17 = vsel %vm775_vm11, %v2394_v48, %v2396_v43 }
 0x42d   : > { %2446 = vmatprep.subr.bf16.mxu1 %v2418_v58 }
 0x42e   : > { %2447 = vmatpush1.bf16.msra.mxu1 %v2417_v17 }
 0x42f   : > { %v2400_v33 = vpop.permute.xlu0 %2399 }
 0x430   : > { %v2404_v53 = vpop.permute.xlu1 %2403 }
 0x433   : > { %v2402_v25 = vpop.permute.xlu0 %2401 }
 0x434   : > { %v2420_v5 = vsel %vm775_vm11, %v2402_v25, %v2404_v53  ;;  %v2419_v15 = vsel %vm775_vm11, %v2400_v33, %v2402_v25 }
 0x435   : > { %2448 = vmatprep.subr.bf16.mxu1 %v2420_v5 }
 0x436   : > { %2449 = vmatpush1.bf16.msra.mxu1 %v2419_v15 }
 0x437   : > { %v2406_v27 = vpop.permute.xlu1 %2405 }
 0x438   : > { %v2410_v28 = vpop.permute.xlu0 %2409 }
 0x43b   : > { %v2408_v24 = vpop.permute.xlu1 %2407 }
 0x43c   : > { %v2422_v23 = vsel %vm775_vm11, %v2408_v24, %v2410_v28  ;;  %v2421_v13 = vsel %vm775_vm11, %v2406_v27, %v2408_v24  ;;  %v10597_v28 = vsel %vm661_vm7, 0, %v2321_v21 }
 0x43d   : > { %2450 = vmatprep.subr.bf16.mxu1 %v2422_v23  ;;  %v9471_v23 = vld [vmem:[%s12868_s4 + $0x20] sm:$0xff]  }
 0x43e   : > { %2451 = vmatpush1.bf16.msra.mxu1 %v2421_v13  ;;  %v12869_v13 = vmov 0  }
 0x440   : > { %v2416_v48 = vpop.permute.xlu1 %2415  ;;  %v2414_v43 = vpop.permute.xlu0 %2413 }
 0x441   : > { %v2424_v58 = vsel %vm775_vm11, %v2414_v43, %v2416_v48 }
 0x442   : > { %2452 = vmatprep.subr.bf16.mxu1 %v2424_v58 }
 0x444   : > { %v2323_v17 = vpop.permute.xlu1 %2322  ;;  %v2412_v53 = vpop.permute.xlu0 %2411 }
 0x445   : > { %v10583_v33 = vsel %vm661_vm7, %v2323_v17, 0  ;;  %v10586_v25 = vsel %vm661_vm7, %v2321_v21, %v2323_v17  ;;  %v2423_v5 = vsel %vm775_vm11, %v2412_v53, %v2414_v43  ;;  %v9472_v53 = vld [vmem:[%s12868_s4 + $0x28] sm:$0xff]  }
 0x446   : > { %2677 = vrot.lane.b32.xlu0 %v10583_v33, %s12867_s26  ;;  %2675 = vrot.lane.b32.xlu1 %v10586_v25, %s12867_s26 }
 0x447   : > { %2453 = vmatpush1.bf16.msra.mxu1 %v2423_v5 }
 0x448   : > { %v2325_v24 = vpop.permute.xlu1 %2324  ;;  %v2327_v27 = vpop.permute.xlu0 %2326 }
 0x449   : > { %v10600_v15 = vsel %vm661_vm7, %v2325_v24, %v2327_v27  ;;  %v10609_v58 = vsel %vm661_vm7, %v2327_v27, 0  ;;  %v10617_v17 = vsel %vm661_vm7, 0, %v2325_v24 }
 0x44a   : > { %8286 = vmatmul.mubr.msk.bf16.vlgmr.msra.gmra.mrb[0].mxu1 %vm2433_vm6, %v9471_v23  ;;  %2673 = vrot.lane.b32.xlu1 %v10597_v28, %s12867_s26 }
 0x44b   : > { %2681 = vrot.lane.b32.xlu0 %v10600_v15, %s12867_s26  ;;  %2488 = vmatprep.mubr.bf16.mxu1 %v12869_v13 }
 0x44c   : > { %v2217_v48 = vpop.permute.xlu1 %2216  ;;  %v2219_v43 = vpop.permute.xlu0 %2218 }
 0x44d   : > { %v10612_v21 = vsel %vm661_vm7, %v2217_v48, %v2219_v43  ;;  %v10632_v24 = vsel %vm661_vm7, %v2219_v43, 0 }
 0x44e   : > { %2683 = vrot.lane.b32.xlu1 %v10609_v58, %s12867_s26  ;;  %2551 = vmatprep.subr.bf16.mxu1 %v10612_v21 }
 0x44f   : > { %2679 = vrot.lane.b32.xlu0 %v10617_v17, %s12867_s26  ;;  %8295 = vmatpush1.bf16.msk.msra.mxu1 %vm9961_vm13, %v2217_v48 }
 0x450   : > { %v2221_v5 = vpop.permute.xlu1 %2220  ;;  %v2223_v23 = vpop.permute.xlu0 %2222 }
 0x451   : > { %v10628_v27 = vsel %vm661_vm7, %v2221_v5, %v2223_v23  ;;  %v10659_v50 = vsel %vm661_vm7, %v2223_v23, 0  ;;  %v10668_v22 = vsel %vm661_vm7, 0, %v2221_v5 }
 0x452   : > { %8287 = vmatmul.mubr.msk.bf16.gmra.mrb[4].mxu1 %vm2433_vm6, %v9472_v53  ;;  %2841 = vrot.lane.b32.xlu1 %v10612_v21, %s12870_s20  ;;  %v10643_v53 = vsel %vm661_vm7, 0, %v2217_v48 }
 0x453   : > { %2843 = vrot.lane.b32.xlu0 %v10632_v24, %s12870_s20  ;;  %2553 = vmatprep.subr.bf16.mxu1 %v10628_v27 }
 0x454   : > { %8297 = vmatpush1.bf16.msk.msra.mxu1 %vm9961_vm13, %v2221_v5  ;;  %v2225_v37 = vpop.permute.xlu1 %2224  ;;  %v2227_v2 = vpop.permute.xlu0 %2226  ;;  %2498 = vmatprep.mubr.bf16.mxu1 %v12869_v13  ;;  %v9474_v5 = vld [vmem:[%s12868_s4 + $0x38] sm:$0xff]  }
 0x455   : > { %v10646_v43 = vsel %vm661_vm7, %v2225_v37, %v2227_v2  ;;  %v10678_v18 = vsel %vm661_vm7, %v2227_v2, 0  ;;  %v2247_v6 = vsel %vm661_vm7, 0, %v2225_v37 }
 0x456   : > { %2839 = vrot.lane.b32.xlu1 %v10643_v53, %s12870_s20  ;;  %2555 = vmatprep.subr.bf16.mxu1 %v10646_v43 }
 0x457   : > { %2847 = vrot.lane.b32.xlu0 %v10628_v27, %s12870_s20 }
 0x458   : > { %8299 = vmatpush1.bf16.msk.msra.mxu1 %vm9961_vm13, %v2225_v37  ;;  %v2229_v48 = vpop.permute.xlu1 %2228  ;;  %v2231_v54 = vpop.permute.xlu0 %2230  ;;  %v9475_v37 = vld [vmem:[%s12868_s4] sm:$0xff]  }
 0x459   : > { %v10662_v29 = vsel %vm661_vm7, %v2229_v48, %v2231_v54  ;;  %v2259_v2 = vsel %vm661_vm7, %v2231_v54, 0 }
 0x45a   : > { %8288 = vmatmul.mubr.msk.bf16.gmra.mrb[8].mxu1 %vm2433_vm6, %v9473_v60  ;;  %2849 = vrot.lane.b32.xlu1 %v10659_v50, %s12870_s20 }
 0x45b   : > { %2845 = vrot.lane.b32.xlu0 %v10668_v22, %s12870_s20  ;;  %2557 = vmatprep.subr.bf16.mxu1 %v10662_v29 }
 0x45c   : > { %8301 = vmatpush1.bf16.msk.msra.mxu1 %vm9961_vm13, %v2229_v48  ;;  %v2664_v23 = vpop.permute.xlu1 %2663  ;;  %v2666_v19 = vpop.permute.xlu0 %2665  ;;  %2508 = vmatprep.mubr.bf16.mxu1 %v12869_v13 }
 0x45d   : > { %v2686_v60 = vsel %vm1020_vm14, %v2664_v23, %v2666_v19 }
 0x45e   : > { %2853 = vrot.lane.b32.xlu1 %v10646_v43, %s12870_s20  ;;  %2713 = vmatprep.subr.bf16.mxu1 %v2686_v60  ;;  %v2250_v60 = vsel %vm661_vm7, 0, %v2229_v48 }
 0x45f   : > { %2855 = vrot.lane.b32.xlu0 %v10678_v18, %s12870_s20 }
 0x460   : > { %v2662_v3 = vpop.permute.xlu1 %2661  ;;  %v2670_v19 = vpop.permute.xlu0 %2669 }
 0x461   : > { %v2685_v63 = vsel %vm1020_vm14, %v2662_v3, %v2664_v23  ;;  %v9476_v3 = vld [vmem:[%s12868_s4 + $0x8] sm:$0xff]  }
 0x462   : > { %8289 = vmatmul.mubr.msk.bf16.gmra.mrb[12].mxu1 %vm2433_vm6, %v9474_v5  ;;  %2851 = vrot.lane.b32.xlu1 %v2247_v6, %s12870_s20 }
 0x463   : > { %2859 = vrot.lane.b32.xlu0 %v10662_v29, %s12870_s20  ;;  %2583 = vmatprep.mubr.bf16.mxu1 %v12869_v13 }
 0x464   : > { %v2672_v5 = vpop.permute.xlu1 %2671  ;;  %v2668_v62 = vpop.permute.xlu0 %2667 }
 0x465   : > { %v2688_v54 = vsel %vm1020_vm14, %v2670_v19, %v2672_v5  ;;  %v2687_v48 = vsel %vm1020_vm14, %v2668_v62, %v2670_v19  ;;  %v9477_v62 = vld [vmem:[%s12868_s4 + $0x10] sm:$0xff]  }
 0x466   : > { %2861 = vrot.lane.b32.xlu1 %v2259_v2, %s12870_s20 }
 0x467   : > { %2857 = vrot.lane.b32.xlu0 %v2250_v60, %s12870_s20 }
 0x46a   : > { %8302 = vmatmul.mubr.msk.bf16.vlgmr.msra.gmra.mrb[0].mxu1 %vm2433_vm6, %v9475_v37  ;;  %3011 = vrot.lane.b32.xlu1 %v10452_v30, %s12871_s19 }
 0x46b   : > { %2714 = vmatpush1.bf16.msra.mxu1 %v2685_v63  ;;  %3013 = vrot.lane.b32.xlu0 %v10447_v16, %s12871_s19  ;;  %v9478_v63 = vld [vmem:[%s12868_s4 + $0x18] sm:$0xff]  }
 0x46c   : > { %2715 = vmatprep.subr.bf16.mxu1 %v2688_v54  ;;  %2593 = vmatprep.mubr.bf16.mxu1 %v12869_v13 }
 0x46e   : > { %3009 = vrot.lane.b32.xlu1 %v10442_v45, %s12871_s19 }
 0x46f   : > { %2716 = vmatpush1.bf16.msra.mxu1 %v2687_v48  ;;  %3017 = vrot.lane.b32.xlu0 %v10467_v41, %s12871_s19 }
 0x472   : > { %3019 = vrot.lane.b32.xlu1 %v10462_v40, %s12871_s19  ;;  %8303 = vmatmul.mubr.msk.bf16.gmra.mrb[4].mxu1 %vm2433_vm6, %v9476_v3  ;;  %v9483_v3 = vld [vmem:[%s12868_s4 + $0x60] sm:$0xff]  }
 0x473   : > { %3015 = vrot.lane.b32.xlu0 %v10457_v36, %s12871_s19  ;;  %2603 = vmatprep.mubr.bf16.mxu1 %v12869_v13 }
 0x476   : > { %3023 = vrot.lane.b32.xlu1 %v10482_v38, %s12871_s19 }
 0x477   : > { %3025 = vrot.lane.b32.xlu0 %v10477_v32, %s12871_s19 }
 0x47a   : > { %3021 = vrot.lane.b32.xlu1 %v10472_v44, %s12871_s19  ;;  %8304 = vmatmul.mubr.msk.bf16.gmra.mrb[8].mxu1 %vm2433_vm6, %v9477_v62 }
 0x47b   : > { %3029 = vrot.lane.b32.xlu0 %v10490_v61, %s12871_s19  ;;  %2613 = vmatprep.mubr.bf16.mxu1 %v12869_v13 }
 0x47e   : > { %3031 = vrot.lane.b32.xlu1 %v10487_v0, %s12871_s19 }
 0x47f   : > { %3027 = vrot.lane.b32.xlu0 %v10500_v14, %s12871_s19 }
 0x482   : > { %3181 = vrot.lane.b32.xlu1 %v10549_v59, %s12872_s0  ;;  %8305 = vmatmul.mubr.msk.bf16.gmra.mrb[12].mxu1 %vm2433_vm6, %v9478_v63  ;;  %v4154_v63 = vld [vmem:[%s12751_s11 + $0x8] sm:$0xff] }
 0x483   : > { %3183 = vrot.lane.b32.xlu0 %v10546_v9, %s12872_s0  ;;  %2745 = vmatprep.mubr.bf16.mxu1 %v12869_v13 }
 0x486   : > { %3179 = vrot.lane.b32.xlu1 %v10556_v57, %s12872_s0 }
 0x487   : > { %3187 = vrot.lane.b32.xlu0 %v10559_v1, %s12872_s0 }
 0x48a   : > { %3189 = vrot.lane.b32.xlu1 %v10566_v10, %s12872_s0 }
 0x48b   : > { %3185 = vrot.lane.b32.xlu0 %v10569_v20, %s12872_s0 }
 0x48e   : > { %3193 = vrot.lane.b32.xlu1 %v10586_v25, %s12872_s0 }
 0x48f   : > { %3195 = vrot.lane.b32.xlu0 %v10583_v33, %s12872_s0 }
 0x492   : > { %3191 = vrot.lane.b32.xlu1 %v10597_v28, %s12872_s0 }
 0x493   : > { %3199 = vrot.lane.b32.xlu0 %v10600_v15, %s12872_s0 }
 0x496   : > { %3201 = vrot.lane.b32.xlu1 %v10609_v58, %s12872_s0 }
 0x497   : > { %3197 = vrot.lane.b32.xlu0 %v10617_v17, %s12872_s0 }
 0x49a   : > { %3351 = vrot.lane.b32.xlu1 %v10612_v21, %s12873_s18 }
 0x49b   : > { %3353 = vrot.lane.b32.xlu0 %v10632_v24, %s12873_s18 }
 0x49e   : > { %3349 = vrot.lane.b32.xlu1 %v10643_v53, %s12873_s18 }
 0x49f   : > { %3357 = vrot.lane.b32.xlu0 %v10628_v27, %s12873_s18 }
 0x4a2   : > { %3359 = vrot.lane.b32.xlu1 %v10659_v50, %s12873_s18 }
 0x4a3   : > { %3355 = vrot.lane.b32.xlu0 %v10668_v22, %s12873_s18 }
 0x4a6   : > { %3363 = vrot.lane.b32.xlu1 %v10646_v43, %s12873_s18 }
 0x4a7   : > { %3365 = vrot.lane.b32.xlu0 %v10678_v18, %s12873_s18 }
 0x4aa   : > { %3361 = vrot.lane.b32.xlu1 %v2247_v6, %s12873_s18 }
 0x4ab   : > { %3369 = vrot.lane.b32.xlu0 %v10662_v29, %s12873_s18 }
 0x4ae   : > { %3371 = vrot.lane.b32.xlu1 %v2259_v2, %s12873_s18 }
 0x4af   : > { %3367 = vrot.lane.b32.xlu0 %v2250_v60, %s12873_s18 }
 0x4b2   : > { %3521 = vrot.lane.b32.xlu1 %v10452_v30, %s12874_s23 }
 0x4b3   : > { %3523 = vrot.lane.b32.xlu0 %v10447_v16, %s12874_s23 }
 0x4b6   : > { %3519 = vrot.lane.b32.xlu1 %v10442_v45, %s12874_s23 }
 0x4b7   : > { %3527 = vrot.lane.b32.xlu0 %v10467_v41, %s12874_s23 }
 0x4b8   : > { %v2676_v6 = vpop.permute.xlu1 %2675  ;;  %v2678_v18 = vpop.permute.xlu0 %2677 }
 0x4b9   : > { %v2690_v22 = vsel %vm1020_vm14, %v2676_v6, %v2678_v18 }
 0x4ba   : > { %3529 = vrot.lane.b32.xlu1 %v10462_v40, %s12874_s23  ;;  %2717 = vmatprep.subr.bf16.mxu1 %v2690_v22 }
 0x4bb   : > { %3525 = vrot.lane.b32.xlu0 %v10457_v36, %s12874_s23  ;;  %v9479_v36 = vld [vmem:[%s12868_s4 + $0x40] sm:$0xff]  }
 0x4bc   : > { %v2674_v29 = vpop.permute.xlu1 %2673 }
 0x4bd   : > { %v2689_v50 = vsel %vm1020_vm14, %v2674_v29, %v2676_v6  ;;  %v2682_v16 = vpop.permute.xlu0 %2681  ;;  %v4145_v29 = vld [vmem:[%s12750_s10 + $0x10] sm:$0xff] }
 0x4be   : > { %3533 = vrot.lane.b32.xlu1 %v10482_v38, %s12874_s23  ;;  %2718 = vmatpush1.bf16.msra.mxu1 %v2689_v50 }
 0x4bf   : > { %3535 = vrot.lane.b32.xlu0 %v10477_v32, %s12874_s23 }
 0x4c0   : > { %v2684_v45 = vpop.permute.xlu1 %2683 }
 0x4c1   : > { %v2680_v30 = vpop.permute.xlu0 %2679  ;;  %v2692_v41 = vsel %vm1020_vm14, %v2682_v16, %v2684_v45 }
 0x4c2   : > { %v2691_v40 = vsel %vm1020_vm14, %v2680_v30, %v2682_v16  ;;  %3531 = vrot.lane.b32.xlu1 %v10472_v44, %s12874_s23  ;;  %2719 = vmatprep.subr.bf16.mxu1 %v2692_v41  ;;  %v4146_v16 = vld [vmem:[%s12750_s10 + $0x18] sm:$0xff] }
 0x4c3   : > { %3539 = vrot.lane.b32.xlu0 %v10490_v61, %s12874_s23  ;;  %2720 = vmatpush1.bf16.msra.mxu1 %v2691_v40  ;;  %v9484_v40 = vld [vmem:[%s12868_s4 + $0x68] sm:$0xff]  }
 0x4c4   : > { %v2842_v38 = vpop.permute.xlu1 %2841 }
 0x4c5   : > { %v2844_v32 = vpop.permute.xlu0 %2843 }
 0x4c6   : > { %3541 = vrot.lane.b32.xlu1 %v10487_v0, %s12874_s23  ;;  %8318 = vmatmul.mubr.msk.bf16.vlgmr.msra.gmra.mrb[0].mxu1 %vm2433_vm6, %v9479_v36  ;;  %v2864_v21 = vsel %vm1175_vm15, %v2842_v38, %v2844_v32  ;;  %v9480_v0 = vld [vmem:[%s12868_s4 + $0x48] sm:$0xff]   ;;  %v4155_v36 = vld [vmem:[%s12751_s11 + $0x10] sm:$0xff]  ;;  %v4156_v32 = vld [vmem:[%s12751_s11 + $0x18] sm:$0xff] }
 0x4c7   : > { %3537 = vrot.lane.b32.xlu0 %v10500_v14, %s12874_s23  ;;  %2891 = vmatprep.subr.bf16.mxu1 %v2864_v21 }
 0x4c8   : > { %v2840_v44 = vpop.permute.xlu1 %2839  ;;  %2755 = vmatprep.mubr.bf16.mxu1 %v12869_v13 }
 0x4c9   : > { %v2863_v27 = vsel %vm1175_vm15, %v2840_v44, %v2842_v38  ;;  %v2848_v61 = vpop.permute.xlu0 %2847 }
 0x4ca   : > { %3691 = vrot.lane.b32.xlu1 %v10549_v59, %s12875_s24  ;;  %2892 = vmatpush1.bf16.msra.mxu1 %v2863_v27  ;;  %v4147_v27 = vld [vmem:[%s12750_s10 + $0x20] sm:$0xff] }
 0x4cb   : > { %3693 = vrot.lane.b32.xlu0 %v10546_v9, %s12875_s24 }
 0x4cc   : > { %v2850_v24 = vpop.permute.xlu1 %2849 }
 0x4cd   : > { %v2846_v14 = vpop.permute.xlu0 %2845  ;;  %v2866_v53 = vsel %vm1175_vm15, %v2848_v61, %v2850_v24 }
 0x4ce   : > { %v2865_v43 = vsel %vm1175_vm15, %v2846_v14, %v2848_v61  ;;  %3689 = vrot.lane.b32.xlu1 %v10556_v57, %s12875_s24  ;;  %8319 = vmatmul.mubr.msk.bf16.gmra.mrb[4].mxu1 %vm2433_vm6, %v9480_v0  ;;  %v9481_v57 = vld [vmem:[%s12868_s4 + $0x50] sm:$0xff]   ;;  %v4148_v0 = vld [vmem:[%s12750_s10 + $0x28] sm:$0xff] }
 0x4cf   : > { %3697 = vrot.lane.b32.xlu0 %v10559_v1, %s12875_s24  ;;  %2893 = vmatprep.subr.bf16.mxu1 %v2866_v53 }
 0x4d0   : > { %2894 = vmatpush1.bf16.msra.mxu1 %v2865_v43  ;;  %v2854_v59 = vpop.permute.xlu1 %2853  ;;  %2765 = vmatprep.mubr.bf16.mxu1 %v12869_v13  ;;  %v9485_v43 = vld [vmem:[%s12868_s4 + $0x70] sm:$0xff]  }
 0x4d1   : > { %v2856_v9 = vpop.permute.xlu0 %2855 }
 0x4d2   : > { %3699 = vrot.lane.b32.xlu1 %v10566_v10, %s12875_s24  ;;  %v2868_v23 = vsel %vm1175_vm15, %v2854_v59, %v2856_v9 }
 0x4d3   : > { %3695 = vrot.lane.b32.xlu0 %v10569_v20, %s12875_s24  ;;  %2895 = vmatprep.subr.bf16.mxu1 %v2868_v23  ;;  %v4158_v23 = vld [vmem:[%s12751_s11 + $0x28] sm:$0xff] }
 0x4d4   : > { %v2852_v1 = vpop.permute.xlu1 %2851 }
 0x4d5   : > { %v2867_v19 = vsel %vm1175_vm15, %v2852_v1, %v2854_v59  ;;  %v2860_v2 = vpop.permute.xlu0 %2859  ;;  %v4157_v59 = vld [vmem:[%s12751_s11 + $0x20] sm:$0xff] }
 0x4d6   : > { %3703 = vrot.lane.b32.xlu1 %v10586_v25, %s12875_s24  ;;  %8320 = vmatmul.mubr.msk.bf16.gmra.mrb[8].mxu1 %vm2433_vm6, %v9481_v57  ;;  %v9482_v25 = vld [vmem:[%s12868_s4 + $0x58] sm:$0xff]  }
 0x4d7   : > { %3705 = vrot.lane.b32.xlu0 %v10583_v33, %s12875_s24  ;;  %2896 = vmatpush1.bf16.msra.mxu1 %v2867_v19  ;;  %v4149_v19 = vld [vmem:[%s12750_s10 + $0x30] sm:$0xff] }
 0x4d8   : > { %v2862_v10 = vpop.permute.xlu1 %2861  ;;  %2775 = vmatprep.mubr.bf16.mxu1 %v12869_v13 }
 0x4d9   : > { %v2858_v60 = vpop.permute.xlu0 %2857  ;;  %v2870_v20 = vsel %vm1175_vm15, %v2860_v2, %v2862_v10  ;;  %v4150_v10 = vld [vmem:[%s12750_s10 + $0x38] sm:$0xff] }
 0x4da   : > { %v2869_v37 = vsel %vm1175_vm15, %v2858_v60, %v2860_v2  ;;  %3701 = vrot.lane.b32.xlu1 %v10597_v28, %s12875_s24  ;;  %2897 = vmatprep.subr.bf16.mxu1 %v2870_v20  ;;  %v4143_v28 = vld [vmem:[%s12750_s10] sm:$0xff]  ;;  %v9486_v20 = vld [vmem:[%s12868_s4 + $0x78] sm:$0xff]  }
 0x4db   : > { %3709 = vrot.lane.b32.xlu0 %v10600_v15, %s12875_s24  ;;  %2898 = vmatpush1.bf16.msra.mxu1 %v2869_v37  ;;  %v4144_v15 = vld [vmem:[%s12750_s10 + $0x8] sm:$0xff]  ;;  %v4159_v37 = vld [vmem:[%s12751_s11 + $0x30] sm:$0xff] }
 0x4dc   : > { %v3012_v33 = vpop.permute.xlu1 %3011 }
 0x4dd   : > { %v3014_v5 = vpop.permute.xlu0 %3013 }
 0x4de   : > { %3711 = vrot.lane.b32.xlu1 %v10609_v58, %s12875_s24  ;;  %8321 = vmatmul.mubr.msk.bf16.gmra.mrb[12].mxu1 %vm2433_vm6, %v9482_v25  ;;  %v3034_v54 = vsel %vm1326_vm0, %v3012_v33, %v3014_v5 }
 0x4df   : > { %3707 = vrot.lane.b32.xlu0 %v10617_v17, %s12875_s24  ;;  %3061 = vmatprep.subr.bf16.mxu1 %v3034_v54  ;;  %v4153_v17 = vld [vmem:[%s12751_s11] sm:$0xff] }
 0x4e0   : > { %v3010_v48 = vpop.permute.xlu1 %3009  ;;  %2923 = vmatprep.mubr.bf16.mxu1 %v12869_v13  ;;  %v4151_v54 = vld [vmem:[%s12750_s10 + $0x40] sm:$0xff] }
 0x4e1   : > { %v3018_v58 = vpop.permute.xlu0 %3017  ;;  %v3033_v22 = vsel %vm1326_vm0, %v3010_v48, %v3012_v33  ;;  %v4160_v33 = vld [vmem:[%s12751_s11 + $0x38] sm:$0xff]  ;;  %v4152_v48 = vld [vmem:[%s12750_s10 + $0x48] sm:$0xff] }
 0x4e2   : > { %5510 = vperm.xlu1 %9434, %v4143_v28  }
 0x4e3   : > { %5515 = vperm.xlu0 %9433, %v4144_v15  }
 0x4e4   : > { %v3020_v62 = vpop.permute.xlu1 %3019 }
 0x4e5   : > { %v3016_v6 = vpop.permute.xlu0 %3015  ;;  %v3036_v18 = vsel %vm1326_vm0, %v3018_v58, %v3020_v62  ;;  %v4162_v62 = vld [vmem:[%s12751_s11 + $0x48] sm:$0xff] }
 0x4e6   : > { %5580 = vperm.xlu1 %9434, %v4153_v17   ;;  %8334 = vmatmul.mubr.msk.bf16.vlgmr.msra.gmra.mrb[0].mxu1 %vm2433_vm6, %v9483_v3  ;;  %v3035_v30 = vsel %vm1326_vm0, %v3016_v6, %v3018_v58  ;;  %v9487_v58 = vld [vmem:[%s12868_s4 + $0x80] sm:$0xff]  }
 0x4e7   : > { %5585 = vperm.xlu0 %9433, %v4154_v63   ;;  %3062 = vmatpush1.bf16.msra.mxu1 %v3033_v22  ;;  %v4161_v3 = vld [vmem:[%s12751_s11 + $0x40] sm:$0xff] }
 0x4e8   : > { %3063 = vmatprep.subr.bf16.mxu1 %v3036_v18  ;;  %v3024_v50 = vpop.permute.xlu1 %3023  ;;  %2933 = vmatprep.mubr.bf16.mxu1 %v12869_v13  ;;  %v2176_v22 = vld [vmem:[%s12745_s5] sm:$0xff] }
 0x4e9   : > { %v3026_v45 = vpop.permute.xlu0 %3025 }
 0x4ea   : > { %5520 = vperm.xlu1 %9434, %v4145_v29   ;;  %v3038_v41 = vsel %vm1326_vm0, %v3024_v50, %v3026_v45 }
 0x4eb   : > { %5525 = vperm.xlu0 %9433, %v4146_v16   ;;  %3064 = vmatpush1.bf16.msra.mxu1 %v3035_v30  ;;  %v9488_v30 = vld [vmem:[%s12868_s4 + $0x88] sm:$0xff]  }
 0x4ec   : > { %3065 = vmatprep.subr.bf16.mxu1 %v3038_v41  ;;  %v3022_v38 = vpop.permute.xlu1 %3021 }
 0x4ed   : > { %v3037_v21 = vsel %vm1326_vm0, %v3022_v38, %v3024_v50  ;;  %v3030_v44 = vpop.permute.xlu0 %3029  ;;  %v2177_v50 = vld [vmem:[%s12745_s5 + $0x8] sm:$0xff] }
 0x4ee   : > { %5590 = vperm.xlu1 %9434, %v4155_v36   ;;  %8335 = vmatmul.mubr.msk.bf16.gmra.mrb[4].mxu1 %vm2433_vm6, %v9484_v40  ;;  %v2184_v40 = vld [vmem:[%s12746_s6] sm:$0xff]  ;;  %v2185_v38 = vld [vmem:[%s12746_s6 + $0x8] sm:$0xff] }
 0x4ef   : > { %5595 = vperm.xlu0 %9433, %v4156_v32   ;;  %3066 = vmatpush1.bf16.msra.mxu1 %v3037_v21 }
 0x4f0   : > { %v3032_v61 = vpop.permute.xlu1 %3031  ;;  %2943 = vmatprep.mubr.bf16.mxu1 %v12869_v13 }
 0x4f1   : > { %v3028_v24 = vpop.permute.xlu0 %3027  ;;  %v3040_v14 = vsel %vm1326_vm0, %v3030_v44, %v3032_v61 }
 0x4f2   : > { %v3039_v53 = vsel %vm1326_vm0, %v3028_v24, %v3030_v44  ;;  %5530 = vperm.xlu1 %9434, %v4147_v27   ;;  %3067 = vmatprep.subr.bf16.mxu1 %v3040_v14  ;;  %v2178_v27 = vld [vmem:[%s12745_s5 + $0x10] sm:$0xff] }
 0x4f3   : > { %5535 = vperm.xlu0 %9433, %v4148_v0   ;;  %3068 = vmatpush1.bf16.msra.mxu1 %v3039_v53  ;;  %v2179_v0 = vld [vmem:[%s12745_s5 + $0x18] sm:$0xff]  ;;  %v9489_v53 = vld [vmem:[%s12868_s4 + $0x90] sm:$0xff]  }
 0x4f4   : > { %v3182_v9 = vpop.permute.xlu1 %3181 }
 0x4f5   : > { %v3184_v57 = vpop.permute.xlu0 %3183 }
 0x4f6   : > { %5600 = vperm.xlu1 %9434, %v4157_v59   ;;  %8336 = vmatmul.mubr.msk.bf16.gmra.mrb[8].mxu1 %vm2433_vm6, %v9485_v43  ;;  %v3204_v1 = vsel %vm1477_vm1, %v3182_v9, %v3184_v57  ;;  %v2186_v59 = vld [vmem:[%s12746_s6 + $0x10] sm:$0xff] }
 0x4f7   : > { %5605 = vperm.xlu0 %9433, %v4158_v23   ;;  %3231 = vmatprep.subr.bf16.mxu1 %v3204_v1  ;;  %v2187_v23 = vld [vmem:[%s12746_s6 + $0x18] sm:$0xff] }
 0x4f8   : > { %v3180_v2 = vpop.permute.xlu1 %3179  ;;  %2953 = vmatprep.mubr.bf16.mxu1 %v12869_v13 }
 0x4f9   : > { %v3188_v60 = vpop.permute.xlu0 %3187  ;;  %v3203_v6 = vsel %vm1477_vm1, %v3180_v2, %v3182_v9  ;;  %v9490_v2 = vld [vmem:[%s12868_s4 + $0x98] sm:$0xff]  }
 0x4fa   : > { %5540 = vperm.xlu1 %9434, %v4149_v19  }
 0x4fb   : > { %5545 = vperm.xlu0 %9433, %v4150_v10  }
 0x4fc   : > { %v3190_v25 = vpop.permute.xlu1 %3189 }
 0x4fd   : > { %v3186_v5 = vpop.permute.xlu0 %3185  ;;  %v3206_v18 = vsel %vm1477_vm1, %v3188_v60, %v3190_v25 }
 0x4fe   : > { %5610 = vperm.xlu1 %9434, %v4159_v37   ;;  %8337 = vmatmul.mubr.msk.bf16.gmra.mrb[12].mxu1 %vm2433_vm6, %v9486_v20  ;;  %v3205_v45 = vsel %vm1477_vm1, %v3186_v5, %v3188_v60  ;;  %v9491_v20 = vld [vmem:[%s12868_s4 + $0xa0] sm:$0xff]  }
 0x4ff   : > { %5615 = vperm.xlu0 %9433, %v4160_v33   ;;  %3093 = vmatprep.mubr.bf16.mxu1 %v12869_v13 }
 0x500   : > { %v3194_v28 = vpop.permute.xlu1 %3193 }
 0x501   : > { %v3196_v15 = vpop.permute.xlu0 %3195 }
 0x502   : > { %5550 = vperm.xlu1 %9434, %v4151_v54   ;;  %v3208_v41 = vsel %vm1477_vm1, %v3194_v28, %v3196_v15 }
 0x503   : > { %5555 = vperm.xlu0 %9433, %v4152_v48   ;;  %v9492_v48 = vld [vmem:[%s12868_s4 + $0xa8] sm:$0xff]  }
 0x504   : > { %v3192_v17 = vpop.permute.xlu1 %3191 }
 0x505   : > { %v3200_v63 = vpop.permute.xlu0 %3199  ;;  %v3207_v21 = vsel %vm1477_vm1, %v3192_v17, %v3194_v28 }
 0x506   : > { %5620 = vperm.xlu1 %9434, %v4161_v3   ;;  %8350 = vmatmul.mubr.msk.bf16.vlgmr.msra.gmra.mrb[0].mxu1 %vm2433_vm6, %v9487_v58 }
 0x507   : > { %5625 = vperm.xlu0 %9433, %v4162_v62   ;;  %3232 = vmatpush1.bf16.msra.mxu1 %v3203_v6 }
 0x508   : > { %3233 = vmatprep.subr.bf16.mxu1 %v3206_v18  ;;  %v3202_v29 = vpop.permute.xlu1 %3201  ;;  %3103 = vmatprep.mubr.bf16.mxu1 %v12869_v13  ;;  %v9493_v18 = vld [vmem:[%s12868_s4 + $0xb0] sm:$0xff]  }
 0x509   : > { %v3198_v16 = vpop.permute.xlu0 %3197  ;;  %v3210_v44 = vsel %vm1477_vm1, %v3200_v63, %v3202_v29 }
 0x50a   : > { %3832 = vperm.xlu1 %9434, %v2176_v22   ;;  %v3209_v14 = vsel %vm1477_vm1, %v3198_v16, %v3200_v63  ;;  %v9494_v16 = vld [vmem:[%s12868_s4 + $0xb8] sm:$0xff]  }
 0x50b   : > { %3837 = vperm.xlu0 %9433, %v2177_v50   ;;  %3234 = vmatpush1.bf16.msra.mxu1 %v3205_v45 }
 0x50c   : > { %3235 = vmatprep.subr.bf16.mxu1 %v3208_v41  ;;  %v3352_v36 = vpop.permute.xlu1 %3351 }
 0x50d   : > { %v3354_v32 = vpop.permute.xlu0 %3353 }
 0x50e   : > { %3888 = vperm.xlu1 %9434, %v2184_v40   ;;  %8351 = vmatmul.mubr.msk.bf16.gmra.mrb[4].mxu1 %vm2433_vm6, %v9488_v30  ;;  %v3374_v43 = vsel %vm1628_vm2, %v3352_v36, %v3354_v32  ;;  %v9495_v40 = vld [vmem:[%s12868_s4 + $0xc0] sm:$0xff]  }
 0x50f   : > { %3893 = vperm.xlu0 %9433, %v2185_v38   ;;  %3236 = vmatpush1.bf16.msra.mxu1 %v3207_v21 }
 0x510   : > { %3237 = vmatprep.subr.bf16.mxu1 %v3210_v44  ;;  %v3350_v61 = vpop.permute.xlu1 %3349  ;;  %3113 = vmatprep.mubr.bf16.mxu1 %v12869_v13 }
 0x511   : > { %v3358_v24 = vpop.permute.xlu0 %3357  ;;  %v3373_v25 = vsel %vm1628_vm2, %v3350_v61, %v3352_v36  ;;  %v9496_v61 = vld [vmem:[%s12868_s4 + $0xc8] sm:$0xff]  }
 0x512   : > { %3842 = vperm.xlu1 %9434, %v2178_v27  }
 0x513   : > { %3847 = vperm.xlu0 %9433, %v2179_v0   ;;  %3238 = vmatpush1.bf16.msra.mxu1 %v3209_v14 }
 0x514   : > { %3401 = vmatprep.subr.bf16.mxu1 %v3374_v43  ;;  %v3360_v9 = vpop.permute.xlu1 %3359 }
 0x515   : > { %v3356_v57 = vpop.permute.xlu0 %3355  ;;  %v3376_v5 = vsel %vm1628_vm2, %v3358_v24, %v3360_v9  ;;  %v9497_v9 = vld [vmem:[%s12868_s4 + $0xd0] sm:$0xff]  }
 0x516   : > { %3898 = vperm.xlu1 %9434, %v2186_v59   ;;  %8352 = vmatmul.mubr.msk.bf16.gmra.mrb[8].mxu1 %vm2433_vm6, %v9489_v53  ;;  %v3375_v54 = vsel %vm1628_vm2, %v3356_v57, %v3358_v24 }
 0x517   : > { %3903 = vperm.xlu0 %9433, %v2187_v23   ;;  %3123 = vmatprep.mubr.bf16.mxu1 %v12869_v13 }
 0x518   : > { %v3364_v1 = vpop.permute.xlu1 %3363 }
 0x519   : > { %v3366_v19 = vpop.permute.xlu0 %3365 }
 0x51a   : > { %v3378_v15 = vsel %vm1628_vm2, %v3364_v1, %v3366_v19 }
 0x51c   : > { %v3362_v10 = vpop.permute.xlu1 %3361 }
 0x51d   : > { %v3370_v60 = vpop.permute.xlu0 %3369  ;;  %v3377_v3 = vsel %vm1628_vm2, %v3362_v10, %v3364_v1 }
 0x51e   : > { %8353 = vmatmul.mubr.msk.bf16.gmra.mrb[12].mxu1 %vm2433_vm6, %v9490_v2  ;;  %v9498_v2 = vld [vmem:[%s12868_s4 + $0xd8] sm:$0xff]  }
 0x51f   : > { %3263 = vmatprep.mubr.bf16.mxu1 %v12869_v13 }
 0x520   : > { %v3372_v37 = vpop.permute.xlu1 %3371 }
 0x521   : > { %v3368_v33 = vpop.permute.xlu0 %3367  ;;  %v3380_v17 = vsel %vm1628_vm2, %v3370_v60, %v3372_v37 }
 0x522   : > { %v3379_v63 = vsel %vm1628_vm2, %v3368_v33, %v3370_v60 }
 0x524   : > { %v3522_v28 = vpop.permute.xlu1 %3521 }
 0x525   : > { %v3524_v58 = vpop.permute.xlu0 %3523 }
 0x526   : > { %8366 = vmatmul.mubr.msk.bf16.vlgmr.msra.gmra.mrb[0].mxu1 %vm2433_vm6, %v9491_v20  ;;  %v3544_v22 = vsel %vm1779_vm4, %v3522_v28, %v3524_v58  ;;  %v9499_v20 = vld [vmem:[%s12868_s4 + $0xe0] sm:$0xff]  }
 0x527   : > { %3402 = vmatpush1.bf16.msra.mxu1 %v3373_v25  ;;  %3273 = vmatprep.mubr.bf16.mxu1 %v12869_v13 }
 0x528   : > { %3403 = vmatprep.subr.bf16.mxu1 %v3376_v5  ;;  %v3520_v62 = vpop.permute.xlu1 %3519 }
 0x529   : > { %v3528_v6 = vpop.permute.xlu0 %3527  ;;  %v3543_v38 = vsel %vm1779_vm4, %v3520_v62, %v3522_v28 }
 0x52b   : > { %3404 = vmatpush1.bf16.msra.mxu1 %v3375_v54 }
 0x52c   : > { %3405 = vmatprep.subr.bf16.mxu1 %v3378_v15  ;;  %v3530_v29 = vpop.permute.xlu1 %3529 }
 0x52d   : > { %v3526_v50 = vpop.permute.xlu0 %3525  ;;  %v3546_v32 = vsel %vm1779_vm4, %v3528_v6, %v3530_v29  ;;  %v9513_v29 = vld [vmem:[%s12876_s9 + $0x8] sm:$0xff]  }
 0x52e   : > { %8367 = vmatmul.mubr.msk.bf16.gmra.mrb[4].mxu1 %vm2433_vm6, %v9492_v48  ;;  %v3545_v44 = vsel %vm1779_vm4, %v3526_v50, %v3528_v6  ;;  %v9500_v48 = vld [vmem:[%s12868_s4 + $0xe8] sm:$0xff]   ;;  %v9501_v6 = vld [vmem:[%s12868_s4 + $0xf0] sm:$0xff]   ;;  %v9518_v50 = vld [vmem:[%s12876_s9 + $0x58] sm:$0xff]  }
 0x52f   : > { %3406 = vmatpush1.bf16.msra.mxu1 %v3377_v3  ;;  %3283 = vmatprep.mubr.bf16.mxu1 %v12869_v13 }
 0x530   : > { %3407 = vmatprep.subr.bf16.mxu1 %v3380_v17  ;;  %v3534_v45 = vpop.permute.xlu1 %3533 }
 0x531   : > { %v3536_v30 = vpop.permute.xlu0 %3535 }
 0x532   : > { %v3548_v0 = vsel %vm1779_vm4, %v3534_v45, %v3536_v30 }
 0x533   : > { %3408 = vmatpush1.bf16.msra.mxu1 %v3379_v63 }
 0x534   : > { %3571 = vmatprep.subr.bf16.mxu1 %v3544_v22  ;;  %v3532_v41 = vpop.permute.xlu1 %3531  ;;  %v9503_v22 = vld [vmem:[%s12868_s4 + $0x100] sm:$0xff]  }
 0x535   : > { %v3540_v36 = vpop.permute.xlu0 %3539  ;;  %v3547_v24 = vsel %vm1779_vm4, %v3532_v41, %v3534_v45  ;;  %v9522_v45 = vld [vmem:[%s12876_s9 + $0x78] sm:$0xff]  }
 0x536   : > { %8368 = vmatmul.mubr.msk.bf16.gmra.mrb[8].mxu1 %vm2433_vm6, %v9493_v18  ;;  %v9502_v18 = vld [vmem:[%s12868_s4 + $0xf8] sm:$0xff]  }
 0x537   : > { %3293 = vmatprep.mubr.bf16.mxu1 %v12869_v13 }
 0x538   : > { %v3542_v21 = vpop.permute.xlu1 %3541 }
 0x539   : > { %v3538_v27 = vpop.permute.xlu0 %3537  ;;  %v3550_v53 = vsel %vm1779_vm4, %v3540_v36, %v3542_v21 }
 0x53a   : > { %v3549_v59 = vsel %vm1779_vm4, %v3538_v27, %v3540_v36  ;;  %v12878_v36 = vld [vmem:[#allocation18_spill] sm:$0xff]  ;;  %v12880_v27 = vld [vmem:[#allocation20_spill] sm:$0xff] }
 0x53c   : > { %v3692_v14 = vpop.permute.xlu1 %3691 }
 0x53d   : > { %v3694_v43 = vpop.permute.xlu0 %3693 }
 0x53e   : > { %8369 = vmatmul.mubr.msk.bf16.gmra.mrb[12].mxu1 %vm2433_vm6, %v9494_v16  ;;  %v3714_v23 = vsel %vm1930_vm5, %v3692_v14, %v3694_v43  ;;  %v9525_v43 = vld [vmem:[%s12876_s9 + $0x90] sm:$0xff]  }
 0x53f   : > { %3433 = vmatprep.mubr.bf16.mxu1 %v12869_v13 }
 0x540   : > { %v3690_v57 = vpop.permute.xlu1 %3689 }
 0x541   : > { %v3698_v1 = vpop.permute.xlu0 %3697  ;;  %v3713_v25 = vsel %vm1930_vm5, %v3690_v57, %v3692_v14  ;;  %v9526_v57 = vld [vmem:[%s12876_s9 + $0x98] sm:$0xff]  }
 0x544   : > { %v3700_v19 = vpop.permute.xlu1 %3699 }
 0x545   : > { %v3696_v10 = vpop.permute.xlu0 %3695  ;;  %v3716_v5 = vsel %vm1930_vm5, %v3698_v1, %v3700_v19 }
 0x546   : > { %8382 = vmatmul.mubr.msk.bf16.vlgmr.msra.gmra.mrb[0].mxu1 %vm2433_vm6, %v9495_v40  ;;  %v3715_v28 = vsel %vm1930_vm5, %v3696_v10, %v3698_v1  ;;  %v12877_v40 = vld [vmem:[#allocation17_spill] sm:$0xff] }
 0x547   : > { %3572 = vmatpush1.bf16.msra.mxu1 %v3543_v38  ;;  %3443 = vmatprep.mubr.bf16.mxu1 %v12869_v13  ;;  %v9527_v10 = vld [vmem:[%s12876_s9 + $0xa0] sm:$0xff]  }
 0x548   : > { %3573 = vmatprep.subr.bf16.mxu1 %v3546_v32  ;;  %v3704_v60 = vpop.permute.xlu1 %3703  ;;  %v9523_v32 = vld [vmem:[%s12876_s9 + $0x80] sm:$0xff]  }
 0x549   : > { %v3706_v37 = vpop.permute.xlu0 %3705 }
 0x54a   : > { %v3718_v15 = vsel %vm1930_vm5, %v3704_v60, %v3706_v37  ;;  %v12881_v37 = vld [vmem:[#allocation21_spill] sm:$0xff] }
 0x54b   : > { %3574 = vmatpush1.bf16.msra.mxu1 %v3545_v44  ;;  %v12879_v44 = vld [vmem:[#allocation19_spill] sm:$0xff] }
 0x54c   : > { %3575 = vmatprep.subr.bf16.mxu1 %v3548_v0  ;;  %v3702_v33 = vpop.permute.xlu1 %3701 }
 0x54d   : > { %v3710_v54 = vpop.permute.xlu0 %3709  ;;  %v3717_v3 = vsel %vm1930_vm5, %v3702_v33, %v3704_v60  ;;  %v9528_v33 = vld [vmem:[%s12876_s9 + $0xa8] sm:$0xff]  }
 0x54e   : > { %8383 = vmatmul.mubr.msk.bf16.gmra.mrb[4].mxu1 %vm2433_vm6, %v9496_v61 }
 0x54f   : > { %3576 = vmatpush1.bf16.msra.mxu1 %v3547_v24  ;;  %3453 = vmatprep.mubr.bf16.mxu1 %v12869_v13  ;;  %v9524_v24 = vld [vmem:[%s12876_s9 + $0x88] sm:$0xff]  }
 0x550   : > { %3577 = vmatprep.subr.bf16.mxu1 %v3550_v53  ;;  %v3712_v58 = vpop.permute.xlu1 %3711 }
 0x551   : > { %v3708_v17 = vpop.permute.xlu0 %3707  ;;  %v3720_v62 = vsel %vm1930_vm5, %v3710_v54, %v3712_v58  ;;  %v9529_v58 = vld [vmem:[%s12876_s9 + $0xb0] sm:$0xff]  }
 0x552   : > { %v3719_v63 = vsel %vm1930_vm5, %v3708_v17, %v3710_v54  ;;  %v12883_v54 = vld [vmem:[#allocation23_spill] sm:$0xff] }
 0x553   : > { %3578 = vmatpush1.bf16.msra.mxu1 %v3549_v59 }
 0x554   : > { %3741 = vmatprep.subr.bf16.mxu1 %v3714_v23 }
 0x556   : > { %8384 = vmatmul.mubr.msk.bf16.gmra.mrb[8].mxu1 %vm2433_vm6, %v9497_v9 }
 0x557   : > { %3463 = vmatprep.mubr.bf16.mxu1 %v12869_v13 }
 0x55e   : > { %8385 = vmatmul.mubr.msk.bf16.gmra.mrb[12].mxu1 %vm2433_vm6, %v9498_v2 }
 0x55f   : > { %3603 = vmatprep.mubr.bf16.mxu1 %v12869_v13 }
 0x562   : > { %v11210_v16 = vpop.permute.xlu0 %5515 }
 0x566   : > { %8398 = vmatmul.mubr.msk.bf16.vlgmr.msra.gmra.mrb[0].mxu1 %vm2433_vm6, %v9499_v20  ;;  %v11218_v41 = vpop.permute.xlu0 %5585 }
 0x567   : > { %3742 = vmatpush1.bf16.msra.mxu1 %v3713_v25  ;;  %3613 = vmatprep.mubr.bf16.mxu1 %v12869_v13  ;;  %v12882_v25 = vld [vmem:[#allocation22_spill] sm:$0xff] }
 0x568   : > { %3743 = vmatprep.subr.bf16.mxu1 %v3716_v5 }
 0x56a   : > { %v11229_v21 = vpop.permute.xlu0 %5525 }
 0x56b   : > { %3744 = vmatpush1.bf16.msra.mxu1 %v3715_v28  ;;  %v12884_v28 = vld [vmem:[#allocation24_spill] sm:$0xff] }
 0x56c   : > { %3745 = vmatprep.subr.bf16.mxu1 %v3718_v15 }
 0x56e   : > { %8399 = vmatmul.mubr.msk.bf16.gmra.mrb[4].mxu1 %vm2433_vm6, %v9500_v48  ;;  %v11237_v0 = vpop.permute.xlu0 %5595 }
 0x56f   : > { %3746 = vmatpush1.bf16.msra.mxu1 %v3717_v3  ;;  %3623 = vmatprep.mubr.bf16.mxu1 %v12869_v13 }
 0x570   : > { %3747 = vmatprep.subr.bf16.mxu1 %v3720_v62 }
 0x572   : > { %v11245_v53 = vpop.permute.xlu0 %5535 }
 0x573   : > { %3748 = vmatpush1.bf16.msra.mxu1 %v3719_v63 }
 0x574   : > { %4224 = vmatprep.subr.bf16.mxu1 %v9909_v49  ;;  %v9504_v49 = vld [vmem:[%s12868_s4 + $0x108] sm:$0xff]  }
 0x576   : > { %8400 = vmatmul.mubr.msk.bf16.gmra.mrb[8].mxu1 %vm2433_vm6, %v9501_v6  ;;  %v11253_v9 = vpop.permute.xlu0 %5605 }
 0x577   : > { %3633 = vmatprep.mubr.bf16.mxu1 %v12869_v13 }
 0x57a   : > { %v11262_v1 = vpop.permute.xlu0 %5545 }
 0x57e   : > { %8401 = vmatmul.mubr.msk.bf16.gmra.mrb[12].mxu1 %vm2433_vm6, %v9502_v18  ;;  %v11268_v2 = vpop.permute.xlu0 %5615 }
 0x57f   : > { %3773 = vmatprep.mubr.bf16.mxu1 %v12869_v13 }
 0x582   : > { %v11276_v20 = vpop.permute.xlu0 %5555 }
 0x586   : > { %8414 = vmatmul.mubr.msk.bf16.vlgmr.msra.gmra.mrb[0].mxu1 %vm2433_vm6, %v9503_v22  ;;  %v11288_v48 = vpop.permute.xlu0 %5625  ;;  %v9530_v22 = vld [vmem:[%s12876_s9 + $0xb8] sm:$0xff]  }
 0x587   : > { %4225 = vmatpush1.bf16.msra.mxu1 %v9913_v52  ;;  %3783 = vmatprep.mubr.bf16.mxu1 %v12869_v13  ;;  %v9505_v52 = vld [vmem:[%s12868_s4 + $0x110] sm:$0xff]  }
 0x588   : > { %4226 = vmatprep.subr.bf16.mxu1 %v9917_v55  ;;  %v9506_v55 = vld [vmem:[%s12868_s4 + $0x118] sm:$0xff]   ;;  %s12902_s4 = sld [smem:[#allocation42_spill]] }
 0x58a   : > { %v3838_v3 = vpop.permute.xlu0 %3837 }
 0x58b   : > { %4227 = vmatpush1.bf16.msra.mxu1 %v9920_v56  ;;  %v9507_v56 = vld [vmem:[%s12876_s9 + $0x28] sm:$0xff]  }
 0x58c   : > { %4347 = vmatprep.subr.bf16.mxu1 %v9971_v8  ;;  %v9508_v8 = vld [vmem:[%s12876_s9 + $0x30] sm:$0xff]  }
 0x58e   : > { %8415 = vmatmul.mubr.msk.bf16.gmra.mrb[4].mxu1 %vm2433_vm6, %v9504_v49  ;;  %v3894_v62 = vpop.permute.xlu0 %3893 }
 0x58f   : > { %3793 = vmatprep.mubr.bf16.mxu1 %v12869_v13 }
 0x596   : > { %8416 = vmatmul.mubr.msk.bf16.gmra.mrb[8].mxu1 %vm2433_vm6, %v9505_v52 }
 0x597   : > { %3803 = vmatprep.mubr.bf16.mxu1 %v12869_v13 }
 0x59e   : > { %8417 = vmatmul.mubr.msk.bf16.gmra.mrb[12].mxu1 %vm2433_vm6, %v9506_v55 }
 0x59f   : > { %4256 = vmatprep.mubr.bf16.mxu1 %v12869_v13 }
 0x5a6   : > { %8441 = vmatmul.mubr.msk.bf16.vlgmr.msra.gmra.mrb[16].mxu1 %vm784_vm12, %v9507_v56 }
 0x5a7   : > { %8452 = vmatpush1.bf16.msk.msra.mxu1 %vm9961_vm13, %v9952_v4  ;;  %4266 = vmatprep.mubr.bf16.mxu1 %v12869_v13  ;;  %v9509_v4 = vld [vmem:[%s12876_s9 + $0x38] sm:$0xff]  }
 0x5a8   : > { %4349 = vmatprep.subr.bf16.mxu1 %v9987_v12  ;;  %v9510_v12 = vld [vmem:[%s12876_s9 + $0x40] sm:$0xff]  }
 0x5ab   : > { %8454 = vmatpush1.bf16.msk.msra.mxu1 %vm9961_vm13, %v9976_v11  ;;  %v9511_v11 = vld [vmem:[%s12876_s9 + $0x48] sm:$0xff]  }
 0x5ac   : > { %4481 = vmatprep.subr.bf16.mxu1 %v10090_v26  ;;  %v9512_v26 = vld [vmem:[%s12876_s9] sm:$0xff]  }
 0x5ae   : > { %8442 = vmatmul.mubr.msk.bf16.gmra.mrb[20].mxu1 %vm784_vm12, %v9508_v8 }
 0x5af   : > { %4276 = vmatprep.mubr.bf16.mxu1 %v12869_v13 }
 0x5b6   : > { %8443 = vmatmul.mubr.msk.bf16.gmra.mrb[24].mxu1 %vm784_vm12, %v9509_v4 }
 0x5b7   : > { %4286 = vmatprep.mubr.bf16.mxu1 %v12869_v13 }
 0x5be   : > { %8444 = vmatmul.mubr.msk.bf16.gmra.mrb[28].mxu1 %vm784_vm12, %v9510_v12 }
 0x5bf   : > { %4296 = vmatprep.mubr.bf16.mxu1 %v12869_v13 }
 0x5c6   : > { %8445 = vmatmul.mubr.msk.bf16.gmra.mrb[32].mxu1 %vm784_vm12, %v9511_v11 }
 0x5c7   : > { %4379 = vmatprep.mubr.bf16.mxu1 %v12869_v13 }
 0x5ce   : > { %8455 = vmatmul.mubr.msk.bf16.vlgmr.msra.gmra.mrb[16].mxu1 %vm784_vm12, %v9512_v26 }
 0x5cf   : > { %4482 = vmatpush1.bf16.msra.mxu1 %v10094_v31  ;;  %4389 = vmatprep.mubr.bf16.mxu1 %v12869_v13  ;;  %v9514_v31 = vld [vmem:[%s12876_s9 + $0x10] sm:$0xff]  }
 0x5d0   : > { %4483 = vmatprep.subr.bf16.mxu1 %v10101_v35  ;;  %v9515_v35 = vld [vmem:[%s12876_s9 + $0x18] sm:$0xff]  }
 0x5d3   : > { %4484 = vmatpush1.bf16.msra.mxu1 %v10098_v34  ;;  %v9516_v34 = vld [vmem:[%s12876_s9 + $0x20] sm:$0xff]  }
 0x5d4   : > { %4635 = vmatprep.subr.bf16.mxu1 %v10109_v39  ;;  %v9517_v39 = vld [vmem:[%s12876_s9 + $0x50] sm:$0xff]  }
 0x5d6   : > { %8456 = vmatmul.mubr.msk.bf16.gmra.mrb[20].mxu1 %vm784_vm12, %v9513_v29  ;;  %v3848_v29 = vpop.permute.xlu0 %3847 }
 0x5d7   : > { %4399 = vmatprep.mubr.bf16.mxu1 %v12869_v13 }
 0x5de   : > { %8457 = vmatmul.mubr.msk.bf16.gmra.mrb[24].mxu1 %vm784_vm12, %v9514_v31 }
 0x5df   : > { %4409 = vmatprep.mubr.bf16.mxu1 %v12869_v13 }
 0x5e6   : > { %8458 = vmatmul.mubr.msk.bf16.gmra.mrb[28].mxu1 %vm784_vm12, %v9515_v35 }
 0x5e7   : > { %4419 = vmatprep.mubr.bf16.mxu1 %v12869_v13 }
 0x5ee   : > { %8459 = vmatmul.mubr.msk.bf16.gmra.mrb[32].mxu1 %vm784_vm12, %v9516_v34 }
 0x5ef   : > { %4513 = vmatprep.mubr.bf16.mxu1 %v12869_v13 }
 0x5f6   : > { %8475 = vmatmul.mubr.msk.bf16.vlgmr.msra.gmra.mrb[16].mxu1 %vm784_vm12, %v9517_v39 }
 0x5f7   : > { %4636 = vmatpush1.bf16.msra.mxu1 %v10115_v42  ;;  %4523 = vmatprep.mubr.bf16.mxu1 %v12869_v13  ;;  %v9519_v42 = vld [vmem:[%s12876_s9 + $0x60] sm:$0xff]  }
 0x5f8   : > { %4637 = vmatprep.subr.bf16.mxu1 %v10125_v47  ;;  %v9520_v47 = vld [vmem:[%s12876_s9 + $0x68] sm:$0xff]  }
 0x5fb   : > { %4638 = vmatpush1.bf16.msra.mxu1 %v10122_v46  ;;  %v9521_v46 = vld [vmem:[%s12876_s9 + $0x70] sm:$0xff]  }
 0x5fc   : > { %4789 = vmatprep.subr.bf16.mxu1 %v10132_v51  ;;  %v11207_v51 = vpop.permute.xlu1 %5510 }
 0x5fe   : > { %8476 = vmatmul.mubr.msk.bf16.gmra.mrb[20].mxu1 %vm784_vm12, %v9518_v50 }
 0x5ff   : > { %4533 = vmatprep.mubr.bf16.mxu1 %v12869_v13 }
 0x600   : > { %v11216_v30 = vpop.permute.xlu1 %5580 }
 0x604   : > { %v11224_v38 = vpop.permute.xlu1 %5520 }
 0x606   : > { %8477 = vmatmul.mubr.msk.bf16.gmra.mrb[24].mxu1 %vm784_vm12, %v9519_v42 }
 0x607   : > { %4543 = vmatprep.mubr.bf16.mxu1 %v12869_v13 }
 0x608   : > { %v11234_v61 = vpop.permute.xlu1 %5590 }
 0x60c   : > { %v11242_v14 = vpop.permute.xlu1 %5530 }
 0x60e   : > { %8478 = vmatmul.mubr.msk.bf16.gmra.mrb[28].mxu1 %vm784_vm12, %v9520_v47 }
 0x60f   : > { %4553 = vmatprep.mubr.bf16.mxu1 %v12869_v13 }
 0x610   : > { %v11251_v59 = vpop.permute.xlu1 %5600 }
 0x614   : > { %v11257_v23 = vpop.permute.xlu1 %5540 }
 0x616   : > { %8479 = vmatmul.mubr.msk.bf16.gmra.mrb[32].mxu1 %vm784_vm12, %v9521_v46 }
 0x617   : > { %4667 = vmatprep.mubr.bf16.mxu1 %v12869_v13 }
 0x618   : > { %v11265_v19 = vpop.permute.xlu1 %5610 }
 0x61c   : > { %v11273_v60 = vpop.permute.xlu1 %5550 }
 0x61e   : > { %8495 = vmatmul.mubr.msk.bf16.vlgmr.msra.gmra.mrb[16].mxu1 %vm784_vm12, %v9522_v45 }
 0x61f   : > { %4790 = vmatpush1.bf16.msra.mxu1 %v12877_v40  ;;  %4677 = vmatprep.mubr.bf16.mxu1 %v12869_v13  ;;  %v9531_v40 = vld [vmem:[%s12876_s9 + $0xc0] sm:$0xff]  }
 0x620   : > { %4791 = vmatprep.subr.bf16.mxu1 %v12878_v36  ;;  %v11284_v5 = vpop.permute.xlu1 %5620 }
 0x623   : > { %4792 = vmatpush1.bf16.msra.mxu1 %v12879_v44 }
 0x624   : > { %4943 = vmatprep.subr.bf16.mxu1 %v12880_v27  ;;  %v3833_v15 = vpop.permute.xlu1 %3832 }
 0x626   : > { %8496 = vmatmul.mubr.msk.bf16.gmra.mrb[20].mxu1 %vm784_vm12, %v9523_v32 }
 0x627   : > { %4687 = vmatprep.mubr.bf16.mxu1 %v12869_v13 }
 0x628   : > { %v3889_v17 = vpop.permute.xlu1 %3888 }
 0x62c   : > { %v3843_v4 = vpop.permute.xlu1 %3842 }
 0x62e   : > { %8497 = vmatmul.mubr.msk.bf16.gmra.mrb[24].mxu1 %vm784_vm12, %v9524_v24 }
 0x62f   : > { %4697 = vmatprep.mubr.bf16.mxu1 %v12869_v13 }
 0x630   : > { %v3899_v36 = vpop.permute.xlu1 %3898 }
 0x636   : > { %8498 = vmatmul.mubr.msk.bf16.gmra.mrb[28].mxu1 %vm784_vm12, %v9525_v43 }
 0x637   : > { %4707 = vmatprep.mubr.bf16.mxu1 %v12869_v13 }
 0x63e   : > { %8499 = vmatmul.mubr.msk.bf16.gmra.mrb[32].mxu1 %vm784_vm12, %v9526_v57 }
 0x63f   : > { %4821 = vmatprep.mubr.bf16.mxu1 %v12869_v13 }
 0x646   : > { %8515 = vmatmul.mubr.msk.bf16.vlgmr.msra.gmra.mrb[16].mxu1 %vm784_vm12, %v9527_v10  ;;  %v3904_v10 = vpop.permute.xlu0 %3903 }
 0x647   : > { %4944 = vmatpush1.bf16.msra.mxu1 %v12881_v37  ;;  %4831 = vmatprep.mubr.bf16.mxu1 %v12869_v13 }
 0x648   : > { %4945 = vmatprep.subr.bf16.mxu1 %v12882_v25 }
 0x64b   : > { %4946 = vmatpush1.bf16.msra.mxu1 %v12883_v54 }
 0x64c   : > { %5097 = vmatprep.subr.bf16.mxu1 %v12884_v28 }
 0x64e   : > { %8516 = vmatmul.mubr.msk.bf16.gmra.mrb[20].mxu1 %vm784_vm12, %v9528_v33 }
 0x64f   : > { %4841 = vmatprep.mubr.bf16.mxu1 %v12869_v13 }
 0x656   : > { %8517 = vmatmul.mubr.msk.bf16.gmra.mrb[24].mxu1 %vm784_vm12, %v9529_v58 }
 0x657   : > { %4851 = vmatprep.mubr.bf16.mxu1 %v12869_v13 }
 0x659   : > { %v3775_v63 = vpop.f32.mrb[0].mxu1 }
 0x65a   : > { %v3870_v6 = vmul.f32 %v3833_v15, %v3775_v63  ;;  %v3777_v18 = vpop.f32.mrb[1].mxu1 }
 0x65b   : > { %v3871_v49 = vmul.f32 %v3833_v15, %v3777_v18  ;;  %v3779_v52 = vpop.f32.mrb[2].mxu1 }
 0x65c   : > { %v3926_v55 = vadd.f32 %v3889_v17, %v3870_v6  ;;  %v3872_v56 = vmul.f32 %v3838_v3, %v3779_v52  ;;  %v3781_v8 = vpop.f32.mrb[3].mxu1  ;;  %v9532_v6 = vld [vmem:[%s12876_s9 + $0xc8] sm:$0xff]   ;;  %v12885_v52 = vld [vmem:[#allocation25_spill] sm:$0xff] }
 0x65d   : > { %v3927_v12 = vadd.f32 %v3889_v17, %v3871_v49  ;;  %v3873_v11 = vmul.f32 %v3838_v3, %v3781_v8 }
 0x65e   : > { %v3928_v26 = vadd.f32 %v3894_v62, %v3872_v56  ;;  %8518 = vmatmul.mubr.msk.bf16.gmra.mrb[28].mxu1 %vm784_vm12, %v9530_v22  ;;  %v3942_v35 = vmax.f32 %v3926_v55, 0.0  ;;  %v12886_v55 = vld [vmem:[#allocation26_spill] sm:$0xff] }
 0x65f   : > { %v3929_v31 = vadd.f32 %v3894_v62, %v3873_v11  ;;  %4861 = vmatprep.mubr.bf16.mxu1 %v12869_v13  ;;  %v3943_v39 = vmax.f32 %v3927_v12, 0.0  ;;  %v12887_v12 = vld [vmem:[#allocation27_spill] sm:$0xff] }
 0x660   : > { %v3944_v34 = vmax.f32 %v3928_v26, 0.0  ;;  %v12888_v26 = vld [vmem:[#allocation28_spill] sm:$0xff] }
 0x661   : > { %v3945_v50 = vmax.f32 %v3929_v31, 0.0  ;;  %v3785_v42 = vpop.f32.mrb[4].mxu1  ;;  %v9534_v31 = vld [vmem:[%s12876_s9 + $0xd8] sm:$0xff]  }
 0x662   : > { %v3966_v47 = vpack.c.bf16 %v3944_v34, %v3942_v35  ;;  %v3874_v46 = vmul.f32 %v3843_v4, %v3785_v42  ;;  %v3787_v45 = vpop.f32.mrb[5].mxu1  ;;  %v9535_v35 = vld [vmem:[%s12876_s9 + $0xe0] sm:$0xff]   ;;  %v9536_v34 = vld [vmem:[%s12876_s9 + $0xe8] sm:$0xff]  }
 0x663   : > { %v3875_v32 = vmul.f32 %v3843_v4, %v3787_v45  ;;  %v3789_v44 = vpop.f32.mrb[6].mxu1  ;;  %v3967_v27 = vpack.c.bf16 %v3945_v50, %v3943_v39  ;;  %v9533_v4 = vld [vmem:[%s12876_s9 + $0xd0] sm:$0xff]   ;;  %v12889_v50 = vld [vmem:[#allocation29_spill] sm:$0xff]  ;;  %v12890_v42 = vld [vmem:[#allocation30_spill] sm:$0xff] }
 0x664   : > { %v3930_v24 = vadd.f32 %v3899_v36, %v3874_v46  ;;  %v3876_v43 = vmul.f32 %v3848_v29, %v3789_v44  ;;  %v3791_v57 = vpop.f32.mrb[7].mxu1  ;;  %v9537_v39 = vld [vmem:[%s12876_s9 + $0xf0] sm:$0xff]   ;;  %v12892_v45 = vld [vmem:[#allocation32_spill] sm:$0xff] }
 0x665   : > { %v3931_v37 = vadd.f32 %v3899_v36, %v3875_v32  ;;  %v3877_v25 = vmul.f32 %v3848_v29, %v3791_v57  ;;  %4054 = vmatprep.subr.bf16.mxu0 %v3967_v27  ;;  %v12891_v46 = vld [vmem:[#allocation31_spill] sm:$0xff]  ;;  %v9540_v36 = vld [vmem:[%s12876_s9 + $0x108] sm:$0xff]   ;;  %v9542_v44 = vld [vmem:[%s12876_s9 + $0x118] sm:$0xff]  }
 0x666   : > { %v3932_v33 = vadd.f32 %v3904_v10, %v3876_v43  ;;  %4055 = vmatpush1.bf16.msra.mxu0 %v3966_v47  ;;  %8519 = vmatmul.mubr.msk.bf16.gmra.mrb[32].mxu1 %vm784_vm12, %v9531_v40  ;;  %v3946_v28 = vmax.f32 %v3930_v24, 0.0  ;;  %v9538_v47 = vld [vmem:[%s12876_s9 + $0xf8] sm:$0xff]   ;;  %v9539_v40 = vld [vmem:[%s12876_s9 + $0x100] sm:$0xff]   ;;  %v9541_v32 = vld [vmem:[%s12876_s9 + $0x110] sm:$0xff]  }
 0x667   : > { %v3933_v54 = vadd.f32 %v3904_v10, %v3877_v25  ;;  %4975 = vmatprep.mubr.bf16.mxu1 %v12869_v13  ;;  %v3947_v58 = vmax.f32 %v3931_v37, 0.0  ;;  %v12893_v27 = vld [vmem:[#allocation33_spill] sm:$0xff]  ;;  %v12894_v24 = vld [vmem:[#allocation34_spill] sm:$0xff]  ;;  %v12895_v57 = vld [vmem:[#allocation35_spill] sm:$0xff] }
 0x668   : > { %v3948_v15 = vmax.f32 %v3932_v33, 0.0  ;;  %v9543_v43 = vld [vmem:[%s12876_s9 + $0x120] sm:$0xff]   ;;  %v9544_v10 = vld [vmem:[%s12876_s9 + $0x128] sm:$0xff]   ;;  %v9545_v37 = vld [vmem:[%s12876_s9 + $0x130] sm:$0xff]  }
 0x669   : > { %v3949_v3 = vmax.f32 %v3933_v54, 0.0  ;;  %v11307_v17 = vpop.f32.mrb[8].mxu1  ;;  %v9546_v25 = vld [vmem:[%s12876_s9 + $0x138] sm:$0xff]   ;;  %v9547_v33 = vld [vmem:[%s12876_s9 + $0x140] sm:$0xff]   ;;  %v9548_v54 = vld [vmem:[%s12876_s9 + $0x148] sm:$0xff]  }
 0x66a   : > { %v3968_v62 = vpack.c.bf16 %v3948_v15, %v3946_v28  ;;  %v11309_v63 = vpop.f32.mrb[9].mxu1  ;;  %v9549_v28 = vld [vmem:[%s12876_s9 + $0x150] sm:$0xff]   ;;  %v9550_v15 = vld [vmem:[%s12876_s9 + $0x158] sm:$0xff]  }
 0x66b   : > { %v11314_v18 = vpop.f32.mrb[10].mxu1  ;;  %v3969_v22 = vpack.c.bf16 %v3949_v3, %v3947_v58  ;;  %v9551_v58 = vld [vmem:[%s12876_s9 + $0x160] sm:$0xff]  }
 0x66c   : > { %v11316_v49 = vpop.f32.mrb[11].mxu1 }
 0x66d   : > { %4056 = vmatprep.subr.bf16.mxu0 %v3969_v22 }
 0x66e   : > { %4057 = vmatpush1.bf16.msra.mxu0 %v3968_v62  ;;  %8535 = vmatmul.mubr.msk.bf16.vlgmr.msra.gmra.mrb[16].mxu1 %vm784_vm12, %v9532_v6 }
 0x66f   : > { %5098 = vmatpush1.bf16.msra.mxu1 %v12885_v52  ;;  %4985 = vmatprep.mubr.bf16.mxu1 %v12869_v13 }
 0x670   : > { %5099 = vmatprep.subr.bf16.mxu1 %v12886_v55 }
 0x671   : > { %v11322_v56 = vpop.f32.mrb[12].mxu1 }
 0x672   : > { %v11324_v8 = vpop.f32.mrb[13].mxu1 }
 0x673   : > { %5100 = vmatpush1.bf16.msra.mxu1 %v12887_v12  ;;  %v11330_v11 = vpop.f32.mrb[14].mxu1 }
 0x674   : > { %5251 = vmatprep.subr.bf16.mxu1 %v12888_v26  ;;  %v11333_v29 = vpop.f32.mrb[15].mxu1 }
 0x676   : > { %8536 = vmatmul.mubr.msk.bf16.gmra.mrb[20].mxu1 %vm784_vm12, %v9533_v4 }
 0x677   : > { %4995 = vmatprep.mubr.bf16.mxu1 %v12869_v13 }
 0x67e   : > { %8537 = vmatmul.mubr.msk.bf16.gmra.mrb[24].mxu1 %vm784_vm12, %v9534_v31 }
 0x67f   : > { %5005 = vmatprep.mubr.bf16.mxu1 %v12869_v13 }
 0x686   : > { %8538 = vmatmul.mubr.msk.bf16.gmra.mrb[28].mxu1 %vm784_vm12, %v9535_v35 }
 0x687   : > { %5015 = vmatprep.mubr.bf16.mxu1 %v12869_v13 }
 0x68e   : > { %8539 = vmatmul.mubr.msk.bf16.gmra.mrb[32].mxu1 %vm784_vm12, %v9536_v34 }
 0x68f   : > { %5129 = vmatprep.mubr.bf16.mxu1 %v12869_v13 }
 0x696   : > { %8555 = vmatmul.mubr.msk.bf16.vlgmr.msra.gmra.mrb[16].mxu1 %vm784_vm12, %v9537_v39 }
 0x697   : > { %5252 = vmatpush1.bf16.msra.mxu1 %v12889_v50  ;;  %5139 = vmatprep.mubr.bf16.mxu1 %v12869_v13 }
 0x698   : > { %5253 = vmatprep.subr.bf16.mxu1 %v12890_v42 }
 0x69b   : > { %5254 = vmatpush1.bf16.msra.mxu1 %v12891_v46 }
 0x69c   : > { %5405 = vmatprep.subr.bf16.mxu1 %v12892_v45 }
 0x69e   : > { %8556 = vmatmul.mubr.msk.bf16.gmra.mrb[20].mxu1 %vm784_vm12, %v9538_v47 }
 0x69f   : > { %5149 = vmatprep.mubr.bf16.mxu1 %v12869_v13 }
 0x6a6   : > { %8557 = vmatmul.mubr.msk.bf16.gmra.mrb[24].mxu1 %vm784_vm12, %v9539_v40 }
 0x6a7   : > { %5159 = vmatprep.mubr.bf16.mxu1 %v12869_v13 }
 0x6ae   : > { %8558 = vmatmul.mubr.msk.bf16.gmra.mrb[28].mxu1 %vm784_vm12, %v9540_v36 }
 0x6af   : > { %5169 = vmatprep.mubr.bf16.mxu1 %v12869_v13 }
 0x6b6   : > { %8559 = vmatmul.mubr.msk.bf16.gmra.mrb[32].mxu1 %vm784_vm12, %v9541_v32 }
 0x6b7   : > { %5283 = vmatprep.mubr.bf16.mxu1 %v12869_v13 }
 0x6be   : > { %8575 = vmatmul.mubr.msk.bf16.vlgmr.msra.gmra.mrb[16].mxu1 %vm784_vm12, %v9542_v44 }
 0x6bf   : > { %5406 = vmatpush1.bf16.msra.mxu1 %v12893_v27  ;;  %5293 = vmatprep.mubr.bf16.mxu1 %v12869_v13 }
 0x6c0   : > { %5407 = vmatprep.subr.bf16.mxu1 %v12894_v24 }
 0x6c3   : > { %5408 = vmatpush1.bf16.msra.mxu1 %v12895_v57 }
 0x6c6   : > { %8576 = vmatmul.mubr.msk.bf16.gmra.mrb[20].mxu1 %vm784_vm12, %v9543_v43 }
 0x6c7   : > { %5303 = vmatprep.mubr.bf16.mxu1 %v12869_v13 }
 0x6ce   : > { %8577 = vmatmul.mubr.msk.bf16.gmra.mrb[24].mxu1 %vm784_vm12, %v9544_v10 }
 0x6cf   : > { %5313 = vmatprep.mubr.bf16.mxu1 %v12869_v13 }
 0x6d6   : > { %8578 = vmatmul.mubr.msk.bf16.gmra.mrb[28].mxu1 %vm784_vm12, %v9545_v37 }
 0x6d7   : > { %5323 = vmatprep.mubr.bf16.mxu1 %v12869_v13 }
 0x6de   : > { %8579 = vmatmul.mubr.msk.bf16.gmra.mrb[32].mxu1 %vm784_vm12, %v9546_v25 }
 0x6df   : > { %5437 = vmatprep.mubr.bf16.mxu1 %v12869_v13 }
 0x6e6   : > { %8595 = vmatmul.mubr.msk.bf16.vlgmr.msra.gmra.mrb[16].mxu1 %vm784_vm12, %v9547_v33 }
 0x6e7   : > { %5447 = vmatprep.mubr.bf16.mxu1 %v12869_v13 }
 0x6ee   : > { %8596 = vmatmul.mubr.msk.bf16.gmra.mrb[20].mxu1 %vm784_vm12, %v9548_v54 }
 0x6ef   : > { %5457 = vmatprep.mubr.bf16.mxu1 %v12869_v13 }
 0x6f6   : > { %8597 = vmatmul.mubr.msk.bf16.gmra.mrb[24].mxu1 %vm784_vm12, %v9549_v28 }
 0x6f7   : > { %5467 = vmatprep.mubr.bf16.mxu1 %v12869_v13 }
 0x6fe   : > { %8598 = vmatmul.mubr.msk.bf16.gmra.mrb[28].mxu1 %vm784_vm12, %v9550_v15 }
 0x6ff   : > { %5477 = vmatprep.mubr.bf16.mxu1 %v12869_v13 }
 0x706   : > { %8599 = vmatmul.mubr.msk.bf16.gmra.mrb[32].mxu1 %vm784_vm12, %v9551_v58 }
 0x707   : > { %7991 = vmatprep.mubr.bf16.mxu1 %v12869_v13 }
 0x7b9   : > { %v5439_v3 = vpop.f32.mrb[16].mxu1 }
 0x7ba   : > { %v5558_v62 = vmul.f32 %v11207_v51, %v5439_v3  ;;  %v5441_v6 = vpop.f32.mrb[17].mxu1 }
 0x7bb   : > { %v5559_v22 = vmul.f32 %v11207_v51, %v5441_v6  ;;  %v5443_v52 = vpop.f32.mrb[18].mxu1 }
 0x7bc   : > { %v5628_v55 = vadd.f32 %v11216_v30, %v5558_v62  ;;  %v5560_v4 = vmul.f32 %v11210_v16, %v5443_v52  ;;  %v5445_v12 = vpop.f32.mrb[19].mxu1 }
 0x7bd   : > { %v5629_v26 = vadd.f32 %v11216_v30, %v5559_v22  ;;  %v5561_v31 = vmul.f32 %v11210_v16, %v5445_v12 }
 0x7be   : > { %v5630_v35 = vadd.f32 %v11218_v41, %v5560_v4  ;;  %v5648_v39 = vmax.f32 %v5628_v55, 0.0 }
 0x7bf   : > { %v5631_v34 = vadd.f32 %v11218_v41, %v5561_v31  ;;  %v5649_v42 = vmax.f32 %v5629_v26, 0.0 }
 0x7c0   : > { %v5650_v50 = vmax.f32 %v5630_v35, 0.0 }
 0x7c1   : > { %v5651_v47 = vmax.f32 %v5631_v34, 0.0  ;;  %v5449_v46 = vpop.f32.mrb[20].mxu1 }
 0x7c2   : > { %v11442_v51 = vpack.c.bf16 %v5650_v50, %v5648_v39  ;;  %v5562_v45 = vmul.f32 %v11224_v38, %v5449_v46  ;;  %v5451_v40 = vpop.f32.mrb[21].mxu1 }
 0x7c3   : > { %v11445_v36 = vpack.c.bf16 %v5651_v47, %v5649_v42  ;;  %v5563_v30 = vmul.f32 %v11224_v38, %v5451_v40  ;;  %v5453_v32 = vpop.f32.mrb[22].mxu1 }
 0x7c4   : > { %v5632_v16 = vadd.f32 %v11234_v61, %v5562_v45  ;;  %v5564_v44 = vmul.f32 %v11229_v21, %v5453_v32  ;;  %v5455_v41 = vpop.f32.mrb[23].mxu1  ;;  %5793 = vrot.lane.b32.xlu1 %v11442_v51, %s12865_s22 }
 0x7c5   : > { %v5633_v27 = vadd.f32 %v11234_v61, %v5563_v30  ;;  %v5565_v24 = vmul.f32 %v11229_v21, %v5455_v41  ;;  %5795 = vrot.lane.b32.xlu0 %v11445_v36, %s12865_s22 }
 0x7c6   : > { %v5634_v43 = vadd.f32 %v11237_v0, %v5564_v44  ;;  %v5652_v57 = vmax.f32 %v5632_v16, 0.0 }
 0x7c7   : > { %v5635_v38 = vadd.f32 %v11237_v0, %v5565_v24  ;;  %v5653_v37 = vmax.f32 %v5633_v27, 0.0 }
 0x7c8   : > { %v5654_v10 = vmax.f32 %v5634_v43, 0.0 }
 0x7c9   : > { %v5655_v25 = vmax.f32 %v5635_v38, 0.0  ;;  %v5459_v33 = vpop.f32.mrb[24].mxu1 }
 0x7ca   : > { %v11458_v54 = vpack.c.bf16 %v5654_v10, %v5652_v57  ;;  %v5566_v28 = vmul.f32 %v11242_v14, %v5459_v33  ;;  %v5461_v15 = vpop.f32.mrb[25].mxu1 }
 0x7cb   : > { %v11461_v61 = vpack.c.bf16 %v5655_v25, %v5653_v37  ;;  %v5567_v21 = vmul.f32 %v11242_v14, %v5461_v15  ;;  %v5463_v58 = vpop.f32.mrb[26].mxu1 }
 0x7cc   : > { %v5636_v3 = vadd.f32 %v11251_v59, %v5566_v28  ;;  %v5568_v62 = vmul.f32 %v11245_v53, %v5463_v58  ;;  %v5465_v0 = vpop.f32.mrb[27].mxu1  ;;  %5797 = vrot.lane.b32.xlu1 %v11458_v54, %s12865_s22 }
 0x7cd   : > { %v5637_v6 = vadd.f32 %v11251_v59, %v5567_v21  ;;  %v5569_v22 = vmul.f32 %v11245_v53, %v5465_v0  ;;  %5799 = vrot.lane.b32.xlu0 %v11461_v61, %s12865_s22  ;;  %v2189_v0 = vld [vmem:[%s12746_s6 + $0x28] sm:$0xff] }
 0x7ce   : > { %v5638_v52 = vadd.f32 %v11253_v9, %v5568_v62  ;;  %v5656_v55 = vmax.f32 %v5636_v3, 0.0 }
 0x7cf   : > { %v5639_v14 = vadd.f32 %v11253_v9, %v5569_v22  ;;  %v5657_v12 = vmax.f32 %v5637_v6, 0.0  ;;  %v2182_v6 = vld [vmem:[%s12745_s5 + $0x30] sm:$0xff]  ;;  %v2183_v22 = vld [vmem:[%s12745_s5 + $0x38] sm:$0xff] }
 0x7d0   : > { %v5658_v4 = vmax.f32 %v5638_v52, 0.0  ;;  %v2190_v52 = vld [vmem:[%s12746_s6 + $0x30] sm:$0xff] }
 0x7d1   : > { %v5659_v26 = vmax.f32 %v5639_v14, 0.0  ;;  %v5469_v31 = vpop.f32.mrb[28].mxu1  ;;  %v2191_v14 = vld [vmem:[%s12746_s6 + $0x38] sm:$0xff] }
 0x7d2   : > { %v11474_v35 = vpack.c.bf16 %v5658_v4, %v5656_v55  ;;  %v5570_v34 = vmul.f32 %v11257_v23, %v5469_v31  ;;  %v5471_v39 = vpop.f32.mrb[29].mxu1 }
 0x7d3   : > { %v11477_v59 = vpack.c.bf16 %v5659_v26, %v5657_v12  ;;  %v5571_v53 = vmul.f32 %v11257_v23, %v5471_v39  ;;  %v5473_v50 = vpop.f32.mrb[30].mxu1 }
 0x7d4   : > { %v5640_v42 = vadd.f32 %v11265_v19, %v5570_v34  ;;  %v5572_v47 = vmul.f32 %v11262_v1, %v5473_v50  ;;  %v5475_v9 = vpop.f32.mrb[31].mxu1  ;;  %5801 = vrot.lane.b32.xlu1 %v11474_v35, %s12865_s22 }
 0x7d5   : > { %v5641_v46 = vadd.f32 %v11265_v19, %v5571_v53  ;;  %v5573_v45 = vmul.f32 %v11262_v1, %v5475_v9  ;;  %5803 = vrot.lane.b32.xlu0 %v11477_v59, %s12865_s22 }
 0x7d6   : > { %v5642_v40 = vadd.f32 %v11268_v2, %v5572_v47  ;;  %v5660_v30 = vmax.f32 %v5640_v42, 0.0 }
 0x7d7   : > { %v5643_v23 = vadd.f32 %v11268_v2, %v5573_v45  ;;  %v5661_v16 = vmax.f32 %v5641_v46, 0.0 }
 0x7d8   : > { %v5662_v32 = vmax.f32 %v5642_v40, 0.0 }
 0x7d9   : > { %v5663_v44 = vmax.f32 %v5643_v23, 0.0  ;;  %v5479_v41 = vpop.f32.mrb[32].mxu1 }
 0x7da   : > { %v11490_v27 = vpack.c.bf16 %v5662_v32, %v5660_v30  ;;  %v5574_v24 = vmul.f32 %v11273_v60, %v5479_v41  ;;  %v5481_v43 = vpop.f32.mrb[33].mxu1 }
 0x7db   : > { %v11493_v19 = vpack.c.bf16 %v5663_v44, %v5661_v16  ;;  %v5575_v1 = vmul.f32 %v11273_v60, %v5481_v43  ;;  %v5483_v38 = vpop.f32.mrb[34].mxu1 }
 0x7dc   : > { %v5644_v57 = vadd.f32 %v11284_v5, %v5574_v24  ;;  %v5576_v10 = vmul.f32 %v11276_v20, %v5483_v38  ;;  %v5485_v2 = vpop.f32.mrb[35].mxu1  ;;  %5805 = vrot.lane.b32.xlu1 %v11490_v27, %s12865_s22 }
 0x7dd   : > { %v5645_v37 = vadd.f32 %v11284_v5, %v5575_v1  ;;  %v5577_v25 = vmul.f32 %v11276_v20, %v5485_v2  ;;  %5807 = vrot.lane.b32.xlu0 %v11493_v19, %s12865_s22  ;;  %v2180_v20 = vld [vmem:[%s12745_s5 + $0x20] sm:$0xff]  ;;  %v2181_v5 = vld [vmem:[%s12745_s5 + $0x28] sm:$0xff] }
 0x7de   : > { %v5646_v33 = vadd.f32 %v11288_v48, %v5576_v10  ;;  %v5664_v28 = vmax.f32 %v5644_v57, 0.0  ;;  %v5708_v10 = vsel %vm643_vm3, 0, %v11442_v51 }
 0x7df   : > { %v5647_v60 = vadd.f32 %v11288_v48, %v5577_v25  ;;  %v5665_v21 = vmax.f32 %v5645_v37, 0.0  ;;  %v2188_v48 = vld [vmem:[%s12746_s6 + $0x20] sm:$0xff]  ;;  %v5709_v37 = vsel %vm644_vm8, 0, %v11445_v36  ;;  %v5710_v25 = vsel %vm643_vm3, 0, %v11458_v54 }
 0x7e0   : > { %v5666_v15 = vmax.f32 %v5646_v33, 0.0  ;;  %v5711_v33 = vsel %vm644_vm8, 0, %v11461_v61 }
 0x7e1   : > { %v5667_v58 = vmax.f32 %v5647_v60, 0.0  ;;  %v5712_v60 = vsel %vm643_vm3, 0, %v11474_v35 }
 0x7e2   : > { %v11506_v3 = vpack.c.bf16 %v5666_v15, %v5664_v28  ;;  %v5713_v15 = vsel %vm644_vm8, 0, %v11477_v59 }
 0x7e3   : > { %v11508_v62 = vpack.c.bf16 %v5667_v58, %v5665_v21  ;;  %v5714_v58 = vsel %vm643_vm3, 0, %v11490_v27 }
 0x7e4   : > { %5809 = vrot.lane.b32.xlu1 %v11506_v3, %s12865_s22 }
 0x7e5   : > { %5811 = vrot.lane.b32.xlu0 %v11508_v62, %s12865_s22 }
 0x7e8   : > { %3852 = vperm.xlu1 %9434, %v2180_v20  }
 0x7e9   : > { %3857 = vperm.xlu0 %9433, %v2181_v5  }
 0x7ec   : > { %3908 = vperm.xlu1 %9434, %v2188_v48  }
 0x7ed   : > { %3913 = vperm.xlu0 %9433, %v2189_v0  }
 0x7f0   : > { %3862 = vperm.xlu1 %9434, %v2182_v6  }
 0x7f1   : > { %3867 = vperm.xlu0 %9433, %v2183_v22   ;;  %v5715_v22 = vsel %vm644_vm8, 0, %v11493_v19 }
 0x7f4   : > { %3918 = vperm.xlu1 %9434, %v2190_v52  }
 0x7f5   : > { %3923 = vperm.xlu0 %9433, %v2191_v14  }
 0x836   : > { %v5794_v55 = vpop.permute.xlu1 %5793 }
 0x837   : > { %v5796_v4 = vpop.permute.xlu0 %5795  ;;  %v11539_v12 = vsel %vm661_vm7, 0, %v5794_v55 }
 0x838   : > { %5949 = vrot.lane.b32.xlu1 %v11539_v12, %s12866_s29  ;;  %v11544_v26 = vsel %vm661_vm7, %v5796_v4, 0  ;;  %v11549_v31 = vsel %vm661_vm7, %v5794_v55, %v5796_v4 }
 0x839   : > { %5953 = vrot.lane.b32.xlu0 %v11544_v26, %s12866_s29 }
 0x83c   : > { %5951 = vrot.lane.b32.xlu1 %v11549_v31, %s12866_s29 }
 0x83e   : > { %v5798_v34 = vpop.permute.xlu1 %5797 }
 0x83f   : > { %v5800_v39 = vpop.permute.xlu0 %5799  ;;  %v11554_v53 = vsel %vm661_vm7, 0, %v5798_v34 }
 0x840   : > { %5955 = vrot.lane.b32.xlu0 %v11554_v53, %s12866_s29  ;;  %v11559_v50 = vsel %vm661_vm7, %v5800_v39, 0  ;;  %v11564_v42 = vsel %vm661_vm7, %v5798_v34, %v5800_v39 }
 0x841   : > { %5959 = vrot.lane.b32.xlu1 %v11559_v50, %s12866_s29 }
 0x844   : > { %5957 = vrot.lane.b32.xlu0 %v11564_v42, %s12866_s29 }
 0x846   : > { %v5802_v47 = vpop.permute.xlu1 %5801 }
 0x847   : > { %v5804_v9 = vpop.permute.xlu0 %5803  ;;  %v11569_v46 = vsel %vm661_vm7, 0, %v5802_v47 }
 0x848   : > { %5961 = vrot.lane.b32.xlu1 %v11569_v46, %s12866_s29  ;;  %v11574_v45 = vsel %vm661_vm7, %v5804_v9, 0  ;;  %v11579_v40 = vsel %vm661_vm7, %v5802_v47, %v5804_v9  ;;  %v5717_v9 = vsel %vm644_vm8, 0, %v11508_v62 }
 0x849   : > { %5965 = vrot.lane.b32.xlu0 %v11574_v45, %s12866_s29 }
 0x84c   : > { %5963 = vrot.lane.b32.xlu1 %v11579_v40, %s12866_s29 }
 0x84e   : > { %v5806_v23 = vpop.permute.xlu1 %5805 }
 0x84f   : > { %v5808_v30 = vpop.permute.xlu0 %5807  ;;  %v11584_v32 = vsel %vm661_vm7, 0, %v5806_v23 }
 0x850   : > { %5967 = vrot.lane.b32.xlu0 %v11584_v32, %s12866_s29  ;;  %v11589_v16 = vsel %vm661_vm7, %v5808_v30, 0  ;;  %v11594_v44 = vsel %vm661_vm7, %v5806_v23, %v5808_v30 }
 0x851   : > { %5971 = vrot.lane.b32.xlu1 %v11589_v16, %s12866_s29 }
 0x854   : > { %5969 = vrot.lane.b32.xlu0 %v11594_v44, %s12866_s29 }
 0x856   : > { %v5810_v41 = vpop.permute.xlu1 %5809 }
 0x857   : > { %v5812_v24 = vpop.permute.xlu0 %5811  ;;  %v11599_v43 = vsel %vm661_vm7, 0, %v5810_v41 }
 0x858   : > { %5973 = vrot.lane.b32.xlu1 %v11599_v43, %s12866_s29  ;;  %v11604_v1 = vsel %vm661_vm7, %v5812_v24, 0  ;;  %v11609_v38 = vsel %vm661_vm7, %v5810_v41, %v5812_v24  ;;  %v5698_v41 = vsel %vm621_vm10, 0, %v11442_v51 }
 0x859   : > { %5977 = vrot.lane.b32.xlu0 %v11604_v1, %s12866_s29 }
 0x85c   : > { %5975 = vrot.lane.b32.xlu1 %v11609_v38, %s12866_s29  ;;  %s539_s29 = sand.u32 1, %s9660_s25  }
 0x85d   : > { %5848 = vrot.lane.b32.xlu0 %v5708_v10, %s12865_s22  ;;  %s9380_s3 = smul.u32 288, %s539_s29  ;;  %s12699_s9 = scalar_lea.sflag [#allocation3], %s539_s29 }
 0x860   : > { %5850 = vrot.lane.b32.xlu1 %v5709_v37, %s12865_s22 }
 0x861   : > { %5852 = vrot.lane.b32.xlu0 %v5710_v25, %s12865_s22 }
 0x864   : > { %5854 = vrot.lane.b32.xlu1 %v5711_v33, %s12865_s22 }
 0x865   : > { %5856 = vrot.lane.b32.xlu0 %v5712_v60, %s12865_s22 }
 0x867   : > { %v3853_v28 = vpop.permute.xlu1 %3852 }
 0x868   : > { %5858 = vrot.lane.b32.xlu1 %v5713_v15, %s12865_s22  ;;  %v3858_v21 = vpop.permute.xlu0 %3857  ;;  %v3878_v20 = vmul.f32 %v3853_v28, %v11307_v17  ;;  %v3879_v5 = vmul.f32 %v3853_v28, %v11309_v63  ;;  %v5716_v17 = vsel %vm643_vm3, 0, %v11506_v3  ;;  %v5699_v28 = vsel %vm622_vm9, 0, %v11445_v36 }
 0x869   : > { %5860 = vrot.lane.b32.xlu0 %v5714_v58, %s12865_s22  ;;  %v3880_v48 = vmul.f32 %v3858_v21, %v11314_v18  ;;  %v3881_v0 = vmul.f32 %v3858_v21, %v11316_v49  ;;  %v5701_v36 = vsel %vm622_vm9, 0, %v11461_v61  ;;  %v5704_v61 = vsel %vm621_vm10, 0, %v11490_v27 }
 0x86a   : > { %v5707_v27 = vsel %vm622_vm9, 0, %v11508_v62  ;;  %v9555_v62 = vld [vmem:[%s12747_s7 + $0x18] sm:$0xff]   ;;  %vm5999_vm3 = vcmask 654336  }
 0x86b   : > { %v3909_v6 = vpop.permute.xlu1 %3908 }
 0x86c   : > { %v3934_v52 = vadd.f32 %v3909_v6, %v3878_v20  ;;  %v3935_v14 = vadd.f32 %v3909_v6, %v3879_v5  ;;  %5862 = vrot.lane.b32.xlu1 %v5715_v22, %s12865_s22  ;;  %v3914_v55 = vpop.permute.xlu0 %3913  ;;  %v5703_v6 = vsel %vm622_vm9, 0, %v11477_v59  ;;  %v9552_v22 = vld [vmem:[%s12747_s7] sm:$0xff]   ;;  %v5706_v59 = vsel %vm621_vm10, 0, %v11506_v3  ;;  %v9554_v3 = vld [vmem:[%s12747_s7 + $0x10] sm:$0xff]  }
 0x86d   : > { %v3936_v4 = vadd.f32 %v3914_v55, %v3880_v48  ;;  %v3937_v63 = vadd.f32 %v3914_v55, %v3881_v0  ;;  %5864 = vrot.lane.b32.xlu0 %v5716_v17, %s12865_s22  ;;  %v5702_v48 = vsel %vm621_vm10, 0, %v11474_v35  ;;  %v5705_v35 = vsel %vm622_vm9, 0, %v11493_v19  ;;  %v9553_v19 = vld [vmem:[%s12747_s7 + $0x8] sm:$0xff]  }
 0x86e   : > { %v3950_v18 = vmax.f32 %v3934_v52, 0.0  ;;  %v3951_v49 = vmax.f32 %v3935_v14, 0.0 }
 0x86f   : > { %v3952_v34 = vmax.f32 %v3936_v4, 0.0  ;;  %v3953_v39 = vmax.f32 %v3937_v63, 0.0  ;;  %v3863_v47 = vpop.permute.xlu1 %3862 }
 0x870   : > { %5866 = vrot.lane.b32.xlu1 %v5717_v9, %s12865_s22  ;;  %v3868_v23 = vpop.permute.xlu0 %3867  ;;  %v3882_v10 = vmul.f32 %v3863_v47, %v11322_v56  ;;  %v3883_v37 = vmul.f32 %v3863_v47, %v11324_v8  ;;  %v5700_v56 = vsel %vm621_vm10, 0, %v11458_v54 }
 0x871   : > { %v3970_v24 = vpack.c.bf16 %v3952_v34, %v3950_v18  ;;  %5728 = vrot.lane.b32.xlu0 %v5698_v41, %s12865_s22  ;;  %v3971_v57 = vpack.c.bf16 %v3953_v39, %v3951_v49  ;;  %v3884_v25 = vmul.f32 %v3868_v23, %v11330_v11  ;;  %v3885_v2 = vmul.f32 %v3868_v23, %v11333_v29 }
 0x873   : > { %v3919_v33 = vpop.permute.xlu1 %3918  ;;  %4058 = vmatprep.subr.bf16.mxu0 %v3971_v57 }
 0x874   : > { %v3938_v15 = vadd.f32 %v3919_v33, %v3882_v10  ;;  %v3939_v51 = vadd.f32 %v3919_v33, %v3883_v37  ;;  %5730 = vrot.lane.b32.xlu1 %v5699_v28, %s12865_s22  ;;  %4059 = vmatpush1.bf16.msra.mxu0 %v3970_v24  ;;  %v3924_v21 = vpop.permute.xlu0 %3923 }
 0x875   : > { %v3940_v8 = vadd.f32 %v3924_v21, %v3884_v25  ;;  %v3941_v11 = vadd.f32 %v3924_v21, %v3885_v2  ;;  %5732 = vrot.lane.b32.xlu0 %v5700_v56, %s12865_s22  ;;  %v9556_v21 = vld [vmem:[%s12752_s12 + $0x28] sm:$0xff]  }
 0x876   : > { %v3954_v29 = vmax.f32 %v3938_v15, 0.0  ;;  %v3955_v58 = vmax.f32 %v3939_v51, 0.0 }
 0x877   : > { %v3956_v20 = vmax.f32 %v3940_v8, 0.0  ;;  %v3957_v5 = vmax.f32 %v3941_v11, 0.0 }
 0x878   : > { %5734 = vrot.lane.b32.xlu1 %v5701_v36, %s12865_s22 }
 0x879   : > { %v3972_v0 = vpack.c.bf16 %v3956_v20, %v3954_v29  ;;  %5736 = vrot.lane.b32.xlu0 %v5702_v48, %s12865_s22  ;;  %v3973_v54 = vpack.c.bf16 %v3957_v5, %v3955_v58  ;;  %v9557_v48 = vld [vmem:[%s12752_s12 + $0x30] sm:$0xff]  }
 0x87b   : > { %4060 = vmatprep.subr.bf16.mxu0 %v3973_v54 }
 0x87c   : > { %5738 = vrot.lane.b32.xlu1 %v5703_v6, %s12865_s22  ;;  %4061 = vmatpush1.bf16.msra.mxu0 %v3972_v0 }
 0x87d   : > { %5740 = vrot.lane.b32.xlu0 %v5704_v61, %s12865_s22 }
 0x87f   : > { %8422 = vmatmul.mubr.msk.bf16.vlgmr.msra.gmra.mrb[16].mxu0 %vm2433_vm6, %v9552_v22 }
 0x880   : > { %5742 = vrot.lane.b32.xlu1 %v5705_v35, %s12865_s22  ;;  %4096 = vmatprep.mubr.bf16.mxu0 %v12869_v13 }
 0x881   : > { %5744 = vrot.lane.b32.xlu0 %v5706_v59, %s12865_s22 }
 0x884   : > { %5746 = vrot.lane.b32.xlu1 %v5707_v27, %s12865_s22  ;;  %s9381_s22 = smul.u32 4608, %s12900_s28 }
 0x887   : > { %8423 = vmatmul.mubr.msk.bf16.gmra.mrb[20].mxu0 %vm2433_vm6, %v9553_v19  ;;  %v9558_v19 = vld [vmem:[%s12752_s12 + $0x38] sm:$0xff]  }
 0x888   : > { %4106 = vmatprep.mubr.bf16.mxu0 %v12869_v13 }
 0x88f   : > { %8424 = vmatmul.mubr.msk.bf16.gmra.mrb[24].mxu0 %vm2433_vm6, %v9554_v3 }
 0x890   : > { %4116 = vmatprep.mubr.bf16.mxu0 %v12869_v13 }
 0x897   : > { %8425 = vmatmul.mubr.msk.bf16.gmra.mrb[28].mxu0 %vm2433_vm6, %v9555_v62 }
 0x898   : > { %6047 = vmatprep.mubr.bf16.mxu0 %v12869_v13 }
 0x8aa   : > { %v5950_v52 = vpop.permute.xlu1 %5949 }
 0x8ab   : > { %v5954_v14 = vpop.permute.xlu0 %5953 }
 0x8ae   : > { %v5952_v55 = vpop.permute.xlu1 %5951 }
 0x8af   : > { %v5980_v17 = vsel %vm775_vm11, %v5952_v55, %v5954_v14  ;;  %v5979_v4 = vsel %vm775_vm11, %v5950_v52, %v5952_v55 }
 0x8b0   : > { %6015 = vmatprep.subr.bf16.mxu0 %v5980_v17 }
 0x8b1   : > { %6016 = vmatpush1.bf16.msra.mxu0 %v5979_v4 }
 0x8b2   : > { %v5956_v63 = vpop.permute.xlu0 %5955 }
 0x8b3   : > { %v5960_v18 = vpop.permute.xlu1 %5959 }
 0x8b6   : > { %v5958_v49 = vpop.permute.xlu0 %5957 }
 0x8b7   : > { %v5982_v34 = vsel %vm775_vm11, %v5958_v49, %v5960_v18  ;;  %v5981_v39 = vsel %vm775_vm11, %v5956_v63, %v5958_v49  ;;  %v9559_v49 = vld [vmem:[%s12752_s12 + $0x40] sm:$0xff]  }
 0x8b8   : > { %6017 = vmatprep.subr.bf16.mxu0 %v5982_v34 }
 0x8b9   : > { %6018 = vmatpush1.bf16.msra.mxu0 %v5981_v39 }
 0x8ba   : > { %v5962_v47 = vpop.permute.xlu1 %5961 }
 0x8bb   : > { %v5966_v9 = vpop.permute.xlu0 %5965 }
 0x8be   : > { %v5964_v23 = vpop.permute.xlu1 %5963 }
 0x8bf   : > { %v5984_v30 = vsel %vm775_vm11, %v5964_v23, %v5966_v9  ;;  %v5983_v41 = vsel %vm775_vm11, %v5962_v47, %v5964_v23 }
 0x8c0   : > { %6019 = vmatprep.subr.bf16.mxu0 %v5984_v30 }
 0x8c1   : > { %6020 = vmatpush1.bf16.msra.mxu0 %v5983_v41 }
 0x8c2   : > { %v5968_v24 = vpop.permute.xlu0 %5967 }
 0x8c3   : > { %v5972_v57 = vpop.permute.xlu1 %5971 }
 0x8c6   : > { %v5970_v10 = vpop.permute.xlu0 %5969 }
 0x8c7   : > { %v5986_v37 = vsel %vm775_vm11, %v5970_v10, %v5972_v57  ;;  %v5985_v25 = vsel %vm775_vm11, %v5968_v24, %v5970_v10  ;;  %v9560_v10 = vld [vmem:[%s12752_s12 + $0x48] sm:$0xff]  }
 0x8c8   : > { %6021 = vmatprep.subr.bf16.mxu0 %v5986_v37 }
 0x8c9   : > { %6022 = vmatpush1.bf16.msra.mxu0 %v5985_v25 }
 0x8ca   : > { %v5974_v2 = vpop.permute.xlu1 %5973 }
 0x8cb   : > { %v5978_v33 = vpop.permute.xlu0 %5977 }
 0x8ce   : > { %v5976_v60 = vpop.permute.xlu1 %5975 }
 0x8cf   : > { %v5849_v28 = vpop.permute.xlu0 %5848  ;;  %v5988_v15 = vsel %vm775_vm11, %v5976_v60, %v5978_v33  ;;  %v5987_v51 = vsel %vm775_vm11, %v5974_v2, %v5976_v60 }
 0x8d0   : > { %6023 = vmatprep.subr.bf16.mxu0 %v5988_v15  ;;  %v11747_v5 = vsel %vm661_vm7, 0, %v5849_v28 }
 0x8d1   : > { %6024 = vmatpush1.bf16.msra.mxu0 %v5987_v51 }
 0x8d2   : > { %v5851_v56 = vpop.permute.xlu1 %5850 }
 0x8d3   : > { %v5853_v8 = vpop.permute.xlu0 %5852  ;;  %v11735_v11 = vsel %vm661_vm7, %v5851_v56, 0  ;;  %v11738_v29 = vsel %vm661_vm7, %v5849_v28, %v5851_v56 }
 0x8d4   : > { %6271 = vrot.lane.b32.xlu1 %v11735_v11, %s12867_s26  ;;  %6269 = vrot.lane.b32.xlu0 %v11738_v29, %s12867_s26  ;;  %v11763_v22 = vsel %vm661_vm7, 0, %v5853_v8 }
 0x8d5   : > { %8615 = vmatmul.mubr.msk.bf16.vlgmr.msra.gmra.mrb[32].mxu0 %vm5999_vm3, %v9556_v21  ;;  %v9561_v21 = vld [vmem:[%s12752_s12] sm:$0xff]  }
 0x8d6   : > { %v5855_v58 = vpop.permute.xlu1 %5854  ;;  %6057 = vmatprep.mubr.bf16.mxu0 %v12869_v13 }
 0x8d7   : > { %v5857_v20 = vpop.permute.xlu0 %5856  ;;  %v11750_v36 = vsel %vm661_vm7, %v5853_v8, %v5855_v58  ;;  %v11760_v6 = vsel %vm661_vm7, %v5855_v58, 0 }
 0x8d8   : > { %6267 = vrot.lane.b32.xlu0 %v11747_v5, %s12867_s26  ;;  %6275 = vrot.lane.b32.xlu1 %v11750_v36, %s12867_s26  ;;  %v11785_v52 = vsel %vm661_vm7, 0, %v5857_v20 }
 0x8da   : > { %v5859_v0 = vpop.permute.xlu1 %5858 }
 0x8db   : > { %v5861_v54 = vpop.permute.xlu0 %5860  ;;  %v11772_v59 = vsel %vm661_vm7, %v5859_v0, 0  ;;  %v11775_v27 = vsel %vm661_vm7, %v5857_v20, %v5859_v0  ;;  %v9563_v0 = vld [vmem:[%s12752_s12 + $0x10] sm:$0xff]  }
 0x8dc   : > { %6277 = vrot.lane.b32.xlu0 %v11760_v6, %s12867_s26  ;;  %6273 = vrot.lane.b32.xlu1 %v11763_v22, %s12867_s26  ;;  %v11800_v63 = vsel %vm661_vm7, 0, %v5861_v54 }
 0x8dd   : > { %8616 = vmatmul.mubr.msk.bf16.gmra.mrb[36].mxu0 %vm5999_vm3, %v9557_v48 }
 0x8de   : > { %v5863_v61 = vpop.permute.xlu1 %5862  ;;  %6067 = vmatprep.mubr.bf16.mxu0 %v12869_v13 }
 0x8df   : > { %v5865_v35 = vpop.permute.xlu0 %5864  ;;  %v11788_v14 = vsel %vm661_vm7, %v5861_v54, %v5863_v61  ;;  %v11797_v4 = vsel %vm661_vm7, %v5863_v61, 0 }
 0x8e0   : > { %6283 = vrot.lane.b32.xlu1 %v11772_v59, %s12867_s26  ;;  %6281 = vrot.lane.b32.xlu0 %v11775_v27, %s12867_s26  ;;  %v11834_v41 = vsel %vm661_vm7, 0, %v5865_v35 }
 0x8e2   : > { %v5867_v3 = vpop.permute.xlu1 %5866 }
 0x8e3   : > { %v5729_v62 = vpop.permute.xlu0 %5728  ;;  %v11816_v47 = vsel %vm661_vm7, %v5867_v3, 0  ;;  %v11819_v9 = vsel %vm661_vm7, %v5865_v35, %v5867_v3  ;;  %v9564_v35 = vld [vmem:[%s12752_s12 + $0x18] sm:$0xff]  }
 0x8e4   : > { %6279 = vrot.lane.b32.xlu0 %v11785_v52, %s12867_s26  ;;  %6287 = vrot.lane.b32.xlu1 %v11788_v14, %s12867_s26  ;;  %v11853_v2 = vsel %vm661_vm7, 0, %v5729_v62 }
 0x8e5   : > { %8617 = vmatmul.mubr.msk.bf16.gmra.mrb[40].mxu0 %vm5999_vm3, %v9558_v19  ;;  %v9565_v19 = vld [vmem:[%s12752_s12 + $0x20] sm:$0xff]  }
 0x8e6   : > { %v5731_v55 = vpop.permute.xlu1 %5730  ;;  %6077 = vmatprep.mubr.bf16.mxu0 %v12869_v13 }
 0x8e7   : > { %v5733_v17 = vpop.permute.xlu0 %5732  ;;  %v11803_v18 = vsel %vm661_vm7, %v5729_v62, %v5731_v55  ;;  %v11850_v25 = vsel %vm661_vm7, %v5731_v55, 0 }
 0x8e8   : > { %6289 = vrot.lane.b32.xlu0 %v11797_v4, %s12867_s26  ;;  %6285 = vrot.lane.b32.xlu1 %v11800_v63, %s12867_s26  ;;  %v11884_v56 = vsel %vm661_vm7, 0, %v5733_v17 }
 0x8e9   : > { %6138 = vmatprep.subr.bf16.mxu0 %v11803_v18 }
 0x8ea   : > { %8626 = vmatpush1.bf16.msk.msra.mxu0 %vm9961_vm13, %v5729_v62  ;;  %v5735_v34 = vpop.permute.xlu1 %5734 }
 0x8eb   : > { %v5737_v39 = vpop.permute.xlu0 %5736  ;;  %v11822_v23 = vsel %vm661_vm7, %v5733_v17, %v5735_v34  ;;  %v11868_v15 = vsel %vm661_vm7, %v5735_v34, 0 }
 0x8ec   : > { %6295 = vrot.lane.b32.xlu1 %v11816_v47, %s12867_s26  ;;  %6293 = vrot.lane.b32.xlu0 %v11819_v9, %s12867_s26  ;;  %v11896_v58 = vsel %vm661_vm7, 0, %v5737_v39 }
 0x8ed   : > { %6140 = vmatprep.subr.bf16.mxu0 %v11822_v23  ;;  %8618 = vmatmul.mubr.msk.bf16.gmra.mrb[44].mxu0 %vm5999_vm3, %v9559_v49 }
 0x8ee   : > { %8628 = vmatpush1.bf16.msk.msra.mxu0 %vm9961_vm13, %v5733_v17  ;;  %v5739_v30 = vpop.permute.xlu1 %5738  ;;  %6087 = vmatprep.mubr.bf16.mxu0 %v12869_v13 }
 0x8ef   : > { %v11837_v24 = vsel %vm661_vm7, %v5737_v39, %v5739_v30  ;;  %v5741_v57 = vpop.permute.xlu0 %5740  ;;  %v11893_v8 = vsel %vm661_vm7, %v5739_v30, 0 }
 0x8f0   : > { %6291 = vrot.lane.b32.xlu0 %v11834_v41, %s12867_s26  ;;  %6483 = vrot.lane.b32.xlu1 %v11803_v18, %s12870_s20  ;;  %v11915_v48 = vsel %vm661_vm7, 0, %v5741_v57 }
 0x8f1   : > { %6142 = vmatprep.subr.bf16.mxu0 %v11837_v24 }
 0x8f2   : > { %8630 = vmatpush1.bf16.msk.msra.mxu0 %vm9961_vm13, %v5737_v39  ;;  %v5743_v37 = vpop.permute.xlu1 %5742 }
 0x8f3   : > { %v11856_v33 = vsel %vm661_vm7, %v5741_v57, %v5743_v37  ;;  %v5745_v60 = vpop.permute.xlu0 %5744  ;;  %v11906_v20 = vsel %vm661_vm7, %v5743_v37, 0 }
 0x8f4   : > { %6485 = vrot.lane.b32.xlu0 %v11850_v25, %s12870_s20  ;;  %6481 = vrot.lane.b32.xlu1 %v11853_v2, %s12870_s20  ;;  %v11928_v61 = vsel %vm661_vm7, 0, %v5745_v60 }
 0x8f5   : > { %6144 = vmatprep.subr.bf16.mxu0 %v11856_v33  ;;  %8619 = vmatmul.mubr.msk.bf16.gmra.mrb[48].mxu0 %vm5999_vm3, %v9560_v10 }
 0x8f6   : > { %8632 = vmatpush1.bf16.msk.msra.mxu0 %vm9961_vm13, %v5741_v57  ;;  %v5747_v28 = vpop.permute.xlu1 %5746  ;;  %6170 = vmatprep.mubr.bf16.mxu0 %v12869_v13 }
 0x8f7   : > { %v11871_v51 = vsel %vm661_vm7, %v5745_v60, %v5747_v28  ;;  %v11925_v54 = vsel %vm661_vm7, %v5747_v28, 0 }
 0x8f8   : > { %6491 = vrot.lane.b32.xlu1 %v11868_v15, %s12870_s20  ;;  %6489 = vrot.lane.b32.xlu0 %v11822_v23, %s12870_s20 }
 0x8f9   : > { %6146 = vmatprep.subr.bf16.mxu0 %v11871_v51 }
 0x8fa   : > { %8634 = vmatpush1.bf16.msk.msra.mxu0 %vm9961_vm13, %v5745_v60 }
 0x8fc   : > { %6487 = vrot.lane.b32.xlu0 %v11884_v56, %s12870_s20  ;;  %6495 = vrot.lane.b32.xlu1 %v11837_v24, %s12870_s20 }
 0x8fd   : > { %8635 = vmatmul.mubr.msk.bf16.vlgmr.msra.gmra.mrb[32].mxu0 %vm5999_vm3, %v9561_v21 }
 0x8fe   : > { %6180 = vmatprep.mubr.bf16.mxu0 %v12869_v13 }
 0x900   : > { %6497 = vrot.lane.b32.xlu0 %v11893_v8, %s12870_s20  ;;  %6493 = vrot.lane.b32.xlu1 %v11896_v58, %s12870_s20 }
 0x904   : > { %6503 = vrot.lane.b32.xlu1 %v11906_v20, %s12870_s20  ;;  %6501 = vrot.lane.b32.xlu0 %v11856_v33, %s12870_s20 }
 0x905   : > { %8636 = vmatmul.mubr.msk.bf16.gmra.mrb[36].mxu0 %vm5999_vm3, %v9562_v7 }
 0x906   : > { %6190 = vmatprep.mubr.bf16.mxu0 %v12869_v13 }
 0x908   : > { %6499 = vrot.lane.b32.xlu0 %v11915_v48, %s12870_s20  ;;  %6507 = vrot.lane.b32.xlu1 %v11871_v51, %s12870_s20 }
 0x90c   : > { %6509 = vrot.lane.b32.xlu0 %v11925_v54, %s12870_s20  ;;  %6505 = vrot.lane.b32.xlu1 %v11928_v61, %s12870_s20  ;;  %s12690_s20 = scalar_lea.hbm %s12902_s4, %s9381_s22 }
 0x90d   : > { %8637 = vmatmul.mubr.msk.bf16.gmra.mrb[40].mxu0 %vm5999_vm3, %v9563_v0 }
 0x90e   : > { %6200 = vmatprep.mubr.bf16.mxu0 %v12869_v13 }
 0x910   : > { %6687 = vrot.lane.b32.xlu0 %v11549_v31, %s12871_s19  ;;  %6689 = vrot.lane.b32.xlu1 %v11544_v26, %s12871_s19 }
 0x914   : > { %6685 = vrot.lane.b32.xlu0 %v11539_v12, %s12871_s19  ;;  %6693 = vrot.lane.b32.xlu1 %v11564_v42, %s12871_s19 }
 0x915   : > { %8638 = vmatmul.mubr.msk.bf16.gmra.mrb[44].mxu0 %vm5999_vm3, %v9564_v35 }
 0x916   : > { %6210 = vmatprep.mubr.bf16.mxu0 %v12869_v13 }
 0x918   : > { %6695 = vrot.lane.b32.xlu0 %v11559_v50, %s12871_s19  ;;  %6691 = vrot.lane.b32.xlu1 %v11554_v53, %s12871_s19 }
 0x91c   : > { %6699 = vrot.lane.b32.xlu0 %v11579_v40, %s12871_s19  ;;  %6701 = vrot.lane.b32.xlu1 %v11574_v45, %s12871_s19 }
 0x91d   : > { %8639 = vmatmul.mubr.msk.bf16.gmra.mrb[48].mxu0 %vm5999_vm3, %v9565_v19 }
 0x91e   : > { %6364 = vmatprep.mubr.bf16.mxu0 %v12869_v13 }
 0x920   : > { %6697 = vrot.lane.b32.xlu0 %v11569_v46, %s12871_s19  ;;  %6705 = vrot.lane.b32.xlu1 %v11594_v44, %s12871_s19 }
 0x924   : > { %6707 = vrot.lane.b32.xlu0 %v11589_v16, %s12871_s19  ;;  %6703 = vrot.lane.b32.xlu1 %v11584_v32, %s12871_s19 }
 0x928   : > { %6711 = vrot.lane.b32.xlu0 %v11609_v38, %s12871_s19  ;;  %6713 = vrot.lane.b32.xlu1 %v11604_v1, %s12871_s19 }
 0x92c   : > { %6709 = vrot.lane.b32.xlu0 %v11599_v43, %s12871_s19  ;;  %6891 = vrot.lane.b32.xlu1 %v11738_v29, %s12872_s0 }
 0x930   : > { %6893 = vrot.lane.b32.xlu0 %v11735_v11, %s12872_s0  ;;  %6889 = vrot.lane.b32.xlu1 %v11747_v5, %s12872_s0 }
 0x934   : > { %6897 = vrot.lane.b32.xlu0 %v11750_v36, %s12872_s0  ;;  %6899 = vrot.lane.b32.xlu1 %v11760_v6, %s12872_s0 }
 0x938   : > { %6895 = vrot.lane.b32.xlu0 %v11763_v22, %s12872_s0  ;;  %6903 = vrot.lane.b32.xlu1 %v11775_v27, %s12872_s0 }
 0x93c   : > { %6905 = vrot.lane.b32.xlu0 %v11772_v59, %s12872_s0  ;;  %6901 = vrot.lane.b32.xlu1 %v11785_v52, %s12872_s0 }
 0x940   : > { %6909 = vrot.lane.b32.xlu0 %v11788_v14, %s12872_s0  ;;  %6911 = vrot.lane.b32.xlu1 %v11797_v4, %s12872_s0 }
 0x944   : > { %6907 = vrot.lane.b32.xlu0 %v11800_v63, %s12872_s0  ;;  %6915 = vrot.lane.b32.xlu1 %v11819_v9, %s12872_s0 }
 0x946   : > { %v6272_v3 = vpop.permute.xlu1 %6271  ;;  %v6270_v62 = vpop.permute.xlu0 %6269 }
 0x947   : > { %v6298_v55 = vsel %vm1020_vm14, %v6270_v62, %v6272_v3 }
 0x948   : > { %6917 = vrot.lane.b32.xlu0 %v11816_v47, %s12872_s0  ;;  %6913 = vrot.lane.b32.xlu1 %v11834_v41, %s12872_s0  ;;  %s9680_s0 = smov [#allocation2]  }
 0x949   : > { %6332 = vmatprep.subr.bf16.mxu0 %v6298_v55 }
 0x94a   : > { %v6276_v17 = vpop.permute.xlu1 %6275  ;;  %v6268_v49 = vpop.permute.xlu0 %6267 }
 0x94b   : > { %v6297_v34 = vsel %vm1020_vm14, %v6268_v49, %v6270_v62 }
 0x94c   : > { %7095 = vrot.lane.b32.xlu0 %v11803_v18, %s12873_s18  ;;  %7097 = vrot.lane.b32.xlu1 %v11850_v25, %s12873_s18 }
 0x94d   : > { %6333 = vmatpush1.bf16.msra.mxu0 %v6297_v34 }
 0x94e   : > { %v6274_v39 = vpop.permute.xlu1 %6273  ;;  %v6278_v30 = vpop.permute.xlu0 %6277 }
 0x94f   : > { %v6299_v57 = vsel %vm1020_vm14, %v6274_v39, %v6276_v17  ;;  %v6300_v10 = vsel %vm1020_vm14, %v6276_v17, %v6278_v30 }
 0x950   : > { %7093 = vrot.lane.b32.xlu0 %v11853_v2, %s12873_s18  ;;  %7101 = vrot.lane.b32.xlu1 %v11822_v23, %s12873_s18 }
 0x951   : > { %6334 = vmatprep.subr.bf16.mxu0 %v6300_v10 }
 0x952   : > { %6335 = vmatpush1.bf16.msra.mxu0 %v6299_v57  ;;  %v6284_v37 = vpop.permute.xlu1 %6283  ;;  %v6282_v18 = vpop.permute.xlu0 %6281 }
 0x953   : > { %v6302_v60 = vsel %vm1020_vm14, %v6282_v18, %v6284_v37  ;;  %v12019_v25 = vpop.f32.mrb[16].mxu0 }
 0x954   : > { %7103 = vrot.lane.b32.xlu0 %v11868_v15, %s12873_s18  ;;  %7099 = vrot.lane.b32.xlu1 %v11884_v56, %s12873_s18  ;;  %v12025_v28 = vpop.f32.mrb[17].mxu0 }
 0x955   : > { %6336 = vmatprep.subr.bf16.mxu0 %v6302_v60  ;;  %v12027_v2 = vpop.f32.mrb[18].mxu0 }
 0x956   : > { %v6288_v23 = vpop.permute.xlu1 %6287  ;;  %v6280_v21 = vpop.permute.xlu0 %6279 }
 0x957   : > { %v6301_v7 = vsel %vm1020_vm14, %v6280_v21, %v6282_v18  ;;  %v12030_v0 = vpop.f32.mrb[19].mxu0 }
 0x958   : > { %7107 = vrot.lane.b32.xlu0 %v11837_v24, %s12873_s18  ;;  %7109 = vrot.lane.b32.xlu1 %v11893_v8, %s12873_s18 }
 0x959   : > { %6337 = vmatpush1.bf16.msra.mxu0 %v6301_v7 }
 0x95a   : > { %v6286_v15 = vpop.permute.xlu1 %6285  ;;  %v6290_v56 = vpop.permute.xlu0 %6289 }
 0x95b   : > { %v6303_v35 = vsel %vm1020_vm14, %v6286_v15, %v6288_v23  ;;  %v6304_v19 = vsel %vm1020_vm14, %v6288_v23, %v6290_v56  ;;  %v12038_v3 = vpop.f32.mrb[20].mxu0 }
 0x95c   : > { %7105 = vrot.lane.b32.xlu0 %v11896_v58, %s12873_s18  ;;  %7113 = vrot.lane.b32.xlu1 %v11856_v33, %s12873_s18  ;;  %v12044_v62 = vpop.f32.mrb[21].mxu0 }
 0x95d   : > { %6338 = vmatprep.subr.bf16.mxu0 %v6304_v19  ;;  %v12046_v24 = vpop.f32.mrb[22].mxu0 }
 0x95e   : > { %6339 = vmatpush1.bf16.msra.mxu0 %v6303_v35  ;;  %v6296_v8 = vpop.permute.xlu1 %6295  ;;  %v6294_v55 = vpop.permute.xlu0 %6293 }
 0x95f   : > { %v6306_v17 = vsel %vm1020_vm14, %v6294_v55, %v6296_v8  ;;  %v12049_v49 = vpop.f32.mrb[23].mxu0 }
 0x960   : > { %7115 = vrot.lane.b32.xlu0 %v11906_v20, %s12873_s18  ;;  %7111 = vrot.lane.b32.xlu1 %v11915_v48, %s12873_s18  ;;  %v9566_v20 = vld [vmem:[%s12752_s12 + $0x50] sm:$0xff]  }
 0x961   : > { %6340 = vmatprep.subr.bf16.mxu0 %v6306_v17 }
 0x962   : > { %v6484_v33 = vpop.permute.xlu1 %6483  ;;  %v6292_v58 = vpop.permute.xlu0 %6291 }
 0x963   : > { %v6305_v34 = vsel %vm1020_vm14, %v6292_v58, %v6294_v55  ;;  %v12056_v39 = vpop.f32.mrb[24].mxu0 }
 0x964   : > { %7119 = vrot.lane.b32.xlu0 %v11871_v51, %s12873_s18  ;;  %7121 = vrot.lane.b32.xlu1 %v11925_v54, %s12873_s18  ;;  %v12065_v30 = vpop.f32.mrb[25].mxu0 }
 0x965   : > { %6341 = vmatpush1.bf16.msra.mxu0 %v6305_v34  ;;  %v12067_v48 = vpop.f32.mrb[26].mxu0  ;;  %v9569_v34 = vld [vmem:[%s12752_s12 + $0x68] sm:$0xff]  }
 0x966   : > { %v6482_v57 = vpop.permute.xlu1 %6481  ;;  %v6486_v10 = vpop.permute.xlu0 %6485 }
 0x967   : > { %v6511_v37 = vsel %vm1175_vm15, %v6482_v57, %v6484_v33  ;;  %v6512_v18 = vsel %vm1175_vm15, %v6484_v33, %v6486_v10  ;;  %v12071_v60 = vpop.f32.mrb[27].mxu0 }
 0x968   : > { %8655 = vmatmul.mubr.msk.bf16.vlgmr.msra.gmra.mrb[32].mxu0 %vm5999_vm3, %v9566_v20  ;;  %7117 = vrot.lane.b32.xlu0 %v11928_v61, %s12873_s18  ;;  %v9567_v61 = vld [vmem:[%s12752_s12 + $0x58] sm:$0xff]  }
 0x969   : > { %7299 = vrot.lane.b32.xlu1 %v11549_v31, %s12874_s23  ;;  %6546 = vmatprep.subr.bf16.mxu0 %v6512_v18 }
 0x96a   : > { %6547 = vmatpush1.bf16.msra.mxu0 %v6511_v37  ;;  %v6492_v51 = vpop.permute.xlu1 %6491  ;;  %v6490_v54 = vpop.permute.xlu0 %6489  ;;  %6374 = vmatprep.mubr.bf16.mxu0 %v12869_v13  ;;  %v9570_v37 = vld [vmem:[%s12752_s12 + $0x70] sm:$0xff]  }
 0x96b   : > { %v6514_v23 = vsel %vm1175_vm15, %v6490_v54, %v6492_v51  ;;  %v12080_v21 = vpop.f32.mrb[28].mxu0 }
 0x96c   : > { %7301 = vrot.lane.b32.xlu0 %v11544_v26, %s12874_s23  ;;  %6548 = vmatprep.subr.bf16.mxu0 %v6514_v23  ;;  %v12087_v7 = vpop.f32.mrb[29].mxu0 }
 0x96d   : > { %7297 = vrot.lane.b32.xlu1 %v11539_v12, %s12874_s23  ;;  %v12091_v31 = vpop.f32.mrb[30].mxu0 }
 0x96e   : > { %v6496_v15 = vpop.permute.xlu1 %6495  ;;  %v6488_v56 = vpop.permute.xlu0 %6487 }
 0x96f   : > { %v6513_v35 = vsel %vm1175_vm15, %v6488_v56, %v6490_v54  ;;  %v12094_v19 = vpop.f32.mrb[31].mxu0 }
 0x970   : > { %8656 = vmatmul.mubr.msk.bf16.gmra.mrb[36].mxu0 %vm5999_vm3, %v9567_v61  ;;  %7305 = vrot.lane.b32.xlu0 %v11564_v42, %s12874_s23  ;;  %v9568_v42 = vld [vmem:[%s12752_s12 + $0x60] sm:$0xff]  }
 0x971   : > { %7307 = vrot.lane.b32.xlu1 %v11559_v50, %s12874_s23  ;;  %6549 = vmatpush1.bf16.msra.mxu0 %v6513_v35 }
 0x972   : > { %v6494_v26 = vpop.permute.xlu1 %6493  ;;  %v6498_v8 = vpop.permute.xlu0 %6497  ;;  %6384 = vmatprep.mubr.bf16.mxu0 %v12869_v13 }
 0x973   : > { %v6515_v12 = vsel %vm1175_vm15, %v6494_v26, %v6496_v15  ;;  %v6516_v55 = vsel %vm1175_vm15, %v6496_v15, %v6498_v8 }
 0x974   : > { %7303 = vrot.lane.b32.xlu0 %v11554_v53, %s12874_s23  ;;  %6550 = vmatprep.subr.bf16.mxu0 %v6516_v55 }
 0x975   : > { %7311 = vrot.lane.b32.xlu1 %v11579_v40, %s12874_s23  ;;  %6551 = vmatpush1.bf16.msra.mxu0 %v6515_v12 }
 0x976   : > { %v6504_v50 = vpop.permute.xlu1 %6503  ;;  %v6502_v17 = vpop.permute.xlu0 %6501 }
 0x977   : > { %v6518_v33 = vsel %vm1175_vm15, %v6502_v17, %v6504_v50 }
 0x978   : > { %8657 = vmatmul.mubr.msk.bf16.gmra.mrb[40].mxu0 %vm5999_vm3, %v9568_v42  ;;  %7313 = vrot.lane.b32.xlu0 %v11574_v45, %s12874_s23 }
 0x979   : > { %7309 = vrot.lane.b32.xlu1 %v11569_v46, %s12874_s23  ;;  %6552 = vmatprep.subr.bf16.mxu0 %v6518_v33 }
 0x97a   : > { %v6508_v53 = vpop.permute.xlu1 %6507  ;;  %v6500_v58 = vpop.permute.xlu0 %6499  ;;  %6394 = vmatprep.mubr.bf16.mxu0 %v12869_v13 }
 0x97b   : > { %v6517_v40 = vsel %vm1175_vm15, %v6500_v58, %v6502_v17 }
 0x97c   : > { %7317 = vrot.lane.b32.xlu0 %v11594_v44, %s12874_s23  ;;  %6553 = vmatpush1.bf16.msra.mxu0 %v6517_v40 }
 0x97d   : > { %7319 = vrot.lane.b32.xlu1 %v11589_v16, %s12874_s23 }
 0x97e   : > { %v6506_v45 = vpop.permute.xlu1 %6505  ;;  %v6510_v46 = vpop.permute.xlu0 %6509 }
 0x97f   : > { %v6519_v20 = vsel %vm1175_vm15, %v6506_v45, %v6508_v53  ;;  %v6520_v57 = vsel %vm1175_vm15, %v6508_v53, %v6510_v46  ;;  %v5688_v53 = vld [vmem:[%s12754_s14] sm:$0xff]  ;;  %v9575_v45 = vld [vmem:[%s12752_s12 + $0x98] sm:$0xff]  }
 0x980   : > { %8658 = vmatmul.mubr.msk.bf16.gmra.mrb[44].mxu0 %vm5999_vm3, %v9569_v34  ;;  %7315 = vrot.lane.b32.xlu0 %v11584_v32, %s12874_s23  ;;  %v5680_v34 = vld [vmem:[%s12753_s13 + $0x10] sm:$0xff]  ;;  %v5681_v46 = vld [vmem:[%s12753_s13 + $0x18] sm:$0xff] }
 0x981   : > { %7323 = vrot.lane.b32.xlu1 %v11609_v38, %s12874_s23  ;;  %6554 = vmatprep.subr.bf16.mxu0 %v6520_v57 }
 0x982   : > { %6555 = vmatpush1.bf16.msra.mxu0 %v6519_v20  ;;  %v6690_v44 = vpop.permute.xlu1 %6689  ;;  %v6688_v10 = vpop.permute.xlu0 %6687  ;;  %6404 = vmatprep.mubr.bf16.mxu0 %v12869_v13 }
 0x983   : > { %v6716_v16 = vsel %vm1326_vm0, %v6688_v10, %v6690_v44  ;;  %v5690_v44 = vld [vmem:[%s12754_s14 + $0x10] sm:$0xff] }
 0x984   : > { %7325 = vrot.lane.b32.xlu0 %v11604_v1, %s12874_s23  ;;  %6750 = vmatprep.subr.bf16.mxu0 %v6716_v16 }
 0x985   : > { %7321 = vrot.lane.b32.xlu1 %v11599_v43, %s12874_s23  ;;  %v9571_v43 = vld [vmem:[%s12752_s12 + $0x78] sm:$0xff]  }
 0x986   : > { %v6694_v32 = vpop.permute.xlu1 %6693  ;;  %v6686_v38 = vpop.permute.xlu0 %6685 }
 0x988   : > { %8659 = vmatmul.mubr.msk.bf16.gmra.mrb[48].mxu0 %vm5999_vm3, %v9570_v37  ;;  %7503 = vrot.lane.b32.xlu0 %v11738_v29, %s12875_s24  ;;  %v6715_v29 = vsel %vm1326_vm0, %v6686_v38, %v6688_v10  ;;  %v5691_v10 = vld [vmem:[%s12754_s14 + $0x18] sm:$0xff]  ;;  %v9576_v38 = vld [vmem:[%s12752_s12 + $0xa0] sm:$0xff]  }
 0x989   : > { %7505 = vrot.lane.b32.xlu1 %v11735_v11, %s12875_s24  ;;  %6578 = vmatprep.mubr.bf16.mxu0 %v12869_v13 }
 0x98a   : > { %v6692_v1 = vpop.permute.xlu1 %6691  ;;  %v6696_v18 = vpop.permute.xlu0 %6695 }
 0x98b   : > { %v6718_v11 = vsel %vm1326_vm0, %v6694_v32, %v6696_v18 }
 0x98c   : > { %7501 = vrot.lane.b32.xlu0 %v11747_v5, %s12875_s24 }
 0x98d   : > { %7509 = vrot.lane.b32.xlu1 %v11750_v36, %s12875_s24  ;;  %v6717_v36 = vsel %vm1326_vm0, %v6692_v1, %v6694_v32  ;;  %v5682_v32 = vld [vmem:[%s12753_s13 + $0x20] sm:$0xff]  ;;  %v5683_v1 = vld [vmem:[%s12753_s13 + $0x28] sm:$0xff] }
 0x98e   : > { %v6702_v51 = vpop.permute.xlu1 %6701  ;;  %v6700_v54 = vpop.permute.xlu0 %6699 }
 0x990   : > { %8675 = vmatmul.mubr.msk.bf16.vlgmr.msra.gmra.mrb[32].mxu0 %vm5999_vm3, %v9571_v43  ;;  %7511 = vrot.lane.b32.xlu0 %v11760_v6, %s12875_s24  ;;  %v9572_v6 = vld [vmem:[%s12752_s12 + $0x80] sm:$0xff]  }
 0x991   : > { %6751 = vmatpush1.bf16.msra.mxu0 %v6715_v29  ;;  %7507 = vrot.lane.b32.xlu1 %v11763_v22, %s12875_s24  ;;  %v6720_v22 = vsel %vm1326_vm0, %v6700_v54, %v6702_v51  ;;  %v5692_v51 = vld [vmem:[%s12754_s14 + $0x20] sm:$0xff] }
 0x992   : > { %6752 = vmatprep.subr.bf16.mxu0 %v6718_v11  ;;  %v6706_v5 = vpop.permute.xlu1 %6705  ;;  %v6698_v23 = vpop.permute.xlu0 %6697  ;;  %6588 = vmatprep.mubr.bf16.mxu0 %v12869_v13  ;;  %v5693_v11 = vld [vmem:[%s12754_s14 + $0x28] sm:$0xff] }
 0x993   : > { %v6719_v35 = vsel %vm1326_vm0, %v6698_v23, %v6700_v54 }
 0x994   : > { %7515 = vrot.lane.b32.xlu0 %v11775_v27, %s12875_s24 }
 0x995   : > { %6753 = vmatpush1.bf16.msra.mxu0 %v6717_v36  ;;  %7517 = vrot.lane.b32.xlu1 %v11772_v59, %s12875_s24  ;;  %v5684_v36 = vld [vmem:[%s12753_s13 + $0x30] sm:$0xff] }
 0x996   : > { %6754 = vmatprep.subr.bf16.mxu0 %v6720_v22  ;;  %v6704_v61 = vpop.permute.xlu1 %6703  ;;  %v6708_v15 = vpop.permute.xlu0 %6707  ;;  %v9577_v22 = vld [vmem:[%s12752_s12 + $0xa8] sm:$0xff]  }
 0x997   : > { %v6722_v56 = vsel %vm1326_vm0, %v6706_v5, %v6708_v15  ;;  %v6721_v8 = vsel %vm1326_vm0, %v6704_v61, %v6706_v5  ;;  %v5685_v15 = vld [vmem:[%s12753_s13 + $0x38] sm:$0xff] }
 0x998   : > { %8676 = vmatmul.mubr.msk.bf16.gmra.mrb[36].mxu0 %vm5999_vm3, %v9572_v6  ;;  %7513 = vrot.lane.b32.xlu0 %v11785_v52, %s12875_s24  ;;  %v9573_v52 = vld [vmem:[%s12752_s12 + $0x88] sm:$0xff]  }
 0x999   : > { %6755 = vmatpush1.bf16.msra.mxu0 %v6719_v35  ;;  %7521 = vrot.lane.b32.xlu1 %v11788_v14, %s12875_s24 }
 0x99a   : > { %6756 = vmatprep.subr.bf16.mxu0 %v6722_v56  ;;  %v6714_v59 = vpop.permute.xlu1 %6713  ;;  %v6712_v27 = vpop.permute.xlu0 %6711  ;;  %6598 = vmatprep.mubr.bf16.mxu0 %v12869_v13 }
 0x99b   : > { %v6724_v26 = vsel %vm1326_vm0, %v6712_v27, %v6714_v59  ;;  %v5694_v59 = vld [vmem:[%s12754_s14 + $0x30] sm:$0xff] }
 0x99c   : > { %7523 = vrot.lane.b32.xlu0 %v11797_v4, %s12875_s24 }
 0x99d   : > { %6757 = vmatpush1.bf16.msra.mxu0 %v6721_v8  ;;  %7519 = vrot.lane.b32.xlu1 %v11800_v63, %s12875_s24  ;;  %v5678_v63 = vld [vmem:[%s12753_s13] sm:$0xff]  ;;  %v5695_v8 = vld [vmem:[%s12754_s14 + $0x38] sm:$0xff] }
 0x99e   : > { %6758 = vmatprep.subr.bf16.mxu0 %v6724_v26  ;;  %v6892_v14 = vpop.permute.xlu1 %6891  ;;  %v6710_v12 = vpop.permute.xlu0 %6709 }
 0x99f   : > { %v6723_v55 = vsel %vm1326_vm0, %v6710_v12, %v6712_v27  ;;  %v5686_v12 = vld [vmem:[%s12753_s13 + $0x40] sm:$0xff] }
 0x9a0   : > { %8677 = vmatmul.mubr.msk.bf16.gmra.mrb[40].mxu0 %vm5999_vm3, %v9573_v52  ;;  %7527 = vrot.lane.b32.xlu0 %v11819_v9, %s12875_s24  ;;  %v9574_v9 = vld [vmem:[%s12752_s12 + $0x90] sm:$0xff]  }
 0x9a1   : > { %7529 = vrot.lane.b32.xlu1 %v11816_v47, %s12875_s24  ;;  %6759 = vmatpush1.bf16.msra.mxu0 %v6723_v55  ;;  %v5679_v47 = vld [vmem:[%s12753_s13 + $0x8] sm:$0xff] }
 0x9a2   : > { %v6890_v4 = vpop.permute.xlu1 %6889  ;;  %v6894_v42 = vpop.permute.xlu0 %6893  ;;  %6608 = vmatprep.mubr.bf16.mxu0 %v12869_v13 }
 0x9a3   : > { %v6920_v50 = vsel %vm1477_vm1, %v6892_v14, %v6894_v42  ;;  %v6919_v54 = vsel %vm1477_vm1, %v6890_v4, %v6892_v14  ;;  %v9578_v4 = vld [vmem:[%s12752_s12 + $0xb0] sm:$0xff]  }
 0x9a4   : > { %7525 = vrot.lane.b32.xlu0 %v11834_v41, %s12875_s24  ;;  %6954 = vmatprep.subr.bf16.mxu0 %v6920_v50  ;;  %v5689_v41 = vld [vmem:[%s12754_s14 + $0x8] sm:$0xff]  ;;  %s12546_s24 = scalar_lea.vmem [#allocation2], %s9380_s3  ;;  %s9610_s3 = sshll.u32 %s9680_s0, 4  ;;  %s9611_s3 = int_to_ptr.vmem [resolvable:$false] %s9610_s3 }
 0x9a5   : > { %7671 = vperm.xlu1 %9434, %v5678_v63   ;;  %v5687_v63 = vld [vmem:[%s12753_s13 + $0x48] sm:$0xff]  ;;  %s8066_s1 = sshll.u32 %s12546_s24, 4  ;;  %s9612_s18 = scalar_lea.vmem %s9611_s3, 9216  ;;  %s12692_s1 = int_to_ptr.vmem [resolvable:$true] %s8066_s1 }
 0x9a6   : > { %v6900_v17 = vpop.permute.xlu1 %6899  ;;  %v6898_v33 = vpop.permute.xlu0 %6897  ;;  %s9606_s19 = scalar_lea.vmem %s12692_s1, 4608  ;;  %p9613_p0 = scmp.lt.s32.totalorder %s12692_s1, %s9611_s3 }
 0x9a7   : > { %v6922_v29 = vsel %vm1477_vm1, %v6898_v33, %v6900_v17  ;;  %p9607_p11 = scmp.ne.s32.totalorder %s12692_s1, %s9606_s19  ;;  %p9614_p1 = scmp.lt.s32.totalorder %s9612_s18, %s9606_s19 }
 0x9a8   : > { %8678 = vmatmul.mubr.msk.bf16.gmra.mrb[44].mxu0 %vm5999_vm3, %v9574_v9  ;;  %7676 = vperm.xlu0 %9433, %v5679_v47   ;;  %v5696_v47 = vld [vmem:[%s12754_s14 + $0x40] sm:$0xff] }
 0x9a9   : > { %7741 = vperm.xlu1 %9434, %v5688_v53   ;;  %6618 = vmatprep.mubr.bf16.mxu0 %v12869_v13  ;;  %v5697_v53 = vld [vmem:[%s12754_s14 + $0x48] sm:$0xff]  ;;  %p9608_p12 = pnand %p9607_p11, %p9811_p5  ;;  %p9615_p2 = por %p9614_p1, %p9613_p0 }
 0x9aa   : > { %v6904_v58 = vpop.permute.xlu1 %6903  ;;  %v6896_v40 = vpop.permute.xlu0 %6895 }
 0x9ab   : > { %v6921_v6 = vsel %vm1477_vm1, %v6896_v40, %v6898_v33  ;;  %v3974_v40 = vld [vmem:[%s12748_s8] sm:$0xff]  ;;  %p9609_p13 = pneg %p9608_p12 }
 0x9ac   : > { %7746 = vperm.xlu0 %9433, %v5689_v41  }
 0x9ad   : > { %7681 = vperm.xlu1 %9434, %v5680_v34   ;;  %v9579_v34 = vld [vmem:[%s12752_s12 + $0xb8] sm:$0xff]   ;;  %p9616_p3 = pnand %p9615_p2, %p9609_p13 }
 0x9ae   : > { %v6902_v20 = vpop.permute.xlu1 %6901  ;;  %v6906_v57 = vpop.permute.xlu0 %6905 }
 0x9af   : > { %v6924_v61 = vsel %vm1477_vm1, %v6904_v58, %v6906_v57  ;;  %v6923_v27 = vsel %vm1477_vm1, %v6902_v20, %v6904_v58  ;;  %v3976_v57 = vld [vmem:[%s12748_s8 + $0x10] sm:$0xff] }
 0x9b0   : > { %8679 = vmatmul.mubr.msk.bf16.gmra.mrb[48].mxu0 %vm5999_vm3, %v9575_v45  ;;  %7686 = vperm.xlu0 %9433, %v5681_v46   ;;  %v3975_v45 = vld [vmem:[%s12748_s8 + $0x8] sm:$0xff] }
 0x9b1   : > { %7751 = vperm.xlu1 %9434, %v5690_v44   ;;  %6782 = vmatprep.mubr.bf16.mxu0 %v12869_v13  ;;  %v3977_v44 = vld [vmem:[%s12748_s8 + $0x18] sm:$0xff] }
 0x9b2   : > { %v6912_v16 = vpop.permute.xlu1 %6911  ;;  %v6910_v37 = vpop.permute.xlu0 %6909 }
 0x9b3   : > { %v6926_v26 = vsel %vm1477_vm1, %v6910_v37, %v6912_v16 }
 0x9b4   : > { %7756 = vperm.xlu0 %9433, %v5691_v10  }
 0x9b5   : > { %7691 = vperm.xlu1 %9434, %v5682_v32   ;;  %v9580_v32 = vld [vmem:[%s12752_s12 + $0xc0] sm:$0xff]  }
 0x9b6   : > { %v6916_v18 = vpop.permute.xlu1 %6915  ;;  %v6908_v43 = vpop.permute.xlu0 %6907 }
 0x9b7   : > { %v6925_v55 = vsel %vm1477_vm1, %v6908_v43, %v6910_v37  ;;  %v3978_v37 = vld [vmem:[%s12748_s8 + $0x20] sm:$0xff]  ;;  %v3980_v43 = vld [vmem:[%s12748_s8 + $0x30] sm:$0xff] }
 0x9b8   : > { %8695 = vmatmul.mubr.msk.bf16.vlgmr.msra.gmra.mrb[32].mxu0 %vm5999_vm3, %v9576_v38  ;;  %7696 = vperm.xlu0 %9433, %v5683_v1   ;;  %v3979_v38 = vld [vmem:[%s12748_s8 + $0x28] sm:$0xff] }
 0x9b9   : > { %6955 = vmatpush1.bf16.msra.mxu0 %v6919_v54  ;;  %7761 = vperm.xlu1 %9434, %v5692_v51   ;;  %v3981_v51 = vld [vmem:[%s12748_s8 + $0x38] sm:$0xff] }
 0x9ba   : > { %6956 = vmatprep.subr.bf16.mxu0 %v6922_v29  ;;  %v6914_v5 = vpop.permute.xlu1 %6913  ;;  %v6918_v23 = vpop.permute.xlu0 %6917  ;;  %6792 = vmatprep.mubr.bf16.mxu0 %v12869_v13  ;;  %v7849_v29 = vld [vmem:[%s12756_s16] sm:$0xff] }
 0x9bb   : > { %v6928_v42 = vsel %vm1477_vm1, %v6916_v18, %v6918_v23  ;;  %v6927_v17 = vsel %vm1477_vm1, %v6914_v5, %v6916_v18  ;;  %v9581_v5 = vld [vmem:[%s12752_s12 + $0xc8] sm:$0xff]  }
 0x9bc   : > { %7766 = vperm.xlu0 %9433, %v5693_v11   ;;  %v7850_v23 = vld [vmem:[%s12756_s16 + $0x8] sm:$0xff] }
 0x9bd   : > { %6957 = vmatpush1.bf16.msra.mxu0 %v6921_v6  ;;  %7701 = vperm.xlu1 %9434, %v5684_v36   ;;  %v7851_v6 = vld [vmem:[%s12756_s16 + $0x10] sm:$0xff] }
 0x9be   : > { %6958 = vmatprep.subr.bf16.mxu0 %v6924_v61  ;;  %v7098_v56 = vpop.permute.xlu1 %7097  ;;  %v12263_v35 = vpop.permute.xlu0 %7095 }
 0x9bf   : > { %v7124_v33 = vsel %vm1628_vm2, %v12263_v35, %v7098_v56  ;;  %v7852_v56 = vld [vmem:[%s12756_s16 + $0x18] sm:$0xff] }
 0x9c0   : > { %8696 = vmatmul.mubr.msk.bf16.gmra.mrb[36].mxu0 %vm5999_vm3, %v9577_v22  ;;  %7706 = vperm.xlu0 %9433, %v5685_v15  }
 0x9c1   : > { %6959 = vmatpush1.bf16.msra.mxu0 %v6923_v27  ;;  %7771 = vperm.xlu1 %9434, %v5694_v59   ;;  %v7853_v27 = vld [vmem:[%s12756_s16 + $0x20] sm:$0xff] }
 0x9c2   : > { %6960 = vmatprep.subr.bf16.mxu0 %v6926_v26  ;;  %v12274_v52 = vpop.permute.xlu1 %7101  ;;  %v12276_v14 = vpop.permute.xlu0 %7093  ;;  %6802 = vmatprep.mubr.bf16.mxu0 %v12869_v13 }
 0x9c3   : > { %v7123_v61 = vsel %vm1628_vm2, %v12276_v14, %v12263_v35 }
 0x9c4   : > { %7776 = vperm.xlu0 %9433, %v5695_v8   ;;  %v9582_v8 = vld [vmem:[%s12752_s12 + $0xd0] sm:$0xff]  }
 0x9c5   : > { %6961 = vmatpush1.bf16.msra.mxu0 %v6925_v55  ;;  %7711 = vperm.xlu1 %9434, %v5686_v12   ;;  %v7854_v12 = vld [vmem:[%s12756_s16 + $0x28] sm:$0xff] }
 0x9c6   : > { %6962 = vmatprep.subr.bf16.mxu0 %v6928_v42  ;;  %v12290_v50 = vpop.permute.xlu1 %7099  ;;  %v7104_v9 = vpop.permute.xlu0 %7103 }
 0x9c7   : > { %v7126_v15 = vsel %vm1628_vm2, %v12274_v52, %v7104_v9  ;;  %v7125_v26 = vsel %vm1628_vm2, %v12290_v50, %v12274_v52  ;;  %v7855_v52 = vld [vmem:[%s12756_s16 + $0x30] sm:$0xff]  ;;  %v7856_v50 = vld [vmem:[%s12756_s16 + $0x38] sm:$0xff] }
 0x9c8   : > { %8697 = vmatmul.mubr.msk.bf16.gmra.mrb[40].mxu0 %vm5999_vm3, %v9578_v4  ;;  %7716 = vperm.xlu0 %9433, %v5687_v63  }
 0x9c9   : > { %6963 = vmatpush1.bf16.msra.mxu0 %v6927_v17  ;;  %7781 = vperm.xlu1 %9434, %v5696_v47   ;;  %v7857_v47 = vld [vmem:[%s12756_s16 + $0x40] sm:$0xff] }
 0x9ca   : > { %7158 = vmatprep.subr.bf16.mxu0 %v7124_v33  ;;  %v7110_v41 = vpop.permute.xlu1 %7109  ;;  %v12302_v58 = vpop.permute.xlu0 %7107  ;;  %6812 = vmatprep.mubr.bf16.mxu0 %v12869_v13 }
 0x9cb   : > { %v7128_v14 = vsel %vm1628_vm2, %v12302_v58, %v7110_v41 }
 0x9cc   : > { %7786 = vperm.xlu0 %9433, %v5697_v53   ;;  %v9583_v53 = vld [vmem:[%s12752_s12 + $0xd8] sm:$0xff]  }
 0x9cd   : > { %3984 = vperm.xlu1 %9434, %v3974_v40  }
 0x9ce   : > { %v12314_v46 = vpop.permute.xlu1 %7113  ;;  %v7106_v20 = vpop.permute.xlu0 %7105 }
 0x9cf   : > { %v7127_v42 = vsel %vm1628_vm2, %v7106_v20, %v12302_v58  ;;  %v7858_v58 = vld [vmem:[%s12756_s16 + $0x48] sm:$0xff] }
 0x9d0   : > { %8698 = vmatmul.mubr.msk.bf16.gmra.mrb[44].mxu0 %vm5999_vm3, %v9579_v34  ;;  %3989 = vperm.xlu0 %9433, %v3975_v45  }
 0x9d1   : > { %3994 = vperm.xlu1 %9434, %v3976_v57   ;;  %6822 = vmatprep.mubr.bf16.mxu0 %v12869_v13 }
 0x9d2   : > { %v7112_v10 = vpop.permute.xlu1 %7111  ;;  %v7116_v16 = vpop.permute.xlu0 %7115 }
 0x9d3   : > { %v7130_v63 = vsel %vm1628_vm2, %v12314_v46, %v7116_v16  ;;  %v7129_v33 = vsel %vm1628_vm2, %v7112_v10, %v12314_v46 }
 0x9d4   : > { %3999 = vperm.xlu0 %9433, %v3977_v44   ;;  %v9584_v44 = vld [vmem:[%s12752_s12 + $0xe0] sm:$0xff]  }
 0x9d5   : > { %4004 = vperm.xlu1 %9434, %v3978_v37  }
 0x9d6   : > { %v7122_v1 = vpop.permute.xlu1 %7121  ;;  %v12333_v18 = vpop.permute.xlu0 %7119 }
 0x9d7   : > { %v7132_v41 = vsel %vm1628_vm2, %v12333_v18, %v7122_v1 }
 0x9d8   : > { %8699 = vmatmul.mubr.msk.bf16.gmra.mrb[48].mxu0 %vm5999_vm3, %v9580_v32  ;;  %4009 = vperm.xlu0 %9433, %v3979_v38   ;;  %v9585_v38 = vld [vmem:[%s12752_s12 + $0xe8] sm:$0xff]  }
 0x9d9   : > { %4014 = vperm.xlu1 %9434, %v3980_v43   ;;  %6986 = vmatprep.mubr.bf16.mxu0 %v12869_v13  ;;  %v9586_v43 = vld [vmem:[%s12752_s12 + $0xf0] sm:$0xff]  }
 0x9da   : > { %v7118_v54 = vpop.permute.xlu0 %7117 }
 0x9db   : > { %v12346_v11 = vpop.permute.xlu1 %7299  ;;  %v7131_v45 = vsel %vm1628_vm2, %v7118_v54, %v12333_v18 }
 0x9dc   : > { %4019 = vperm.xlu0 %9433, %v3981_v51  }
 0x9dd   : > { %7861 = vperm.xlu1 %9434, %v7849_v29  }
 0x9de   : > { %v7302_v36 = vpop.permute.xlu0 %7301 }
 0x9df   : > { %v12357_v22 = vpop.permute.xlu1 %7297  ;;  %v7328_v46 = vsel %vm1779_vm4, %v12346_v11, %v7302_v36 }
 0x9e0   : > { %8715 = vmatmul.mubr.msk.bf16.vlgmr.msra.gmra.mrb[32].mxu0 %vm5999_vm3, %v9581_v5  ;;  %7866 = vperm.xlu0 %9433, %v7850_v23   ;;  %v7327_v54 = vsel %vm1779_vm4, %v12357_v22, %v12346_v11 }
 0x9e1   : > { %7159 = vmatpush1.bf16.msra.mxu0 %v7123_v61  ;;  %7871 = vperm.xlu1 %9434, %v7851_v6   ;;  %v9587_v6 = vld [vmem:[%s12752_s12 + $0xf8] sm:$0xff]  }
 0x9e2   : > { %7160 = vmatprep.subr.bf16.mxu0 %v7126_v15  ;;  %v12368_v59 = vpop.permute.xlu0 %7305  ;;  %6996 = vmatprep.mubr.bf16.mxu0 %v12869_v13 }
 0x9e3   : > { %v7308_v35 = vpop.permute.xlu1 %7307 }
 0x9e4   : > { %7876 = vperm.xlu0 %9433, %v7852_v56   ;;  %v7330_v5 = vsel %vm1779_vm4, %v12368_v59, %v7308_v35  ;;  %v9588_v35 = vld [vmem:[%s12752_s12 + $0x100] sm:$0xff]  }
 0x9e5   : > { %7161 = vmatpush1.bf16.msra.mxu0 %v7125_v26  ;;  %7881 = vperm.xlu1 %9434, %v7853_v27  }
 0x9e6   : > { %7162 = vmatprep.subr.bf16.mxu0 %v7128_v14  ;;  %v7304_v55 = vpop.permute.xlu0 %7303 }
 0x9e7   : > { %v7312_v4 = vpop.permute.xlu1 %7311  ;;  %v7329_v36 = vsel %vm1779_vm4, %v7304_v55, %v12368_v59 }
 0x9e8   : > { %8716 = vmatmul.mubr.msk.bf16.gmra.mrb[36].mxu0 %vm5999_vm3, %v9582_v8  ;;  %7886 = vperm.xlu0 %9433, %v7854_v12  }
 0x9e9   : > { %7163 = vmatpush1.bf16.msra.mxu0 %v7127_v42  ;;  %7891 = vperm.xlu1 %9434, %v7855_v52   ;;  %v9589_v52 = vld [vmem:[%s12752_s12 + $0x108] sm:$0xff]  }
 0x9ea   : > { %7164 = vmatprep.subr.bf16.mxu0 %v7130_v63  ;;  %v7314_v9 = vpop.permute.xlu0 %7313  ;;  %7006 = vmatprep.mubr.bf16.mxu0 %v12869_v13 }
 0x9eb   : > { %v7310_v17 = vpop.permute.xlu1 %7309  ;;  %v7332_v11 = vsel %vm1779_vm4, %v7312_v4, %v7314_v9  ;;  %v9590_v9 = vld [vmem:[%s12752_s12 + $0x110] sm:$0xff]  }
 0x9ec   : > { %7896 = vperm.xlu0 %9433, %v7856_v50   ;;  %v7331_v61 = vsel %vm1779_vm4, %v7310_v17, %v7312_v4 }
 0x9ed   : > { %7165 = vmatpush1.bf16.msra.mxu0 %v7129_v33  ;;  %7901 = vperm.xlu1 %9434, %v7857_v47  }
 0x9ee   : > { %7166 = vmatprep.subr.bf16.mxu0 %v7132_v41  ;;  %v7318_v40 = vpop.permute.xlu0 %7317  ;;  %v9591_v41 = vld [vmem:[%s12752_s12 + $0x118] sm:$0xff]  }
 0x9ef   : > { %v7320_v34 = vpop.permute.xlu1 %7319 }
 0x9f0   : > { %8717 = vmatmul.mubr.msk.bf16.gmra.mrb[40].mxu0 %vm5999_vm3, %v9583_v53  ;;  %7906 = vperm.xlu0 %9433, %v7858_v58   ;;  %v7334_v56 = vsel %vm1779_vm4, %v7318_v40, %v7320_v34 }
 0x9f1   : > { %7167 = vmatpush1.bf16.msra.mxu0 %v7131_v45  ;;  %7016 = vmatprep.mubr.bf16.mxu0 %v12869_v13 }
 0x9f2   : > { %7362 = vmatprep.subr.bf16.mxu0 %v7328_v46  ;;  %v7316_v20 = vpop.permute.xlu0 %7315 }
 0x9f3   : > { %v7324_v57 = vpop.permute.xlu1 %7323  ;;  %v7333_v59 = vsel %vm1779_vm4, %v7316_v20, %v7318_v40 }
 0x9f6   : > { %v7326_v10 = vpop.permute.xlu0 %7325 }
 0x9f7   : > { %v7322_v16 = vpop.permute.xlu1 %7321  ;;  %v7336_v26 = vsel %vm1779_vm4, %v7324_v57, %v7326_v10 }
 0x9f8   : > { %8718 = vmatmul.mubr.msk.bf16.gmra.mrb[44].mxu0 %vm5999_vm3, %v9584_v44  ;;  %v7335_v14 = vsel %vm1779_vm4, %v7322_v16, %v7324_v57  ;;  %v9592_v44 = vld [vmem:[%s12752_s12 + $0x120] sm:$0xff]  }
 0x9f9   : > { %7026 = vmatprep.mubr.bf16.mxu0 %v12869_v13 }
 0x9fa   : > { %v7504_v37 = vpop.permute.xlu0 %7503 }
 0x9fb   : > { %v7506_v32 = vpop.permute.xlu1 %7505 }
 0x9fc   : > { %v7532_v12 = vsel %vm1930_vm5, %v7504_v37, %v7506_v32 }
 0x9fe   : > { %v7502_v1 = vpop.permute.xlu0 %7501 }
 0x9ff   : > { %v12426_v18 = vpop.permute.xlu1 %7509  ;;  %v7531_v40 = vsel %vm1930_vm5, %v7502_v1, %v7504_v37 }
 0xa00   : > { %8719 = vmatmul.mubr.msk.bf16.gmra.mrb[48].mxu0 %vm5999_vm3, %v9585_v38 }
 0xa01   : > { %7190 = vmatprep.mubr.bf16.mxu0 %v12869_v13 }
 0xa02   : > { %v7512_v51 = vpop.permute.xlu0 %7511 }
 0xa03   : > { %v7508_v29 = vpop.permute.xlu1 %7507  ;;  %v7534_v45 = vsel %vm1930_vm5, %v12426_v18, %v7512_v51  ;;  %v9593_v51 = vld [vmem:[%s12752_s12 + $0x128] sm:$0xff]  }
 0xa04   : > { %v7533_v20 = vsel %vm1930_vm5, %v7508_v29, %v12426_v18 }
 0xa06   : > { %v7516_v23 = vpop.permute.xlu0 %7515 }
 0xa07   : > { %v7518_v22 = vpop.permute.xlu1 %7517 }
 0xa08   : > { %8735 = vmatmul.mubr.msk.bf16.vlgmr.msra.gmra.mrb[32].mxu0 %vm5999_vm3, %v9586_v43  ;;  %v7536_v10 = vsel %vm1930_vm5, %v7516_v23, %v7518_v22 }
 0xa09   : > { %7363 = vmatpush1.bf16.msra.mxu0 %v7327_v54  ;;  %7200 = vmatprep.mubr.bf16.mxu0 %v12869_v13 }
 0xa0a   : > { %7364 = vmatprep.subr.bf16.mxu0 %v7330_v5  ;;  %v7514_v15 = vpop.permute.xlu0 %7513 }
 0xa0b   : > { %v7522_v27 = vpop.permute.xlu1 %7521  ;;  %v7535_v37 = vsel %vm1930_vm5, %v7514_v15, %v7516_v23 }
 0xa0d   : > { %7365 = vmatpush1.bf16.msra.mxu0 %v7329_v36 }
 0xa0e   : > { %7366 = vmatprep.subr.bf16.mxu0 %v7332_v11  ;;  %v7524_v8 = vpop.permute.xlu0 %7523  ;;  %v9594_v11 = vld [vmem:[%s12752_s12 + $0x130] sm:$0xff]  }
 0xa0f   : > { %v7520_v55 = vpop.permute.xlu1 %7519  ;;  %v7538_v38 = vsel %vm1930_vm5, %v7522_v27, %v7524_v8 }
 0xa10   : > { %8736 = vmatmul.mubr.msk.bf16.gmra.mrb[36].mxu0 %vm5999_vm3, %v9587_v6  ;;  %v7537_v18 = vsel %vm1930_vm5, %v7520_v55, %v7522_v27 }
 0xa11   : > { %7367 = vmatpush1.bf16.msra.mxu0 %v7331_v61  ;;  %7210 = vmatprep.mubr.bf16.mxu0 %v12869_v13 }
 0xa12   : > { %7368 = vmatprep.subr.bf16.mxu0 %v7334_v56  ;;  %v7528_v4 = vpop.permute.xlu0 %7527 }
 0xa13   : > { %v7530_v42 = vpop.permute.xlu1 %7529 }
 0xa14   : > { %v7540_v54 = vsel %vm1930_vm5, %v7528_v4, %v7530_v42 }
 0xa15   : > { %7369 = vmatpush1.bf16.msra.mxu0 %v7333_v59  ;;  %v9595_v59 = vld [vmem:[%s12752_s12 + $0x138] sm:$0xff]  }
 0xa16   : > { %7370 = vmatprep.subr.bf16.mxu0 %v7336_v26  ;;  %v7526_v63 = vpop.permute.xlu0 %7525 }
 0xa17   : > { %v7539_v5 = vsel %vm1930_vm5, %v7526_v63, %v7528_v4 }
 0xa18   : > { %8737 = vmatmul.mubr.msk.bf16.gmra.mrb[40].mxu0 %vm5999_vm3, %v9588_v35 }
 0xa19   : > { %7371 = vmatpush1.bf16.msra.mxu0 %v7335_v14  ;;  %7220 = vmatprep.mubr.bf16.mxu0 %v12869_v13 }
 0xa1a   : > { %7566 = vmatprep.subr.bf16.mxu0 %v7532_v12 }
 0xa20   : > { %8738 = vmatmul.mubr.msk.bf16.gmra.mrb[44].mxu0 %vm5999_vm3, %v9589_v52 }
 0xa21   : > { %7230 = vmatprep.mubr.bf16.mxu0 %v12869_v13 }
 0xa24   : > { %v12462_v50 = vpop.permute.xlu1 %7671 }
 0xa27   : > { %v12467_v47 = vpop.permute.xlu0 %7676 }
 0xa28   : > { %v12469_v17 = vpop.permute.xlu1 %7741  ;;  %8739 = vmatmul.mubr.msk.bf16.gmra.mrb[48].mxu0 %vm5999_vm3, %v9590_v9 }
 0xa29   : > { %7394 = vmatprep.mubr.bf16.mxu0 %v12869_v13 }
 0xa2b   : > { %v12473_v33 = vpop.permute.xlu0 %7746 }
 0xa2c   : > { %v12475_v53 = vpop.permute.xlu1 %7681 }
 0xa2f   : > { %v12480_v58 = vpop.permute.xlu0 %7686 }
 0xa30   : > { %v12483_v34 = vpop.permute.xlu1 %7751  ;;  %8755 = vmatmul.mubr.msk.bf16.vlgmr.msra.gmra.mrb[32].mxu0 %vm5999_vm3, %v9591_v41 }
 0xa31   : > { %7567 = vmatpush1.bf16.msra.mxu0 %v7531_v40  ;;  %7404 = vmatprep.mubr.bf16.mxu0 %v12869_v13 }
 0xa32   : > { %7568 = vmatprep.subr.bf16.mxu0 %v7534_v45 }
 0xa33   : > { %v12489_v46 = vpop.permute.xlu0 %7756 }
 0xa34   : > { %v12493_v57 = vpop.permute.xlu1 %7691 }
 0xa35   : > { %7569 = vmatpush1.bf16.msra.mxu0 %v7533_v20 }
 0xa36   : > { %7570 = vmatprep.subr.bf16.mxu0 %v7536_v10 }
 0xa37   : > { %v12499_v16 = vpop.permute.xlu0 %7696 }
 0xa38   : > { %v12502_v32 = vpop.permute.xlu1 %7761  ;;  %8756 = vmatmul.mubr.msk.bf16.gmra.mrb[36].mxu0 %vm5999_vm3, %v9592_v44 }
 0xa39   : > { %7571 = vmatpush1.bf16.msra.mxu0 %v7535_v37  ;;  %7414 = vmatprep.mubr.bf16.mxu0 %v12869_v13 }
 0xa3a   : > { %7572 = vmatprep.subr.bf16.mxu0 %v7538_v38 }
 0xa3b   : > { %v12507_v1 = vpop.permute.xlu0 %7766 }
 0xa3c   : > { %v12510_v43 = vpop.permute.xlu1 %7701 }
 0xa3d   : > { %7573 = vmatpush1.bf16.msra.mxu0 %v7537_v18 }
 0xa3e   : > { %7574 = vmatprep.subr.bf16.mxu0 %v7540_v54 }
 0xa3f   : > { %v12516_v29 = vpop.permute.xlu0 %7706 }
 0xa40   : > { %v12519_v23 = vpop.permute.xlu1 %7771  ;;  %8757 = vmatmul.mubr.msk.bf16.gmra.mrb[40].mxu0 %vm5999_vm3, %v9593_v51 }
 0xa41   : > { %7575 = vmatpush1.bf16.msra.mxu0 %v7539_v5  ;;  %7424 = vmatprep.mubr.bf16.mxu0 %v12869_v13 }
 0xa43   : > { %v12523_v36 = vpop.permute.xlu0 %7776 }
 0xa44   : > { %v12525_v6 = vpop.permute.xlu1 %7711 }
 0xa47   : > { %v12531_v22 = vpop.permute.xlu0 %7716 }
 0xa48   : > { %v12533_v61 = vpop.permute.xlu1 %7781  ;;  %8758 = vmatmul.mubr.msk.bf16.gmra.mrb[44].mxu0 %vm5999_vm3, %v9594_v11 }
 0xa49   : > { %7434 = vmatprep.mubr.bf16.mxu0 %v12869_v13 }
 0xa4b   : > { %v12539_v15 = vpop.permute.xlu0 %7786 }
 0xa4c   : > { %v3985_v56 = vpop.permute.xlu1 %3984 }
 0xa4d   : > { %v4089_v27 = vadd.f32 %v12019_v25, %v3985_v56  ;;  %v4091_v35 = vadd.f32 %v12025_v28, %v3985_v56 }
 0xa4f   : > { %4127 = vst [vmem:[%s12546_s24] sm:$0xff] %v4089_v27  ;;  %4128 = vst [vmem:[%s12546_s24 + $0x8] sm:$0xff] %v4091_v35  ;;  %v3990_v26 = vpop.permute.xlu0 %3989 }
 0xa50   : > { %v3995_v8 = vpop.permute.xlu1 %3994  ;;  %8759 = vmatmul.mubr.msk.bf16.gmra.mrb[48].mxu0 %vm5999_vm3, %v9595_v59  ;;  %v4093_v14 = vadd.f32 %v12027_v2, %v3990_v26  ;;  %v4095_v25 = vadd.f32 %v12030_v0, %v3990_v26  ;;  %v9596_v0 = vld [vmem:[%s12752_s12 + $0x140] sm:$0xff]  }
 0xa51   : > { %v4099_v28 = vadd.f32 %v12038_v3, %v3995_v8  ;;  %v4101_v12 = vadd.f32 %v12044_v62, %v3995_v8  ;;  %7598 = vmatprep.mubr.bf16.mxu0 %v12869_v13 }
 0xa52   : > { %4129 = vst [vmem:[%s12546_s24 + $0x10] sm:$0xff] %v4093_v14  ;;  %4130 = vst [vmem:[%s12546_s24 + $0x18] sm:$0xff] %v4095_v25 }
 0xa53   : > { %4131 = vst [vmem:[%s12546_s24 + $0x20] sm:$0xff] %v4099_v28  ;;  %4132 = vst [vmem:[%s12546_s24 + $0x28] sm:$0xff] %v4101_v12  ;;  %v4000_v55 = vpop.permute.xlu0 %3999 }
 0xa54   : > { %v4005_v52 = vpop.permute.xlu1 %4004  ;;  %v4103_v2 = vadd.f32 %v12046_v24, %v4000_v55  ;;  %v4105_v4 = vadd.f32 %v12049_v49, %v4000_v55 }
 0xa55   : > { %v4109_v3 = vadd.f32 %v12056_v39, %v4005_v52  ;;  %v4111_v62 = vadd.f32 %v12065_v30, %v4005_v52 }
 0xa56   : > { %4133 = vst [vmem:[%s12546_s24 + $0x30] sm:$0xff] %v4103_v2  ;;  %4134 = vst [vmem:[%s12546_s24 + $0x38] sm:$0xff] %v4105_v4 }
 0xa57   : > { %4135 = vst [vmem:[%s12546_s24 + $0x40] sm:$0xff] %v4109_v3  ;;  %4136 = vst [vmem:[%s12546_s24 + $0x48] sm:$0xff] %v4111_v62  ;;  %v4010_v42 = vpop.permute.xlu0 %4009 }
 0xa58   : > { %v4015_v24 = vpop.permute.xlu1 %4014  ;;  %8775 = vmatmul.mubr.msk.bf16.vlgmr.msra.gmra.mrb[32].mxu0 %vm5999_vm3, %v9596_v0  ;;  %v4113_v49 = vadd.f32 %v12067_v48, %v4010_v42  ;;  %v4115_v63 = vadd.f32 %v12071_v60, %v4010_v42  ;;  %v9597_v48 = vld [vmem:[%s12752_s12 + $0x148] sm:$0xff]   ;;  %v9598_v60 = vld [vmem:[%s12752_s12 + $0x150] sm:$0xff]  }
 0xa59   : > { %v4119_v39 = vadd.f32 %v12080_v21, %v4015_v24  ;;  %v4121_v9 = vadd.f32 %v12087_v7, %v4015_v24  ;;  %7608 = vmatprep.mubr.bf16.mxu0 %v12869_v13  ;;  %v9599_v21 = vld [vmem:[%s12752_s12 + $0x158] sm:$0xff]   ;;  %v9600_v7 = vld [vmem:[%s12752_s12 + $0x160] sm:$0xff]  }
 0xa5a   : > { %4137 = vst [vmem:[%s12546_s24 + $0x50] sm:$0xff] %v4113_v49  ;;  %4138 = vst [vmem:[%s12546_s24 + $0x58] sm:$0xff] %v4115_v63 }
 0xa5b   : > { %4139 = vst [vmem:[%s12546_s24 + $0x60] sm:$0xff] %v4119_v39  ;;  %4140 = vst [vmem:[%s12546_s24 + $0x68] sm:$0xff] %v4121_v9  ;;  %v4020_v30 = vpop.permute.xlu0 %4019 }
 0xa5c   : > { %v4123_v41 = vadd.f32 %v12091_v31, %v4020_v30  ;;  %v4125_v40 = vadd.f32 %v12094_v19, %v4020_v30 }
 0xa5e   : > { %4141 = vst [vmem:[%s12546_s24 + $0x70] sm:$0xff] %v4123_v41  ;;  %4142 = vst [vmem:[%s12546_s24 + $0x78] sm:$0xff] %v4125_v40 }
 0xa60   : > { %8776 = vmatmul.mubr.msk.bf16.gmra.mrb[36].mxu0 %vm5999_vm3, %v9597_v48 }
 0xa61   : > { %7618 = vmatprep.mubr.bf16.mxu0 %v12869_v13 }
 0xa68   : > { %8777 = vmatmul.mubr.msk.bf16.gmra.mrb[40].mxu0 %vm5999_vm3, %v9598_v60 }
 0xa69   : > { %7628 = vmatprep.mubr.bf16.mxu0 %v12869_v13 }
 0xa70   : > { %8778 = vmatmul.mubr.msk.bf16.gmra.mrb[44].mxu0 %vm5999_vm3, %v9599_v21 }
 0xa71   : > { %7638 = vmatprep.mubr.bf16.mxu0 %v12869_v13 }
 0xa78   : > { %8779 = vmatmul.mubr.msk.bf16.gmra.mrb[48].mxu0 %vm5999_vm3, %v9600_v7 }
 0xa79   : > { %7981 = vmatprep.mubr.bf16.mxu0 %v12869_v13 }
 0xb2b   : > { %v7600_v31 = vpop.f32.mrb[32].mxu0 }
 0xb2c   : > { %v7719_v19 = vmul.f32 %v12462_v50, %v7600_v31  ;;  %v7602_v45 = vpop.f32.mrb[33].mxu0 }
 0xb2d   : > { %v7720_v20 = vmul.f32 %v12462_v50, %v7602_v45  ;;  %v7604_v44 = vpop.f32.mrb[34].mxu0 }
 0xb2e   : > { %v7789_v10 = vadd.f32 %v12469_v17, %v7719_v19  ;;  %v7721_v37 = vmul.f32 %v12467_v47, %v7604_v44  ;;  %v7606_v38 = vpop.f32.mrb[35].mxu0 }
 0xb2f   : > { %v7790_v18 = vadd.f32 %v12469_v17, %v7720_v20  ;;  %v7722_v51 = vmul.f32 %v12467_v47, %v7606_v38 }
 0xb30   : > { %v7791_v54 = vadd.f32 %v12473_v33, %v7721_v37  ;;  %v7809_v11 = vmax.f32 %v7789_v10, 0.0 }
 0xb31   : > { %v7792_v5 = vadd.f32 %v12473_v33, %v7722_v51  ;;  %v7810_v59 = vmax.f32 %v7790_v18, 0.0 }
 0xb32   : > { %v7811_v56 = vmax.f32 %v7791_v54, 0.0 }
 0xb33   : > { %v7812_v27 = vmax.f32 %v7792_v5, 0.0  ;;  %v7610_v35 = vpop.f32.mrb[36].mxu0 }
 0xb34   : > { %v7839_v50 = vpack.c.bf16 %v7811_v56, %v7809_v11  ;;  %v7723_v26 = vmul.f32 %v12475_v53, %v7610_v35  ;;  %v7612_v8 = vpop.f32.mrb[37].mxu0 }
 0xb35   : > { %v7724_v14 = vmul.f32 %v12475_v53, %v7612_v8  ;;  %v7614_v25 = vpop.f32.mrb[38].mxu0  ;;  %v7840_v28 = vpack.c.bf16 %v7812_v27, %v7810_v59 }
 0xb36   : > { %v7793_v17 = vadd.f32 %v12483_v34, %v7723_v26  ;;  %v7725_v47 = vmul.f32 %v12480_v58, %v7614_v25  ;;  %v7616_v12 = vpop.f32.mrb[39].mxu0 }
 0xb37   : > { %v7794_v33 = vadd.f32 %v12483_v34, %v7724_v14  ;;  %v7726_v55 = vmul.f32 %v12480_v58, %v7616_v12  ;;  %7949 = vmatprep.subr.bf16.mxu0 %v7840_v28  ;;  %8794 = vmatprep.subr.bf16.mxu1 %v7840_v28 }
 0xb38   : > { %v7795_v52 = vadd.f32 %v12489_v46, %v7725_v47  ;;  %7950 = vmatpush1.bf16.msra.mxu0 %v7839_v50  ;;  %8799 = vmatpush1.bf16.msra.mxu1 %v7839_v50  ;;  %v7813_v53 = vmax.f32 %v7793_v17, 0.0 }
 0xb39   : > { %v7796_v2 = vadd.f32 %v12489_v46, %v7726_v55  ;;  %v7814_v0 = vmax.f32 %v7794_v33, 0.0 }
 0xb3a   : > { %v7815_v4 = vmax.f32 %v7795_v52, 0.0 }
 0xb3b   : > { %v7816_v3 = vmax.f32 %v7796_v2, 0.0  ;;  %v7620_v62 = vpop.f32.mrb[40].mxu0 }
 0xb3c   : > { %v7841_v42 = vpack.c.bf16 %v7815_v4, %v7813_v53  ;;  %v7727_v24 = vmul.f32 %v12493_v57, %v7620_v62  ;;  %v7622_v49 = vpop.f32.mrb[41].mxu0  ;;  %v9604_v53 = vld [vmem:[%s12755_s15 + $0x18] sm:$0xff]   ;;  %v9605_v4 = vld [vmem:[%s12755_s15 + $0x20] sm:$0xff]  }
 0xb3d   : > { %v7728_v34 = vmul.f32 %v12493_v57, %v7622_v49  ;;  %v7624_v58 = vpop.f32.mrb[42].mxu0  ;;  %v7842_v63 = vpack.c.bf16 %v7816_v3, %v7814_v0  ;;  %v7862_v0 = vpop.permute.xlu1 %7861 }
 0xb3e   : > { %v7797_v39 = vadd.f32 %v12502_v32, %v7727_v24  ;;  %v7729_v9 = vmul.f32 %v12499_v16, %v7624_v58  ;;  %v7626_v30 = vpop.f32.mrb[43].mxu0  ;;  %v7867_v3 = vpop.permute.xlu0 %7866 }
 0xb3f   : > { %v7798_v46 = vadd.f32 %v12502_v32, %v7728_v34  ;;  %v7730_v41 = vmul.f32 %v12499_v16, %v7626_v30  ;;  %7951 = vmatprep.subr.bf16.mxu0 %v7842_v63  ;;  %8795 = vmatprep.subr.bf16.mxu1 %v7842_v63 }
 0xb40   : > { %v7799_v40 = vadd.f32 %v12507_v1, %v7729_v9  ;;  %7952 = vmatpush1.bf16.msra.mxu0 %v7841_v42  ;;  %8800 = vmatpush1.bf16.msra.mxu1 %v7841_v42  ;;  %v7817_v57 = vmax.f32 %v7797_v39, 0.0 }
 0xb41   : > { %v7800_v48 = vadd.f32 %v12507_v1, %v7730_v41  ;;  %v7818_v21 = vmax.f32 %v7798_v46, 0.0  ;;  %v7872_v62 = vpop.permute.xlu1 %7871 }
 0xb42   : > { %v7819_v60 = vmax.f32 %v7799_v40, 0.0  ;;  %v7877_v42 = vpop.permute.xlu0 %7876 }
 0xb43   : > { %v7820_v7 = vmax.f32 %v7800_v48, 0.0  ;;  %v7630_v31 = vpop.f32.mrb[44].mxu0 }
 0xb44   : > { %v7843_v19 = vpack.c.bf16 %v7819_v60, %v7817_v57  ;;  %v7731_v45 = vmul.f32 %v12510_v43, %v7630_v31  ;;  %v7632_v20 = vpop.f32.mrb[45].mxu0 }
 0xb45   : > { %v7732_v32 = vmul.f32 %v12510_v43, %v7632_v20  ;;  %v7634_v16 = vpop.f32.mrb[46].mxu0  ;;  %v7844_v44 = vpack.c.bf16 %v7820_v7, %v7818_v21  ;;  %v7882_v7 = vpop.permute.xlu1 %7881 }
 0xb46   : > { %v7801_v10 = vadd.f32 %v12519_v23, %v7731_v45  ;;  %v7733_v37 = vmul.f32 %v12516_v29, %v7634_v16  ;;  %v7636_v38 = vpop.f32.mrb[47].mxu0  ;;  %v7887_v20 = vpop.permute.xlu0 %7886 }
 0xb47   : > { %v7802_v1 = vadd.f32 %v12519_v23, %v7732_v32  ;;  %v7734_v18 = vmul.f32 %v12516_v29, %v7636_v38  ;;  %7953 = vmatprep.subr.bf16.mxu0 %v7844_v44  ;;  %8796 = vmatprep.subr.bf16.mxu1 %v7844_v44 }
 0xb48   : > { %v7803_v51 = vadd.f32 %v12523_v36, %v7733_v37  ;;  %7954 = vmatpush1.bf16.msra.mxu0 %v7843_v19  ;;  %8801 = vmatpush1.bf16.msra.mxu1 %v7843_v19  ;;  %v7821_v43 = vmax.f32 %v7801_v10, 0.0 }
 0xb49   : > { %v7804_v54 = vadd.f32 %v12523_v36, %v7734_v18  ;;  %v7822_v11 = vmax.f32 %v7802_v1, 0.0  ;;  %v7892_v38 = vpop.permute.xlu1 %7891 }
 0xb4a   : > { %v7823_v5 = vmax.f32 %v7803_v51, 0.0 }
 0xb4b   : > { %v7824_v56 = vmax.f32 %v7804_v54, 0.0  ;;  %v7640_v59 = vpop.f32.mrb[48].mxu0  ;;  %v7897_v54 = vpop.permute.xlu0 %7896 }
 0xb4c   : > { %v7845_v27 = vpack.c.bf16 %v7823_v5, %v7821_v43  ;;  %v7735_v35 = vmul.f32 %v12525_v6, %v7640_v59  ;;  %v7642_v50 = vpop.f32.mrb[49].mxu0 }
 0xb4d   : > { %v7736_v23 = vmul.f32 %v12525_v6, %v7642_v50  ;;  %v7644_v29 = vpop.f32.mrb[50].mxu0  ;;  %v7846_v26 = vpack.c.bf16 %v7824_v56, %v7822_v11 }
 0xb4e   : > { %v7805_v8 = vadd.f32 %v12533_v61, %v7735_v35  ;;  %v7737_v14 = vmul.f32 %v12531_v22, %v7644_v29  ;;  %v7646_v25 = vpop.f32.mrb[51].mxu0 }
 0xb4f   : > { %v7806_v36 = vadd.f32 %v12533_v61, %v7736_v23  ;;  %v7738_v28 = vmul.f32 %v12531_v22, %v7646_v25  ;;  %7955 = vmatprep.subr.bf16.mxu0 %v7846_v26  ;;  %8797 = vmatprep.subr.bf16.mxu1 %v7846_v26  ;;  %v9601_v22 = vld [vmem:[%s12755_s15] sm:$0xff]   ;;  %v9602_v61 = vld [vmem:[%s12755_s15 + $0x8] sm:$0xff]   ;;  %v7907_v29 = vpop.permute.xlu0 %7906 }
 0xb50   : > { %v7807_v17 = vadd.f32 %v12539_v15, %v7737_v14  ;;  %7956 = vmatpush1.bf16.msra.mxu0 %v7845_v27  ;;  %8802 = vmatpush1.bf16.msra.mxu1 %v7845_v27  ;;  %v7825_v6 = vmax.f32 %v7805_v8, 0.0  ;;  %v7902_v27 = vpop.permute.xlu1 %7901 }
 0xb51   : > { %v7808_v47 = vadd.f32 %v12539_v15, %v7738_v28  ;;  %v7826_v33 = vmax.f32 %v7806_v36, 0.0  ;;  %v9603_v15 = vld [vmem:[%s12755_s15 + $0x10] sm:$0xff]  }
 0xb52   : > { %v7827_v12 = vmax.f32 %v7807_v17, 0.0 }
 0xb53   : > { %v7828_v55 = vmax.f32 %v7808_v47, 0.0 }
 0xb54   : > { %v7847_v52 = vpack.c.bf16 %v7827_v12, %v7825_v6 }
 0xb55   : > { %v7848_v2 = vpack.c.bf16 %v7828_v55, %v7826_v33 }
 0xb57   : > { %7957 = vmatprep.subr.bf16.mxu0 %v7848_v2  ;;  %8798 = vmatprep.subr.bf16.mxu1 %v7848_v2 }
 0xb58   : > { %7958 = vmatpush1.bf16.msra.mxu0 %v7847_v52  ;;  %8803 = vmatpush1.bf16.msra.mxu1 %v7847_v52 }
 0xb5b   : > { %8785 = vmatmul.mubr.msk.bf16.vlgmr.msra.gmra.mrb[52].mxu0 %vm5999_vm3, %v9601_v22  ;;  %8786 = vmatmul.mubr.msk.bf16.vlgmr.msra.gmra.mrb[36].mxu1 %vm5999_vm3, %v9602_v61 }
 0xb5c   : > { %8001 = vmatprep.mubr.bf16.mxu1 %v12869_v13 }
 0xb63   : > { %8787 = vmatmul.mubr.msk.bf16.gmra.mrb[40].mxu1 %vm5999_vm3, %v9603_v15 }
 0xb64   : > { %8011 = vmatprep.mubr.bf16.mxu1 %v12869_v13 }
 0xb6b   : > { %8788 = vmatmul.mubr.msk.bf16.gmra.mrb[44].mxu1 %vm5999_vm3, %v9604_v53 }
 0xb6c   : > { %8021 = vmatprep.mubr.bf16.mxu1 %v12869_v13 }
 0xb73   : > { %8789 = vmatmul.mubr.msk.bf16.gmra.mrb[48].mxu1 %vm5999_vm3, %v9605_v4 }
 0xc2e   : > { %v7983_v24 = vpop.f32.mrb[52].mxu0  ;;  %v7993_v49 = vpop.f32.mrb[36].mxu1 }
 0xc2f   : > { %v7984_v34 = vadd.f32 %v7983_v24, %v7862_v0  ;;  %v7994_v58 = vadd.f32 %v7993_v49, %v7872_v62  ;;  %v7985_v63 = vpop.f32.mrb[53].mxu0  ;;  %v7995_v13 = vpop.f32.mrb[37].mxu1 }
 0xc30   : > { %v7986_v39 = vadd.f32 %v7985_v63, %v7862_v0  ;;  %v7996_v9 = vadd.f32 %v7995_v13, %v7872_v62  ;;  %v7987_v30 = vpop.f32.mrb[54].mxu0  ;;  %v7997_v46 = vpop.f32.mrb[38].mxu1 }
 0xc31   : > { %8032 = vst [vmem:[%s12546_s24 + $0x80] sm:$0xff] %v7984_v34  ;;  %8036 = vst [vmem:[%s12546_s24 + $0xa0] sm:$0xff] %v7994_v58  ;;  %v7988_v41 = vadd.f32 %v7987_v30, %v7867_v3  ;;  %v7998_v40 = vadd.f32 %v7997_v46, %v7877_v42  ;;  %v7989_v48 = vpop.f32.mrb[55].mxu0  ;;  %v7999_v57 = vpop.f32.mrb[39].mxu1 }
 0xc32   : > { %8033 = vst [vmem:[%s12546_s24 + $0x88] sm:$0xff] %v7986_v39  ;;  %8037 = vst [vmem:[%s12546_s24 + $0xa8] sm:$0xff] %v7996_v9  ;;  %v7990_v60 = vadd.f32 %v7989_v48, %v7867_v3  ;;  %v8000_v21 = vadd.f32 %v7999_v57, %v7877_v42 }
 0xc33   : > { %8034 = vst [vmem:[%s12546_s24 + $0x90] sm:$0xff] %v7988_v41  ;;  %8038 = vst [vmem:[%s12546_s24 + $0xb0] sm:$0xff] %v7998_v40 }
 0xc34   : > { %8035 = vst [vmem:[%s12546_s24 + $0x98] sm:$0xff] %v7990_v60  ;;  %8039 = vst [vmem:[%s12546_s24 + $0xb8] sm:$0xff] %v8000_v21 }
 0xc36   : > { %v8003_v31 = vpop.f32.mrb[40].mxu1 }
 0xc37   : > { %v8004_v19 = vadd.f32 %v8003_v31, %v7882_v7  ;;  %v8005_v45 = vpop.f32.mrb[41].mxu1 }
 0xc38   : > { %v8006_v32 = vadd.f32 %v8005_v45, %v7882_v7  ;;  %v8007_v16 = vpop.f32.mrb[42].mxu1 }
 0xc39   : > { %8040 = vst [vmem:[%s12546_s24 + $0xc0] sm:$0xff] %v8004_v19  ;;  %v8008_v44 = vadd.f32 %v8007_v16, %v7887_v20  ;;  %v8009_v10 = vpop.f32.mrb[43].mxu1 }
 0xc3a   : > { %8041 = vst [vmem:[%s12546_s24 + $0xc8] sm:$0xff] %v8006_v32  ;;  %v8010_v37 = vadd.f32 %v8009_v10, %v7887_v20 }
 0xc3b   : > { %8042 = vst [vmem:[%s12546_s24 + $0xd0] sm:$0xff] %v8008_v44 }
 0xc3c   : > { %8043 = vst [vmem:[%s12546_s24 + $0xd8] sm:$0xff] %v8010_v37 }
 0xc3e   : > { %v8013_v1 = vpop.f32.mrb[44].mxu1 }
 0xc3f   : > { %v8014_v18 = vadd.f32 %v8013_v1, %v7892_v38  ;;  %v8015_v51 = vpop.f32.mrb[45].mxu1 }
 0xc40   : > { %v8016_v43 = vadd.f32 %v8015_v51, %v7892_v38  ;;  %v8017_v5 = vpop.f32.mrb[46].mxu1 }
 0xc41   : > { %8044 = vst [vmem:[%s12546_s24 + $0xe0] sm:$0xff] %v8014_v18  ;;  %v8018_v11 = vadd.f32 %v8017_v5, %v7897_v54  ;;  %v8019_v56 = vpop.f32.mrb[47].mxu1 }
 0xc42   : > { %8045 = vst [vmem:[%s12546_s24 + $0xe8] sm:$0xff] %v8016_v43  ;;  %v8020_v59 = vadd.f32 %v8019_v56, %v7897_v54 }
 0xc43   : > { %8046 = vst [vmem:[%s12546_s24 + $0xf0] sm:$0xff] %v8018_v11 }
 0xc44   : > { %8047 = vst [vmem:[%s12546_s24 + $0xf8] sm:$0xff] %v8020_v59 }
 0xc46   : > { %v8023_v35 = vpop.f32.mrb[48].mxu1 }
 0xc47   : > { %v8024_v50 = vadd.f32 %v8023_v35, %v7902_v27  ;;  %v8025_v23 = vpop.f32.mrb[49].mxu1 }
 0xc48   : > { %v8026_v26 = vadd.f32 %v8025_v23, %v7902_v27  ;;  %v8027_v8 = vpop.f32.mrb[50].mxu1 }
 0xc49   : > { %8048 = vst [vmem:[%s12546_s24 + $0x100] sm:$0xff] %v8024_v50  ;;  %v8028_v14 = vadd.f32 %v8027_v8, %v7907_v29  ;;  %v8029_v25 = vpop.f32.mrb[51].mxu1 }
 0xc4a   : > { %8049 = vst [vmem:[%s12546_s24 + $0x108] sm:$0xff] %v8026_v26  ;;  %v8030_v36 = vadd.f32 %v8029_v25, %v7907_v29 }
 0xc4b   : > { %8050 = vst [vmem:[%s12546_s24 + $0x110] sm:$0xff] %v8028_v14 }
 0xc4c   : > { %8051 = vst [vmem:[%s12546_s24 + $0x118] sm:$0xff] %v8030_v36 }
 0xc4d   : > { %9619 = shalt.err (!%p9616_p3)
}
 0xc4e   : > { %s9620_s29 = scalar_lea.hbm %s12690_s20, 4608  ;;  %s9624_s17 = scalar_lea.hbm %s12902_s4, 9216 }
 0xc4f   : > { %p9621_p4 = scmp.ne.s32.totalorder %s12690_s20, %s9620_s29  ;;  %p9625_p9 = scmp.lt.u32.totalorder %s12690_s20, %s12902_s4 }
 0xc50   : > { %p9626_p10 = scmp.lt.u32.totalorder %s9624_s17, %s9620_s29  ;;  %p9628_p12 = scmp.lt.u32.totalorder %s9620_s29, %s12690_s20 }
 0xc51   : > { %p9622_p7 = pnand %p9621_p4, %p9811_p5 }
 0xc52   : > { %p9627_p11 = por %p9626_p10, %p9625_p9 }
 0xc53   : > { %p9623_p8 = pneg %p9622_p7 }
 0xc54   : > { %p9629_p13 = por %p9628_p12, %p9627_p11 }
 0xc56   : > { %p9630_p0 = pnand %p9629_p13, %p9623_p8 }
 0xc58   : > { %9633 = shalt.err (!%p9630_p0)
}
 0xc59   : > { %s9681_s28 = smov 256   ;;  %s9682_s22 = smov 16  }
 0xc5a   : > { %9382 = dma.vmem_to_hbm [thread:$0]  (%p9811_p5), %s12692_s1, 4608, %s12690_s20, %s12699_s9, %s9681_s28, %s9681_s28, %s9682_s22  }
 0xc5b PF: > { %s12903_s30 = sld [smem:[#allocation7_spill]]  ;;  %s12904_s21 = sld [smem:[#allocation5_spill]] }
 0xc61   : > { %p9388_p1 = scmp.ge.s32.totalorder %s12903_s30, 2  ;;  %s8081_s0 = sand.u32 1, %s12904_s21  }
 0xc62   : > { %s8082_s3 = scalar_lea.sflag [#allocation3], %s8081_s0 }
 0xc63   : > { %p9385_p2 = pnand %p9388_p1, %p9815_p6 }
 0xc65   : > { %9651 = dma.done.wait (!%p9385_p2), %s8082_s3, 4608  }
 0xc66   : > { %9653 = vsyncadd (!%p9385_p2), %s8082_s3, 4294962688  ;;  %s12906_s27 = sld [smem:[#allocation9_spill]]  ;;  %s12907_s18 = sld [smem:[#allocation6_spill]] }
 0xc67   : > { %s12908_s26 = sld [smem:[#allocation10_spill]]  ;;  %s12909_s24 = smov %s9660_s25 }
 0xc6c   : > { %p27_p3 = scmp.ge.s32.totalorder %s12906_s27, 4   ;;  %s12910_s25 = smov %s12907_s18 }
 0xc6e   :  { %29 = sbr.rel (!%p27_p3) target bundleno = 11 (0xb), region = 155 }
 0xc75   :  { %8087 = vsyncpa [#allocation3], 1 }
 0xc76   :  { %8089 = vsyncpa [#allocation3 + $0x1], 1 }

</bundles_post_ra>
